<compile_context>
chip_gen: v7x
topology: tpu7x:2x2x1
jax: 0.10.0
libtpu: 0.0.40
codegen_flags: <defaults>
</compile_context>

<pallas_src>
import jax
import jax.numpy as jnp
from jax import lax
from jax.experimental import pallas as pl
from jax.experimental.pallas import tpu as pltpu

MXU_DTYPE = jnp.float32   # set to jnp.bfloat16 on v6e/v7x for large, compute-bound batches

# Flat-layout geometry (master grid row stride W0 = 32 = input width).
W0 = 32
L1 = 27 * W0 + 27 + 1           # 892: conv1 outputs live at f = 32*h + w    (h, w in [0,28))
LM1 = 64 * 13 + 2 * 13 + 1      # 859: pool1 window-max positions read by conv2
L2 = 64 * 9 + 2 * 9 + 1         # 595: conv2 outputs live at g = 64*h2 + 2*w2 (h2,w2 in [0,10))
LM2 = 128 * 4 + 4 * 4 + 1       # 529: pool2 window-max positions read by fc1


def _net_kernel(x_ref, w1_ref, b1_ref, w2_ref, b2_ref, s3_ref,
                wf1_ref, bf1_ref, wf2_ref, bf2_ref, wf3_ref, bf3_ref, o_ref):
    f32 = jnp.float32
    x = x_ref[0].astype(MXU_DTYPE)                        # (3, 1024) = (Cin, 32*32)

    # ---- conv1 (5x5, 3->6) + bias + ReLU: 25 accumulated dots over shifted flat views.
    a1 = jnp.zeros((6, L1), f32)
    for ki in range(5):
        for kj in range(5):
            t = ki * 5 + kj
            d = ki * W0 + kj
            a1 = a1 + jnp.dot(w1_ref[t].astype(MXU_DTYPE), x[:, d:d + L1],
                              preferred_element_type=f32)
    a1 = jnp.maximum(a1 + b1_ref[...], 0.0)               # (6, 892); valid at f = 32h + w

    # ---- maxpool1 2x2: window max only; the /2 downsample is folded into conv2 offsets.
    m1 = jnp.maximum(jnp.maximum(a1[:, 0:LM1], a1[:, 1:1 + LM1]),
                     jnp.maximum(a1[:, W0:W0 + LM1], a1[:, W0 + 1:W0 + 1 + LM1]))
    m1 = m1.astype(MXU_DTYPE)                             # pool1[c,i,j] sits at 64*i + 2*j

    # ---- conv2 (5x5, 6->16) + bias + ReLU on the strided pooled grid.
    a2 = jnp.zeros((16, L2), f32)
    for ki in range(5):
        for kj in range(5):
            t = ki * 5 + kj
            d = ki * 64 + kj * 2
            a2 = a2 + jnp.dot(w2_ref[t].astype(MXU_DTYPE), m1[:, d:d + L2],
                              preferred_element_type=f32)
    a2 = jnp.maximum(a2 + b2_ref[...], 0.0)               # conv2[o,h2,w2] at 64*h2 + 2*w2

    # ---- maxpool2 2x2 window max (pool2[c,i,j] sits at 128*i + 4*j).
    m2 = jnp.maximum(jnp.maximum(a2[:, 0:LM2], a2[:, 2:2 + LM2]),
                     jnp.maximum(a2[:, 64:64 + LM2], a2[:, 66:66 + LM2]))
    # Compact the 25 valid pooled positions per channel; row-major (16,25) == torch flatten.
    p2 = jnp.dot(m2.astype(MXU_DTYPE), s3_ref[...].astype(MXU_DTYPE),
                 preferred_element_type=f32)              # (16, 25)

    # ---- fc1 (400->120) + ReLU: contract channel-by-channel (no in-kernel reshape).
    z = jnp.zeros((1, 120), f32)
    for c in range(16):
        z = z + jnp.dot(p2[c:c + 1, :].astype(MXU_DTYPE), wf1_ref[c].astype(MXU_DTYPE),
                        preferred_element_type=f32)
    z = jnp.maximum(z + bf1_ref[...], 0.0)

    # ---- fc2 (120->84) + ReLU, fc3 (84->10).
    z = jnp.maximum(jnp.dot(z.astype(MXU_DTYPE), wf2_ref[...].astype(MXU_DTYPE),
                            preferred_element_type=f32) + bf2_ref[...], 0.0)
    z = jnp.dot(z.astype(MXU_DTYPE), wf3_ref[...].astype(MXU_DTYPE),
                preferred_element_type=f32) + bf3_ref[...]
    o_ref[0] = z.astype(o_ref.dtype)                      # (1, 10) per-sample logits


# ---------------------------------------------------------------------------
# One-time weight prepacking (PyTorch layouts -> MXU-ready matrices)
# ---------------------------------------------------------------------------

def prepack_params(p):
    w1 = jnp.transpose(p["conv1_w"], (2, 3, 0, 1)).reshape(25, 6, 3)    # [ki*5+kj, o, c]
    w2 = jnp.transpose(p["conv2_w"], (2, 3, 0, 1)).reshape(25, 16, 6)
    rows = jnp.arange(LM2)[:, None]
    cols = jnp.arange(25)[None, :]
    s3 = (rows == 128 * (cols // 5) + 4 * (cols % 5)).astype(jnp.float32)  # (529, 25)
    return {
        "w1": w1, "b1": p["conv1_b"].reshape(6, 1),
        "w2": w2, "b2": p["conv2_b"].reshape(16, 1),
        "s3": s3,
        "wf1": p["fc1_w"].T.reshape(16, 25, 120), "bf1": p["fc1_b"].reshape(1, 120),
        "wf2": p["fc2_w"].T, "bf2": p["fc2_b"].reshape(1, 84),
        "wf3": p["fc3_w"].T, "bf3": p["fc3_b"].reshape(1, 10),
    }


# ---------------------------------------------------------------------------
# Fused forward pass: one pallas_call for the whole network
# ---------------------------------------------------------------------------

def net_forward(x_nchw, pp):
    N = x_nchw.shape[0]
    x_flat = x_nchw.reshape(N, 3, W0 * W0).astype(jnp.float32)   # free row-major reshape

    def full(shape):
        return pl.BlockSpec(shape, lambda n, _s=len(shape): (0,) * _s)

    out = pl.pallas_call(
        _net_kernel,
        out_shape=jax.ShapeDtypeStruct((N, 1, 10), jnp.float32),
        grid=(N,),
        in_specs=[
            pl.BlockSpec((1, 3, W0 * W0), lambda n: (n, 0, 0)),
            full((25, 6, 3)), full((6, 1)),
            full((25, 16, 6)), full((16, 1)),
            full((LM2, 25)),
            full((16, 25, 120)), full((1, 120)),
            full((120, 84)), full((1, 84)),
            full((84, 10)), full((1, 10)),
        ],
        out_specs=pl.BlockSpec((1, 1, 10), lambda n: (n, 0, 0)),
        compiler_params=pltpu.CompilerParams(dimension_semantics=("parallel",)),
    )(x_flat, pp["w1"], pp["b1"], pp["w2"], pp["b2"], pp["s3"],
      pp["wf1"], pp["bf1"], pp["wf2"], pp["bf2"], pp["wf3"], pp["bf3"])
    return out.reshape(N, 10)


# ---------------------------------------------------------------------------
# Deterministic parameter init (PyTorch-style uniform(-1/sqrt(fan_in), +))
# ---------------------------------------------------------------------------

def init_params(key):
    def unif(k, shape, fan_in):
        bound = 1.0 / float(fan_in) ** 0.5
        return jax.random.uniform(k, shape, jnp.float32, -bound, bound)

    ks = jax.random.split(key, 10)
    return {
        "conv1_w": unif(ks[0], (6, 3, 5, 5), 3 * 25),
        "conv1_b": unif(ks[1], (6,), 3 * 25),
        "conv2_w": unif(ks[2], (16, 6, 5, 5), 6 * 25),
        "conv2_b": unif(ks[3], (16,), 6 * 25),
        "fc1_w": unif(ks[4], (120, 400), 400),
        "fc1_b": unif(ks[5], (120,), 400),
        "fc2_w": unif(ks[6], (84, 120), 120),
        "fc2_b": unif(ks[7], (84,), 120),
        "fc3_w": unif(ks[8], (10, 84), 84),
        "fc3_b": unif(ks[9], (10,), 84),
    }


# ---------------------------------------------------------------------------
# Pure-JAX reference (mirrors the PyTorch module semantics)
# ---------------------------------------------------------------------------

def net_reference(x, p):
    def conv(x, w, b):
        y = lax.conv_general_dilated(x, w, (1, 1), "VALID",
                                     dimension_numbers=("NCHW", "OIHW", "NCHW"))
        return jnp.maximum(y + b[None, :, None, None], 0.0)

    def pool(x):
        return lax.reduce_window(x, -jnp.inf, lax.max, (1, 1, 2, 2), (1, 1, 2, 2), "VALID")

    y = pool(conv(x, p["conv1_w"], p["conv1_b"]))
    y = pool(conv(y, p["conv2_w"], p["conv2_b"]))
    z = y.reshape(y.shape[0], -1)
    z = jnp.maximum(z @ p["fc1_w"].T + p["fc1_b"], 0.0)
    z = jnp.maximum(z @ p["fc2_w"].T + p["fc2_b"], 0.0)
    return z @ p["fc3_w"].T + p["fc3_b"]


if __name__ == "__main__":
    key = jax.random.PRNGKey(0)
    pkey, xkey = jax.random.split(key)
    params = init_params(pkey)
    # 32x32 input so the flattened feature is 16*5*5 = 400 (as Linear(400,.) implies).
    x = jax.random.normal(xkey, (2, 3, 32, 32), jnp.float32)

    pp = prepack_params(params)          # one-time weight repack (outside the hot path)
    fwd = jax.jit(net_forward)

    out = jax.block_until_ready(fwd(x, pp))
    ref = jax.block_until_ready(net_reference(x, params))

    assert out.shape == (2, 10), out.shape
    assert jnp.allclose(out, ref, atol=2e-2, rtol=2e-2), (out, ref)
    print("KERNEL_OK")
</pallas_src>

<mosaic_0001>
module attributes {stable_mosaic.version = 11 : i64} {
  func.func @_net_kernel(%arg0: i32, %arg1: memref<1x3x1024xf32, #tpu.memory_space<vmem>>, %arg2: memref<25x6x3xf32, #tpu.memory_space<vmem>>, %arg3: memref<6x1xf32, #tpu.memory_space<vmem>>, %arg4: memref<25x16x6xf32, #tpu.memory_space<vmem>>, %arg5: memref<16x1xf32, #tpu.memory_space<vmem>>, %arg6: memref<529x25xf32, #tpu.memory_space<vmem>>, %arg7: memref<16x25x120xf32, #tpu.memory_space<vmem>>, %arg8: memref<1x120xf32, #tpu.memory_space<vmem>>, %arg9: memref<120x84xf32, #tpu.memory_space<vmem>>, %arg10: memref<1x84xf32, #tpu.memory_space<vmem>>, %arg11: memref<84x10xf32, #tpu.memory_space<vmem>>, %arg12: memref<1x10xf32, #tpu.memory_space<vmem>>, %arg13: memref<1x1x10xf32, #tpu.memory_space<vmem>>) attributes {dimension_semantics = [#tpu.dimension_semantics<parallel>], iteration_bounds = array<i64: 2>, scalar_prefetch = 0 : i64, scratch_operands = 0 : i64, tpu.core_type = #tpu.core_type<tc>, window_params = [{transform_indices = @transform_0, window_bounds = array<i64: 1, 3, 1024>}, {pipeline_mode = #tpu.pipeline_mode<synchronous>, transform_indices = @transform_1, window_bounds = array<i64: 25, 6, 3>}, {pipeline_mode = #tpu.pipeline_mode<synchronous>, transform_indices = @transform_2, window_bounds = array<i64: 6, 1>}, {pipeline_mode = #tpu.pipeline_mode<synchronous>, transform_indices = @transform_3, window_bounds = array<i64: 25, 16, 6>}, {pipeline_mode = #tpu.pipeline_mode<synchronous>, transform_indices = @transform_4, window_bounds = array<i64: 16, 1>}, {pipeline_mode = #tpu.pipeline_mode<synchronous>, transform_indices = @transform_5, window_bounds = array<i64: 529, 25>}, {pipeline_mode = #tpu.pipeline_mode<synchronous>, transform_indices = @transform_6, window_bounds = array<i64: 16, 25, 120>}, {pipeline_mode = #tpu.pipeline_mode<synchronous>, transform_indices = @transform_7, window_bounds = array<i64: 1, 120>}, {pipeline_mode = #tpu.pipeline_mode<synchronous>, transform_indices = @transform_8, window_bounds = array<i64: 120, 84>}, {pipeline_mode = #tpu.pipeline_mode<synchronous>, transform_indices = @transform_9, window_bounds = array<i64: 1, 84>}, {pipeline_mode = #tpu.pipeline_mode<synchronous>, transform_indices = @transform_10, window_bounds = array<i64: 84, 10>}, {pipeline_mode = #tpu.pipeline_mode<synchronous>, transform_indices = @transform_11, window_bounds = array<i64: 1, 10>}, {transform_indices = @transform_12, window_bounds = array<i64: 1, 1, 10>}]} {
    %c0 = arith.constant 0 : index
    %c0_0 = arith.constant 0 : index
    %c0_1 = arith.constant 0 : index
    %0 = vector.load %arg1[%c0, %c0_0, %c0_1] : memref<1x3x1024xf32, #tpu.memory_space<vmem>>, vector<1x3x1024xf32>
    %1 = vector.shape_cast %0 : vector<1x3x1024xf32> to vector<3x1024xf32>
    %cst = arith.constant 0.000000e+00 : f32
    %2 = vector.broadcast %cst : f32 to vector<6x892xf32>
    %c0_2 = arith.constant 0 : index
    %c0_3 = arith.constant 0 : index
    %c0_4 = arith.constant 0 : index
    %3 = vector.load %arg2[%c0_2, %c0_3, %c0_4] : memref<25x6x3xf32, #tpu.memory_space<vmem>>, vector<1x6x3xf32>
    %4 = vector.shape_cast %3 : vector<1x6x3xf32> to vector<6x3xf32>
    %5 = vector.extract_strided_slice %1 {offsets = [0, 0], sizes = [3, 892], strides = [1, 1]} : vector<3x1024xf32> to vector<3x892xf32>
    %cst_5 = arith.constant dense<0.000000e+00> : vector<6x892xf32>
    %6 = tpu.matmul %4, %5, %cst_5 {dimension_numbers = #tpu.dot_dimension_numbers<[1], [0], [0], [1], [0, 0, 1, 1], [], []>} : vector<6x3xf32>, vector<3x892xf32>, vector<6x892xf32> -> vector<6x892xf32>
    %7 = arith.addf %2, %6 : vector<6x892xf32>
    %c1 = arith.constant 1 : index
    %c0_6 = arith.constant 0 : index
    %c0_7 = arith.constant 0 : index
    %8 = vector.load %arg2[%c1, %c0_6, %c0_7] : memref<25x6x3xf32, #tpu.memory_space<vmem>>, vector<1x6x3xf32>
    %9 = vector.shape_cast %8 : vector<1x6x3xf32> to vector<6x3xf32>
    %10 = vector.extract_strided_slice %1 {offsets = [0, 1], sizes = [3, 892], strides = [1, 1]} : vector<3x1024xf32> to vector<3x892xf32>
    %cst_8 = arith.constant dense<0.000000e+00> : vector<6x892xf32>
    %11 = tpu.matmul %9, %10, %cst_8 {dimension_numbers = #tpu.dot_dimension_numbers<[1], [0], [0], [1], [0, 0, 1, 1], [], []>} : vector<6x3xf32>, vector<3x892xf32>, vector<6x892xf32> -> vector<6x892xf32>
    %12 = arith.addf %7, %11 : vector<6x892xf32>
    %c2 = arith.constant 2 : index
    %c0_9 = arith.constant 0 : index
    %c0_10 = arith.constant 0 : index
    %13 = vector.load %arg2[%c2, %c0_9, %c0_10] : memref<25x6x3xf32, #tpu.memory_space<vmem>>, vector<1x6x3xf32>
    %14 = vector.shape_cast %13 : vector<1x6x3xf32> to vector<6x3xf32>
    %15 = vector.extract_strided_slice %1 {offsets = [0, 2], sizes = [3, 892], strides = [1, 1]} : vector<3x1024xf32> to vector<3x892xf32>
    %cst_11 = arith.constant dense<0.000000e+00> : vector<6x892xf32>
    %16 = tpu.matmul %14, %15, %cst_11 {dimension_numbers = #tpu.dot_dimension_numbers<[1], [0], [0], [1], [0, 0, 1, 1], [], []>} : vector<6x3xf32>, vector<3x892xf32>, vector<6x892xf32> -> vector<6x892xf32>
    %17 = arith.addf %12, %16 : vector<6x892xf32>
    %c3 = arith.constant 3 : index
    %c0_12 = arith.constant 0 : index
    %c0_13 = arith.constant 0 : index
    %18 = vector.load %arg2[%c3, %c0_12, %c0_13] : memref<25x6x3xf32, #tpu.memory_space<vmem>>, vector<1x6x3xf32>
    %19 = vector.shape_cast %18 : vector<1x6x3xf32> to vector<6x3xf32>
    %20 = vector.extract_strided_slice %1 {offsets = [0, 3], sizes = [3, 892], strides = [1, 1]} : vector<3x1024xf32> to vector<3x892xf32>
    %cst_14 = arith.constant dense<0.000000e+00> : vector<6x892xf32>
    %21 = tpu.matmul %19, %20, %cst_14 {dimension_numbers = #tpu.dot_dimension_numbers<[1], [0], [0], [1], [0, 0, 1, 1], [], []>} : vector<6x3xf32>, vector<3x892xf32>, vector<6x892xf32> -> vector<6x892xf32>
    %22 = arith.addf %17, %21 : vector<6x892xf32>
    %c4 = arith.constant 4 : index
    %c0_15 = arith.constant 0 : index
    %c0_16 = arith.constant 0 : index
    %23 = vector.load %arg2[%c4, %c0_15, %c0_16] : memref<25x6x3xf32, #tpu.memory_space<vmem>>, vector<1x6x3xf32>
    %24 = vector.shape_cast %23 : vector<1x6x3xf32> to vector<6x3xf32>
    %25 = vector.extract_strided_slice %1 {offsets = [0, 4], sizes = [3, 892], strides = [1, 1]} : vector<3x1024xf32> to vector<3x892xf32>
    %cst_17 = arith.constant dense<0.000000e+00> : vector<6x892xf32>
    %26 = tpu.matmul %24, %25, %cst_17 {dimension_numbers = #tpu.dot_dimension_numbers<[1], [0], [0], [1], [0, 0, 1, 1], [], []>} : vector<6x3xf32>, vector<3x892xf32>, vector<6x892xf32> -> vector<6x892xf32>
    %27 = arith.addf %22, %26 : vector<6x892xf32>
    %c5 = arith.constant 5 : index
    %c0_18 = arith.constant 0 : index
    %c0_19 = arith.constant 0 : index
    %28 = vector.load %arg2[%c5, %c0_18, %c0_19] : memref<25x6x3xf32, #tpu.memory_space<vmem>>, vector<1x6x3xf32>
    %29 = vector.shape_cast %28 : vector<1x6x3xf32> to vector<6x3xf32>
    %30 = vector.extract_strided_slice %1 {offsets = [0, 32], sizes = [3, 892], strides = [1, 1]} : vector<3x1024xf32> to vector<3x892xf32>
    %cst_20 = arith.constant dense<0.000000e+00> : vector<6x892xf32>
    %31 = tpu.matmul %29, %30, %cst_20 {dimension_numbers = #tpu.dot_dimension_numbers<[1], [0], [0], [1], [0, 0, 1, 1], [], []>} : vector<6x3xf32>, vector<3x892xf32>, vector<6x892xf32> -> vector<6x892xf32>
    %32 = arith.addf %27, %31 : vector<6x892xf32>
    %c6 = arith.constant 6 : index
    %c0_21 = arith.constant 0 : index
    %c0_22 = arith.constant 0 : index
    %33 = vector.load %arg2[%c6, %c0_21, %c0_22] : memref<25x6x3xf32, #tpu.memory_space<vmem>>, vector<1x6x3xf32>
    %34 = vector.shape_cast %33 : vector<1x6x3xf32> to vector<6x3xf32>
    %35 = vector.extract_strided_slice %1 {offsets = [0, 33], sizes = [3, 892], strides = [1, 1]} : vector<3x1024xf32> to vector<3x892xf32>
    %cst_23 = arith.constant dense<0.000000e+00> : vector<6x892xf32>
    %36 = tpu.matmul %34, %35, %cst_23 {dimension_numbers = #tpu.dot_dimension_numbers<[1], [0], [0], [1], [0, 0, 1, 1], [], []>} : vector<6x3xf32>, vector<3x892xf32>, vector<6x892xf32> -> vector<6x892xf32>
    %37 = arith.addf %32, %36 : vector<6x892xf32>
    %c7 = arith.constant 7 : index
    %c0_24 = arith.constant 0 : index
    %c0_25 = arith.constant 0 : index
    %38 = vector.load %arg2[%c7, %c0_24, %c0_25] : memref<25x6x3xf32, #tpu.memory_space<vmem>>, vector<1x6x3xf32>
    %39 = vector.shape_cast %38 : vector<1x6x3xf32> to vector<6x3xf32>
    %40 = vector.extract_strided_slice %1 {offsets = [0, 34], sizes = [3, 892], strides = [1, 1]} : vector<3x1024xf32> to vector<3x892xf32>
    %cst_26 = arith.constant dense<0.000000e+00> : vector<6x892xf32>
    %41 = tpu.matmul %39, %40, %cst_26 {dimension_numbers = #tpu.dot_dimension_numbers<[1], [0], [0], [1], [0, 0, 1, 1], [], []>} : vector<6x3xf32>, vector<3x892xf32>, vector<6x892xf32> -> vector<6x892xf32>
    %42 = arith.addf %37, %41 : vector<6x892xf32>
    %c8 = arith.constant 8 : index
    %c0_27 = arith.constant 0 : index
    %c0_28 = arith.constant 0 : index
    %43 = vector.load %arg2[%c8, %c0_27, %c0_28] : memref<25x6x3xf32, #tpu.memory_space<vmem>>, vector<1x6x3xf32>
    %44 = vector.shape_cast %43 : vector<1x6x3xf32> to vector<6x3xf32>
    %45 = vector.extract_strided_slice %1 {offsets = [0, 35], sizes = [3, 892], strides = [1, 1]} : vector<3x1024xf32> to vector<3x892xf32>
    %cst_29 = arith.constant dense<0.000000e+00> : vector<6x892xf32>
    %46 = tpu.matmul %44, %45, %cst_29 {dimension_numbers = #tpu.dot_dimension_numbers<[1], [0], [0], [1], [0, 0, 1, 1], [], []>} : vector<6x3xf32>, vector<3x892xf32>, vector<6x892xf32> -> vector<6x892xf32>
    %47 = arith.addf %42, %46 : vector<6x892xf32>
    %c9 = arith.constant 9 : index
    %c0_30 = arith.constant 0 : index
    %c0_31 = arith.constant 0 : index
    %48 = vector.load %arg2[%c9, %c0_30, %c0_31] : memref<25x6x3xf32, #tpu.memory_space<vmem>>, vector<1x6x3xf32>
    %49 = vector.shape_cast %48 : vector<1x6x3xf32> to vector<6x3xf32>
    %50 = vector.extract_strided_slice %1 {offsets = [0, 36], sizes = [3, 892], strides = [1, 1]} : vector<3x1024xf32> to vector<3x892xf32>
    %cst_32 = arith.constant dense<0.000000e+00> : vector<6x892xf32>
    %51 = tpu.matmul %49, %50, %cst_32 {dimension_numbers = #tpu.dot_dimension_numbers<[1], [0], [0], [1], [0, 0, 1, 1], [], []>} : vector<6x3xf32>, vector<3x892xf32>, vector<6x892xf32> -> vector<6x892xf32>
    %52 = arith.addf %47, %51 : vector<6x892xf32>
    %c10 = arith.constant 10 : index
    %c0_33 = arith.constant 0 : index
    %c0_34 = arith.constant 0 : index
    %53 = vector.load %arg2[%c10, %c0_33, %c0_34] : memref<25x6x3xf32, #tpu.memory_space<vmem>>, vector<1x6x3xf32>
    %54 = vector.shape_cast %53 : vector<1x6x3xf32> to vector<6x3xf32>
    %55 = vector.extract_strided_slice %1 {offsets = [0, 64], sizes = [3, 892], strides = [1, 1]} : vector<3x1024xf32> to vector<3x892xf32>
    %cst_35 = arith.constant dense<0.000000e+00> : vector<6x892xf32>
    %56 = tpu.matmul %54, %55, %cst_35 {dimension_numbers = #tpu.dot_dimension_numbers<[1], [0], [0], [1], [0, 0, 1, 1], [], []>} : vector<6x3xf32>, vector<3x892xf32>, vector<6x892xf32> -> vector<6x892xf32>
    %57 = arith.addf %52, %56 : vector<6x892xf32>
    %c11 = arith.constant 11 : index
    %c0_36 = arith.constant 0 : index
    %c0_37 = arith.constant 0 : index
    %58 = vector.load %arg2[%c11, %c0_36, %c0_37] : memref<25x6x3xf32, #tpu.memory_space<vmem>>, vector<1x6x3xf32>
    %59 = vector.shape_cast %58 : vector<1x6x3xf32> to vector<6x3xf32>
    %60 = vector.extract_strided_slice %1 {offsets = [0, 65], sizes = [3, 892], strides = [1, 1]} : vector<3x1024xf32> to vector<3x892xf32>
    %cst_38 = arith.constant dense<0.000000e+00> : vector<6x892xf32>
    %61 = tpu.matmul %59, %60, %cst_38 {dimension_numbers = #tpu.dot_dimension_numbers<[1], [0], [0], [1], [0, 0, 1, 1], [], []>} : vector<6x3xf32>, vector<3x892xf32>, vector<6x892xf32> -> vector<6x892xf32>
    %62 = arith.addf %57, %61 : vector<6x892xf32>
    %c12 = arith.constant 12 : index
    %c0_39 = arith.constant 0 : index
    %c0_40 = arith.constant 0 : index
    %63 = vector.load %arg2[%c12, %c0_39, %c0_40] : memref<25x6x3xf32, #tpu.memory_space<vmem>>, vector<1x6x3xf32>
    %64 = vector.shape_cast %63 : vector<1x6x3xf32> to vector<6x3xf32>
    %65 = vector.extract_strided_slice %1 {offsets = [0, 66], sizes = [3, 892], strides = [1, 1]} : vector<3x1024xf32> to vector<3x892xf32>
    %cst_41 = arith.constant dense<0.000000e+00> : vector<6x892xf32>
    %66 = tpu.matmul %64, %65, %cst_41 {dimension_numbers = #tpu.dot_dimension_numbers<[1], [0], [0], [1], [0, 0, 1, 1], [], []>} : vector<6x3xf32>, vector<3x892xf32>, vector<6x892xf32> -> vector<6x892xf32>
    %67 = arith.addf %62, %66 : vector<6x892xf32>
    %c13 = arith.constant 13 : index
    %c0_42 = arith.constant 0 : index
    %c0_43 = arith.constant 0 : index
    %68 = vector.load %arg2[%c13, %c0_42, %c0_43] : memref<25x6x3xf32, #tpu.memory_space<vmem>>, vector<1x6x3xf32>
    %69 = vector.shape_cast %68 : vector<1x6x3xf32> to vector<6x3xf32>
    %70 = vector.extract_strided_slice %1 {offsets = [0, 67], sizes = [3, 892], strides = [1, 1]} : vector<3x1024xf32> to vector<3x892xf32>
    %cst_44 = arith.constant dense<0.000000e+00> : vector<6x892xf32>
    %71 = tpu.matmul %69, %70, %cst_44 {dimension_numbers = #tpu.dot_dimension_numbers<[1], [0], [0], [1], [0, 0, 1, 1], [], []>} : vector<6x3xf32>, vector<3x892xf32>, vector<6x892xf32> -> vector<6x892xf32>
    %72 = arith.addf %67, %71 : vector<6x892xf32>
    %c14 = arith.constant 14 : index
    %c0_45 = arith.constant 0 : index
    %c0_46 = arith.constant 0 : index
    %73 = vector.load %arg2[%c14, %c0_45, %c0_46] : memref<25x6x3xf32, #tpu.memory_space<vmem>>, vector<1x6x3xf32>
    %74 = vector.shape_cast %73 : vector<1x6x3xf32> to vector<6x3xf32>
    %75 = vector.extract_strided_slice %1 {offsets = [0, 68], sizes = [3, 892], strides = [1, 1]} : vector<3x1024xf32> to vector<3x892xf32>
    %cst_47 = arith.constant dense<0.000000e+00> : vector<6x892xf32>
    %76 = tpu.matmul %74, %75, %cst_47 {dimension_numbers = #tpu.dot_dimension_numbers<[1], [0], [0], [1], [0, 0, 1, 1], [], []>} : vector<6x3xf32>, vector<3x892xf32>, vector<6x892xf32> -> vector<6x892xf32>
    %77 = arith.addf %72, %76 : vector<6x892xf32>
    %c15 = arith.constant 15 : index
    %c0_48 = arith.constant 0 : index
    %c0_49 = arith.constant 0 : index
    %78 = vector.load %arg2[%c15, %c0_48, %c0_49] : memref<25x6x3xf32, #tpu.memory_space<vmem>>, vector<1x6x3xf32>
    %79 = vector.shape_cast %78 : vector<1x6x3xf32> to vector<6x3xf32>
    %80 = vector.extract_strided_slice %1 {offsets = [0, 96], sizes = [3, 892], strides = [1, 1]} : vector<3x1024xf32> to vector<3x892xf32>
    %cst_50 = arith.constant dense<0.000000e+00> : vector<6x892xf32>
    %81 = tpu.matmul %79, %80, %cst_50 {dimension_numbers = #tpu.dot_dimension_numbers<[1], [0], [0], [1], [0, 0, 1, 1], [], []>} : vector<6x3xf32>, vector<3x892xf32>, vector<6x892xf32> -> vector<6x892xf32>
    %82 = arith.addf %77, %81 : vector<6x892xf32>
    %c16 = arith.constant 16 : index
    %c0_51 = arith.constant 0 : index
    %c0_52 = arith.constant 0 : index
    %83 = vector.load %arg2[%c16, %c0_51, %c0_52] : memref<25x6x3xf32, #tpu.memory_space<vmem>>, vector<1x6x3xf32>
    %84 = vector.shape_cast %83 : vector<1x6x3xf32> to vector<6x3xf32>
    %85 = vector.extract_strided_slice %1 {offsets = [0, 97], sizes = [3, 892], strides = [1, 1]} : vector<3x1024xf32> to vector<3x892xf32>
    %cst_53 = arith.constant dense<0.000000e+00> : vector<6x892xf32>
    %86 = tpu.matmul %84, %85, %cst_53 {dimension_numbers = #tpu.dot_dimension_numbers<[1], [0], [0], [1], [0, 0, 1, 1], [], []>} : vector<6x3xf32>, vector<3x892xf32>, vector<6x892xf32> -> vector<6x892xf32>
    %87 = arith.addf %82, %86 : vector<6x892xf32>
    %c17 = arith.constant 17 : index
    %c0_54 = arith.constant 0 : index
    %c0_55 = arith.constant 0 : index
    %88 = vector.load %arg2[%c17, %c0_54, %c0_55] : memref<25x6x3xf32, #tpu.memory_space<vmem>>, vector<1x6x3xf32>
    %89 = vector.shape_cast %88 : vector<1x6x3xf32> to vector<6x3xf32>
    %90 = vector.extract_strided_slice %1 {offsets = [0, 98], sizes = [3, 892], strides = [1, 1]} : vector<3x1024xf32> to vector<3x892xf32>
    %cst_56 = arith.constant dense<0.000000e+00> : vector<6x892xf32>
    %91 = tpu.matmul %89, %90, %cst_56 {dimension_numbers = #tpu.dot_dimension_numbers<[1], [0], [0], [1], [0, 0, 1, 1], [], []>} : vector<6x3xf32>, vector<3x892xf32>, vector<6x892xf32> -> vector<6x892xf32>
    %92 = arith.addf %87, %91 : vector<6x892xf32>
    %c18 = arith.constant 18 : index
    %c0_57 = arith.constant 0 : index
    %c0_58 = arith.constant 0 : index
    %93 = vector.load %arg2[%c18, %c0_57, %c0_58] : memref<25x6x3xf32, #tpu.memory_space<vmem>>, vector<1x6x3xf32>
    %94 = vector.shape_cast %93 : vector<1x6x3xf32> to vector<6x3xf32>
    %95 = vector.extract_strided_slice %1 {offsets = [0, 99], sizes = [3, 892], strides = [1, 1]} : vector<3x1024xf32> to vector<3x892xf32>
    %cst_59 = arith.constant dense<0.000000e+00> : vector<6x892xf32>
    %96 = tpu.matmul %94, %95, %cst_59 {dimension_numbers = #tpu.dot_dimension_numbers<[1], [0], [0], [1], [0, 0, 1, 1], [], []>} : vector<6x3xf32>, vector<3x892xf32>, vector<6x892xf32> -> vector<6x892xf32>
    %97 = arith.addf %92, %96 : vector<6x892xf32>
    %c19 = arith.constant 19 : index
    %c0_60 = arith.constant 0 : index
    %c0_61 = arith.constant 0 : index
    %98 = vector.load %arg2[%c19, %c0_60, %c0_61] : memref<25x6x3xf32, #tpu.memory_space<vmem>>, vector<1x6x3xf32>
    %99 = vector.shape_cast %98 : vector<1x6x3xf32> to vector<6x3xf32>
    %100 = vector.extract_strided_slice %1 {offsets = [0, 100], sizes = [3, 892], strides = [1, 1]} : vector<3x1024xf32> to vector<3x892xf32>
    %cst_62 = arith.constant dense<0.000000e+00> : vector<6x892xf32>
    %101 = tpu.matmul %99, %100, %cst_62 {dimension_numbers = #tpu.dot_dimension_numbers<[1], [0], [0], [1], [0, 0, 1, 1], [], []>} : vector<6x3xf32>, vector<3x892xf32>, vector<6x892xf32> -> vector<6x892xf32>
    %102 = arith.addf %97, %101 : vector<6x892xf32>
    %c20 = arith.constant 20 : index
    %c0_63 = arith.constant 0 : index
    %c0_64 = arith.constant 0 : index
    %103 = vector.load %arg2[%c20, %c0_63, %c0_64] : memref<25x6x3xf32, #tpu.memory_space<vmem>>, vector<1x6x3xf32>
    %104 = vector.shape_cast %103 : vector<1x6x3xf32> to vector<6x3xf32>
    %105 = vector.extract_strided_slice %1 {offsets = [0, 128], sizes = [3, 892], strides = [1, 1]} : vector<3x1024xf32> to vector<3x892xf32>
    %cst_65 = arith.constant dense<0.000000e+00> : vector<6x892xf32>
    %106 = tpu.matmul %104, %105, %cst_65 {dimension_numbers = #tpu.dot_dimension_numbers<[1], [0], [0], [1], [0, 0, 1, 1], [], []>} : vector<6x3xf32>, vector<3x892xf32>, vector<6x892xf32> -> vector<6x892xf32>
    %107 = arith.addf %102, %106 : vector<6x892xf32>
    %c21 = arith.constant 21 : index
    %c0_66 = arith.constant 0 : index
    %c0_67 = arith.constant 0 : index
    %108 = vector.load %arg2[%c21, %c0_66, %c0_67] : memref<25x6x3xf32, #tpu.memory_space<vmem>>, vector<1x6x3xf32>
    %109 = vector.shape_cast %108 : vector<1x6x3xf32> to vector<6x3xf32>
    %110 = vector.extract_strided_slice %1 {offsets = [0, 129], sizes = [3, 892], strides = [1, 1]} : vector<3x1024xf32> to vector<3x892xf32>
    %cst_68 = arith.constant dense<0.000000e+00> : vector<6x892xf32>
    %111 = tpu.matmul %109, %110, %cst_68 {dimension_numbers = #tpu.dot_dimension_numbers<[1], [0], [0], [1], [0, 0, 1, 1], [], []>} : vector<6x3xf32>, vector<3x892xf32>, vector<6x892xf32> -> vector<6x892xf32>
    %112 = arith.addf %107, %111 : vector<6x892xf32>
    %c22 = arith.constant 22 : index
    %c0_69 = arith.constant 0 : index
    %c0_70 = arith.constant 0 : index
    %113 = vector.load %arg2[%c22, %c0_69, %c0_70] : memref<25x6x3xf32, #tpu.memory_space<vmem>>, vector<1x6x3xf32>
    %114 = vector.shape_cast %113 : vector<1x6x3xf32> to vector<6x3xf32>
    %115 = vector.extract_strided_slice %1 {offsets = [0, 130], sizes = [3, 892], strides = [1, 1]} : vector<3x1024xf32> to vector<3x892xf32>
    %cst_71 = arith.constant dense<0.000000e+00> : vector<6x892xf32>
    %116 = tpu.matmul %114, %115, %cst_71 {dimension_numbers = #tpu.dot_dimension_numbers<[1], [0], [0], [1], [0, 0, 1, 1], [], []>} : vector<6x3xf32>, vector<3x892xf32>, vector<6x892xf32> -> vector<6x892xf32>
    %117 = arith.addf %112, %116 : vector<6x892xf32>
    %c23 = arith.constant 23 : index
    %c0_72 = arith.constant 0 : index
    %c0_73 = arith.constant 0 : index
    %118 = vector.load %arg2[%c23, %c0_72, %c0_73] : memref<25x6x3xf32, #tpu.memory_space<vmem>>, vector<1x6x3xf32>
    %119 = vector.shape_cast %118 : vector<1x6x3xf32> to vector<6x3xf32>
    %120 = vector.extract_strided_slice %1 {offsets = [0, 131], sizes = [3, 892], strides = [1, 1]} : vector<3x1024xf32> to vector<3x892xf32>
    %cst_74 = arith.constant dense<0.000000e+00> : vector<6x892xf32>
    %121 = tpu.matmul %119, %120, %cst_74 {dimension_numbers = #tpu.dot_dimension_numbers<[1], [0], [0], [1], [0, 0, 1, 1], [], []>} : vector<6x3xf32>, vector<3x892xf32>, vector<6x892xf32> -> vector<6x892xf32>
    %122 = arith.addf %117, %121 : vector<6x892xf32>
    %c24 = arith.constant 24 : index
    %c0_75 = arith.constant 0 : index
    %c0_76 = arith.constant 0 : index
    %123 = vector.load %arg2[%c24, %c0_75, %c0_76] : memref<25x6x3xf32, #tpu.memory_space<vmem>>, vector<1x6x3xf32>
    %124 = vector.shape_cast %123 : vector<1x6x3xf32> to vector<6x3xf32>
    %125 = vector.extract_strided_slice %1 {offsets = [0, 132], sizes = [3, 892], strides = [1, 1]} : vector<3x1024xf32> to vector<3x892xf32>
    %cst_77 = arith.constant dense<0.000000e+00> : vector<6x892xf32>
    %126 = tpu.matmul %124, %125, %cst_77 {dimension_numbers = #tpu.dot_dimension_numbers<[1], [0], [0], [1], [0, 0, 1, 1], [], []>} : vector<6x3xf32>, vector<3x892xf32>, vector<6x892xf32> -> vector<6x892xf32>
    %127 = arith.addf %122, %126 : vector<6x892xf32>
    %c0_78 = arith.constant 0 : index
    %c0_79 = arith.constant 0 : index
    %128 = vector.load %arg3[%c0_78, %c0_79] : memref<6x1xf32, #tpu.memory_space<vmem>>, vector<6x1xf32>
    %129 = vector.broadcast %128 : vector<6x1xf32> to vector<6x892xf32>
    %130 = arith.addf %127, %129 : vector<6x892xf32>
    %cst_80 = arith.constant 0.000000e+00 : f32
    %131 = vector.broadcast %cst_80 : f32 to vector<6x892xf32>
    %132 = arith.maximumf %130, %131 : vector<6x892xf32>
    %133 = vector.extract_strided_slice %132 {offsets = [0, 0], sizes = [6, 859], strides = [1, 1]} : vector<6x892xf32> to vector<6x859xf32>
    %134 = vector.extract_strided_slice %132 {offsets = [0, 1], sizes = [6, 859], strides = [1, 1]} : vector<6x892xf32> to vector<6x859xf32>
    %135 = arith.maximumf %133, %134 : vector<6x859xf32>
    %136 = vector.extract_strided_slice %132 {offsets = [0, 32], sizes = [6, 859], strides = [1, 1]} : vector<6x892xf32> to vector<6x859xf32>
    %137 = vector.extract_strided_slice %132 {offsets = [0, 33], sizes = [6, 859], strides = [1, 1]} : vector<6x892xf32> to vector<6x859xf32>
    %138 = arith.maximumf %136, %137 : vector<6x859xf32>
    %139 = arith.maximumf %135, %138 : vector<6x859xf32>
    %cst_81 = arith.constant 0.000000e+00 : f32
    %140 = vector.broadcast %cst_81 : f32 to vector<16x595xf32>
    %c0_82 = arith.constant 0 : index
    %c0_83 = arith.constant 0 : index
    %c0_84 = arith.constant 0 : index
    %141 = vector.load %arg4[%c0_82, %c0_83, %c0_84] : memref<25x16x6xf32, #tpu.memory_space<vmem>>, vector<1x16x6xf32>
    %142 = vector.shape_cast %141 : vector<1x16x6xf32> to vector<16x6xf32>
    %143 = vector.extract_strided_slice %139 {offsets = [0, 0], sizes = [6, 595], strides = [1, 1]} : vector<6x859xf32> to vector<6x595xf32>
    %cst_85 = arith.constant dense<0.000000e+00> : vector<16x595xf32>
    %144 = tpu.matmul %142, %143, %cst_85 {dimension_numbers = #tpu.dot_dimension_numbers<[1], [0], [0], [1], [0, 0, 1, 1], [], []>} : vector<16x6xf32>, vector<6x595xf32>, vector<16x595xf32> -> vector<16x595xf32>
    %145 = arith.addf %140, %144 : vector<16x595xf32>
    %c1_86 = arith.constant 1 : index
    %c0_87 = arith.constant 0 : index
    %c0_88 = arith.constant 0 : index
    %146 = vector.load %arg4[%c1_86, %c0_87, %c0_88] : memref<25x16x6xf32, #tpu.memory_space<vmem>>, vector<1x16x6xf32>
    %147 = vector.shape_cast %146 : vector<1x16x6xf32> to vector<16x6xf32>
    %148 = vector.extract_strided_slice %139 {offsets = [0, 2], sizes = [6, 595], strides = [1, 1]} : vector<6x859xf32> to vector<6x595xf32>
    %cst_89 = arith.constant dense<0.000000e+00> : vector<16x595xf32>
    %149 = tpu.matmul %147, %148, %cst_89 {dimension_numbers = #tpu.dot_dimension_numbers<[1], [0], [0], [1], [0, 0, 1, 1], [], []>} : vector<16x6xf32>, vector<6x595xf32>, vector<16x595xf32> -> vector<16x595xf32>
    %150 = arith.addf %145, %149 : vector<16x595xf32>
    %c2_90 = arith.constant 2 : index
    %c0_91 = arith.constant 0 : index
    %c0_92 = arith.constant 0 : index
    %151 = vector.load %arg4[%c2_90, %c0_91, %c0_92] : memref<25x16x6xf32, #tpu.memory_space<vmem>>, vector<1x16x6xf32>
    %152 = vector.shape_cast %151 : vector<1x16x6xf32> to vector<16x6xf32>
    %153 = vector.extract_strided_slice %139 {offsets = [0, 4], sizes = [6, 595], strides = [1, 1]} : vector<6x859xf32> to vector<6x595xf32>
    %cst_93 = arith.constant dense<0.000000e+00> : vector<16x595xf32>
    %154 = tpu.matmul %152, %153, %cst_93 {dimension_numbers = #tpu.dot_dimension_numbers<[1], [0], [0], [1], [0, 0, 1, 1], [], []>} : vector<16x6xf32>, vector<6x595xf32>, vector<16x595xf32> -> vector<16x595xf32>
    %155 = arith.addf %150, %154 : vector<16x595xf32>
    %c3_94 = arith.constant 3 : index
    %c0_95 = arith.constant 0 : index
    %c0_96 = arith.constant 0 : index
    %156 = vector.load %arg4[%c3_94, %c0_95, %c0_96] : memref<25x16x6xf32, #tpu.memory_space<vmem>>, vector<1x16x6xf32>
    %157 = vector.shape_cast %156 : vector<1x16x6xf32> to vector<16x6xf32>
    %158 = vector.extract_strided_slice %139 {offsets = [0, 6], sizes = [6, 595], strides = [1, 1]} : vector<6x859xf32> to vector<6x595xf32>
    %cst_97 = arith.constant dense<0.000000e+00> : vector<16x595xf32>
    %159 = tpu.matmul %157, %158, %cst_97 {dimension_numbers = #tpu.dot_dimension_numbers<[1], [0], [0], [1], [0, 0, 1, 1], [], []>} : vector<16x6xf32>, vector<6x595xf32>, vector<16x595xf32> -> vector<16x595xf32>
    %160 = arith.addf %155, %159 : vector<16x595xf32>
    %c4_98 = arith.constant 4 : index
    %c0_99 = arith.constant 0 : index
    %c0_100 = arith.constant 0 : index
    %161 = vector.load %arg4[%c4_98, %c0_99, %c0_100] : memref<25x16x6xf32, #tpu.memory_space<vmem>>, vector<1x16x6xf32>
    %162 = vector.shape_cast %161 : vector<1x16x6xf32> to vector<16x6xf32>
    %163 = vector.extract_strided_slice %139 {offsets = [0, 8], sizes = [6, 595], strides = [1, 1]} : vector<6x859xf32> to vector<6x595xf32>
    %cst_101 = arith.constant dense<0.000000e+00> : vector<16x595xf32>
    %164 = tpu.matmul %162, %163, %cst_101 {dimension_numbers = #tpu.dot_dimension_numbers<[1], [0], [0], [1], [0, 0, 1, 1], [], []>} : vector<16x6xf32>, vector<6x595xf32>, vector<16x595xf32> -> vector<16x595xf32>
    %165 = arith.addf %160, %164 : vector<16x595xf32>
    %c5_102 = arith.constant 5 : index
    %c0_103 = arith.constant 0 : index
    %c0_104 = arith.constant 0 : index
    %166 = vector.load %arg4[%c5_102, %c0_103, %c0_104] : memref<25x16x6xf32, #tpu.memory_space<vmem>>, vector<1x16x6xf32>
    %167 = vector.shape_cast %166 : vector<1x16x6xf32> to vector<16x6xf32>
    %168 = vector.extract_strided_slice %139 {offsets = [0, 64], sizes = [6, 595], strides = [1, 1]} : vector<6x859xf32> to vector<6x595xf32>
    %cst_105 = arith.constant dense<0.000000e+00> : vector<16x595xf32>
    %169 = tpu.matmul %167, %168, %cst_105 {dimension_numbers = #tpu.dot_dimension_numbers<[1], [0], [0], [1], [0, 0, 1, 1], [], []>} : vector<16x6xf32>, vector<6x595xf32>, vector<16x595xf32> -> vector<16x595xf32>
    %170 = arith.addf %165, %169 : vector<16x595xf32>
    %c6_106 = arith.constant 6 : index
    %c0_107 = arith.constant 0 : index
    %c0_108 = arith.constant 0 : index
    %171 = vector.load %arg4[%c6_106, %c0_107, %c0_108] : memref<25x16x6xf32, #tpu.memory_space<vmem>>, vector<1x16x6xf32>
    %172 = vector.shape_cast %171 : vector<1x16x6xf32> to vector<16x6xf32>
    %173 = vector.extract_strided_slice %139 {offsets = [0, 66], sizes = [6, 595], strides = [1, 1]} : vector<6x859xf32> to vector<6x595xf32>
    %cst_109 = arith.constant dense<0.000000e+00> : vector<16x595xf32>
    %174 = tpu.matmul %172, %173, %cst_109 {dimension_numbers = #tpu.dot_dimension_numbers<[1], [0], [0], [1], [0, 0, 1, 1], [], []>} : vector<16x6xf32>, vector<6x595xf32>, vector<16x595xf32> -> vector<16x595xf32>
    %175 = arith.addf %170, %174 : vector<16x595xf32>
    %c7_110 = arith.constant 7 : index
    %c0_111 = arith.constant 0 : index
    %c0_112 = arith.constant 0 : index
    %176 = vector.load %arg4[%c7_110, %c0_111, %c0_112] : memref<25x16x6xf32, #tpu.memory_space<vmem>>, vector<1x16x6xf32>
    %177 = vector.shape_cast %176 : vector<1x16x6xf32> to vector<16x6xf32>
    %178 = vector.extract_strided_slice %139 {offsets = [0, 68], sizes = [6, 595], strides = [1, 1]} : vector<6x859xf32> to vector<6x595xf32>
    %cst_113 = arith.constant dense<0.000000e+00> : vector<16x595xf32>
    %179 = tpu.matmul %177, %178, %cst_113 {dimension_numbers = #tpu.dot_dimension_numbers<[1], [0], [0], [1], [0, 0, 1, 1], [], []>} : vector<16x6xf32>, vector<6x595xf32>, vector<16x595xf32> -> vector<16x595xf32>
    %180 = arith.addf %175, %179 : vector<16x595xf32>
    %c8_114 = arith.constant 8 : index
    %c0_115 = arith.constant 0 : index
    %c0_116 = arith.constant 0 : index
    %181 = vector.load %arg4[%c8_114, %c0_115, %c0_116] : memref<25x16x6xf32, #tpu.memory_space<vmem>>, vector<1x16x6xf32>
    %182 = vector.shape_cast %181 : vector<1x16x6xf32> to vector<16x6xf32>
    %183 = vector.extract_strided_slice %139 {offsets = [0, 70], sizes = [6, 595], strides = [1, 1]} : vector<6x859xf32> to vector<6x595xf32>
    %cst_117 = arith.constant dense<0.000000e+00> : vector<16x595xf32>
    %184 = tpu.matmul %182, %183, %cst_117 {dimension_numbers = #tpu.dot_dimension_numbers<[1], [0], [0], [1], [0, 0, 1, 1], [], []>} : vector<16x6xf32>, vector<6x595xf32>, vector<16x595xf32> -> vector<16x595xf32>
    %185 = arith.addf %180, %184 : vector<16x595xf32>
    %c9_118 = arith.constant 9 : index
    %c0_119 = arith.constant 0 : index
    %c0_120 = arith.constant 0 : index
    %186 = vector.load %arg4[%c9_118, %c0_119, %c0_120] : memref<25x16x6xf32, #tpu.memory_space<vmem>>, vector<1x16x6xf32>
    %187 = vector.shape_cast %186 : vector<1x16x6xf32> to vector<16x6xf32>
    %188 = vector.extract_strided_slice %139 {offsets = [0, 72], sizes = [6, 595], strides = [1, 1]} : vector<6x859xf32> to vector<6x595xf32>
    %cst_121 = arith.constant dense<0.000000e+00> : vector<16x595xf32>
    %189 = tpu.matmul %187, %188, %cst_121 {dimension_numbers = #tpu.dot_dimension_numbers<[1], [0], [0], [1], [0, 0, 1, 1], [], []>} : vector<16x6xf32>, vector<6x595xf32>, vector<16x595xf32> -> vector<16x595xf32>
    %190 = arith.addf %185, %189 : vector<16x595xf32>
    %c10_122 = arith.constant 10 : index
    %c0_123 = arith.constant 0 : index
    %c0_124 = arith.constant 0 : index
    %191 = vector.load %arg4[%c10_122, %c0_123, %c0_124] : memref<25x16x6xf32, #tpu.memory_space<vmem>>, vector<1x16x6xf32>
    %192 = vector.shape_cast %191 : vector<1x16x6xf32> to vector<16x6xf32>
    %193 = vector.extract_strided_slice %139 {offsets = [0, 128], sizes = [6, 595], strides = [1, 1]} : vector<6x859xf32> to vector<6x595xf32>
    %cst_125 = arith.constant dense<0.000000e+00> : vector<16x595xf32>
    %194 = tpu.matmul %192, %193, %cst_125 {dimension_numbers = #tpu.dot_dimension_numbers<[1], [0], [0], [1], [0, 0, 1, 1], [], []>} : vector<16x6xf32>, vector<6x595xf32>, vector<16x595xf32> -> vector<16x595xf32>
    %195 = arith.addf %190, %194 : vector<16x595xf32>
    %c11_126 = arith.constant 11 : index
    %c0_127 = arith.constant 0 : index
    %c0_128 = arith.constant 0 : index
    %196 = vector.load %arg4[%c11_126, %c0_127, %c0_128] : memref<25x16x6xf32, #tpu.memory_space<vmem>>, vector<1x16x6xf32>
    %197 = vector.shape_cast %196 : vector<1x16x6xf32> to vector<16x6xf32>
    %198 = vector.extract_strided_slice %139 {offsets = [0, 130], sizes = [6, 595], strides = [1, 1]} : vector<6x859xf32> to vector<6x595xf32>
    %cst_129 = arith.constant dense<0.000000e+00> : vector<16x595xf32>
    %199 = tpu.matmul %197, %198, %cst_129 {dimension_numbers = #tpu.dot_dimension_numbers<[1], [0], [0], [1], [0, 0, 1, 1], [], []>} : vector<16x6xf32>, vector<6x595xf32>, vector<16x595xf32> -> vector<16x595xf32>
    %200 = arith.addf %195, %199 : vector<16x595xf32>
    %c12_130 = arith.constant 12 : index
    %c0_131 = arith.constant 0 : index
    %c0_132 = arith.constant 0 : index
    %201 = vector.load %arg4[%c12_130, %c0_131, %c0_132] : memref<25x16x6xf32, #tpu.memory_space<vmem>>, vector<1x16x6xf32>
    %202 = vector.shape_cast %201 : vector<1x16x6xf32> to vector<16x6xf32>
    %203 = vector.extract_strided_slice %139 {offsets = [0, 132], sizes = [6, 595], strides = [1, 1]} : vector<6x859xf32> to vector<6x595xf32>
    %cst_133 = arith.constant dense<0.000000e+00> : vector<16x595xf32>
    %204 = tpu.matmul %202, %203, %cst_133 {dimension_numbers = #tpu.dot_dimension_numbers<[1], [0], [0], [1], [0, 0, 1, 1], [], []>} : vector<16x6xf32>, vector<6x595xf32>, vector<16x595xf32> -> vector<16x595xf32>
    %205 = arith.addf %200, %204 : vector<16x595xf32>
    %c13_134 = arith.constant 13 : index
    %c0_135 = arith.constant 0 : index
    %c0_136 = arith.constant 0 : index
    %206 = vector.load %arg4[%c13_134, %c0_135, %c0_136] : memref<25x16x6xf32, #tpu.memory_space<vmem>>, vector<1x16x6xf32>
    %207 = vector.shape_cast %206 : vector<1x16x6xf32> to vector<16x6xf32>
    %208 = vector.extract_strided_slice %139 {offsets = [0, 134], sizes = [6, 595], strides = [1, 1]} : vector<6x859xf32> to vector<6x595xf32>
    %cst_137 = arith.constant dense<0.000000e+00> : vector<16x595xf32>
    %209 = tpu.matmul %207, %208, %cst_137 {dimension_numbers = #tpu.dot_dimension_numbers<[1], [0], [0], [1], [0, 0, 1, 1], [], []>} : vector<16x6xf32>, vector<6x595xf32>, vector<16x595xf32> -> vector<16x595xf32>
    %210 = arith.addf %205, %209 : vector<16x595xf32>
    %c14_138 = arith.constant 14 : index
    %c0_139 = arith.constant 0 : index
    %c0_140 = arith.constant 0 : index
    %211 = vector.load %arg4[%c14_138, %c0_139, %c0_140] : memref<25x16x6xf32, #tpu.memory_space<vmem>>, vector<1x16x6xf32>
    %212 = vector.shape_cast %211 : vector<1x16x6xf32> to vector<16x6xf32>
    %213 = vector.extract_strided_slice %139 {offsets = [0, 136], sizes = [6, 595], strides = [1, 1]} : vector<6x859xf32> to vector<6x595xf32>
    %cst_141 = arith.constant dense<0.000000e+00> : vector<16x595xf32>
    %214 = tpu.matmul %212, %213, %cst_141 {dimension_numbers = #tpu.dot_dimension_numbers<[1], [0], [0], [1], [0, 0, 1, 1], [], []>} : vector<16x6xf32>, vector<6x595xf32>, vector<16x595xf32> -> vector<16x595xf32>
    %215 = arith.addf %210, %214 : vector<16x595xf32>
    %c15_142 = arith.constant 15 : index
    %c0_143 = arith.constant 0 : index
    %c0_144 = arith.constant 0 : index
    %216 = vector.load %arg4[%c15_142, %c0_143, %c0_144] : memref<25x16x6xf32, #tpu.memory_space<vmem>>, vector<1x16x6xf32>
    %217 = vector.shape_cast %216 : vector<1x16x6xf32> to vector<16x6xf32>
    %218 = vector.extract_strided_slice %139 {offsets = [0, 192], sizes = [6, 595], strides = [1, 1]} : vector<6x859xf32> to vector<6x595xf32>
    %cst_145 = arith.constant dense<0.000000e+00> : vector<16x595xf32>
    %219 = tpu.matmul %217, %218, %cst_145 {dimension_numbers = #tpu.dot_dimension_numbers<[1], [0], [0], [1], [0, 0, 1, 1], [], []>} : vector<16x6xf32>, vector<6x595xf32>, vector<16x595xf32> -> vector<16x595xf32>
    %220 = arith.addf %215, %219 : vector<16x595xf32>
    %c16_146 = arith.constant 16 : index
    %c0_147 = arith.constant 0 : index
    %c0_148 = arith.constant 0 : index
    %221 = vector.load %arg4[%c16_146, %c0_147, %c0_148] : memref<25x16x6xf32, #tpu.memory_space<vmem>>, vector<1x16x6xf32>
    %222 = vector.shape_cast %221 : vector<1x16x6xf32> to vector<16x6xf32>
    %223 = vector.extract_strided_slice %139 {offsets = [0, 194], sizes = [6, 595], strides = [1, 1]} : vector<6x859xf32> to vector<6x595xf32>
    %cst_149 = arith.constant dense<0.000000e+00> : vector<16x595xf32>
    %224 = tpu.matmul %222, %223, %cst_149 {dimension_numbers = #tpu.dot_dimension_numbers<[1], [0], [0], [1], [0, 0, 1, 1], [], []>} : vector<16x6xf32>, vector<6x595xf32>, vector<16x595xf32> -> vector<16x595xf32>
    %225 = arith.addf %220, %224 : vector<16x595xf32>
    %c17_150 = arith.constant 17 : index
    %c0_151 = arith.constant 0 : index
    %c0_152 = arith.constant 0 : index
    %226 = vector.load %arg4[%c17_150, %c0_151, %c0_152] : memref<25x16x6xf32, #tpu.memory_space<vmem>>, vector<1x16x6xf32>
    %227 = vector.shape_cast %226 : vector<1x16x6xf32> to vector<16x6xf32>
    %228 = vector.extract_strided_slice %139 {offsets = [0, 196], sizes = [6, 595], strides = [1, 1]} : vector<6x859xf32> to vector<6x595xf32>
    %cst_153 = arith.constant dense<0.000000e+00> : vector<16x595xf32>
    %229 = tpu.matmul %227, %228, %cst_153 {dimension_numbers = #tpu.dot_dimension_numbers<[1], [0], [0], [1], [0, 0, 1, 1], [], []>} : vector<16x6xf32>, vector<6x595xf32>, vector<16x595xf32> -> vector<16x595xf32>
    %230 = arith.addf %225, %229 : vector<16x595xf32>
    %c18_154 = arith.constant 18 : index
    %c0_155 = arith.constant 0 : index
    %c0_156 = arith.constant 0 : index
    %231 = vector.load %arg4[%c18_154, %c0_155, %c0_156] : memref<25x16x6xf32, #tpu.memory_space<vmem>>, vector<1x16x6xf32>
    %232 = vector.shape_cast %231 : vector<1x16x6xf32> to vector<16x6xf32>
    %233 = vector.extract_strided_slice %139 {offsets = [0, 198], sizes = [6, 595], strides = [1, 1]} : vector<6x859xf32> to vector<6x595xf32>
    %cst_157 = arith.constant dense<0.000000e+00> : vector<16x595xf32>
    %234 = tpu.matmul %232, %233, %cst_157 {dimension_numbers = #tpu.dot_dimension_numbers<[1], [0], [0], [1], [0, 0, 1, 1], [], []>} : vector<16x6xf32>, vector<6x595xf32>, vector<16x595xf32> -> vector<16x595xf32>
    %235 = arith.addf %230, %234 : vector<16x595xf32>
    %c19_158 = arith.constant 19 : index
    %c0_159 = arith.constant 0 : index
    %c0_160 = arith.constant 0 : index
    %236 = vector.load %arg4[%c19_158, %c0_159, %c0_160] : memref<25x16x6xf32, #tpu.memory_space<vmem>>, vector<1x16x6xf32>
    %237 = vector.shape_cast %236 : vector<1x16x6xf32> to vector<16x6xf32>
    %238 = vector.extract_strided_slice %139 {offsets = [0, 200], sizes = [6, 595], strides = [1, 1]} : vector<6x859xf32> to vector<6x595xf32>
    %cst_161 = arith.constant dense<0.000000e+00> : vector<16x595xf32>
    %239 = tpu.matmul %237, %238, %cst_161 {dimension_numbers = #tpu.dot_dimension_numbers<[1], [0], [0], [1], [0, 0, 1, 1], [], []>} : vector<16x6xf32>, vector<6x595xf32>, vector<16x595xf32> -> vector<16x595xf32>
    %240 = arith.addf %235, %239 : vector<16x595xf32>
    %c20_162 = arith.constant 20 : index
    %c0_163 = arith.constant 0 : index
    %c0_164 = arith.constant 0 : index
    %241 = vector.load %arg4[%c20_162, %c0_163, %c0_164] : memref<25x16x6xf32, #tpu.memory_space<vmem>>, vector<1x16x6xf32>
    %242 = vector.shape_cast %241 : vector<1x16x6xf32> to vector<16x6xf32>
    %243 = vector.extract_strided_slice %139 {offsets = [0, 256], sizes = [6, 595], strides = [1, 1]} : vector<6x859xf32> to vector<6x595xf32>
    %cst_165 = arith.constant dense<0.000000e+00> : vector<16x595xf32>
    %244 = tpu.matmul %242, %243, %cst_165 {dimension_numbers = #tpu.dot_dimension_numbers<[1], [0], [0], [1], [0, 0, 1, 1], [], []>} : vector<16x6xf32>, vector<6x595xf32>, vector<16x595xf32> -> vector<16x595xf32>
    %245 = arith.addf %240, %244 : vector<16x595xf32>
    %c21_166 = arith.constant 21 : index
    %c0_167 = arith.constant 0 : index
    %c0_168 = arith.constant 0 : index
    %246 = vector.load %arg4[%c21_166, %c0_167, %c0_168] : memref<25x16x6xf32, #tpu.memory_space<vmem>>, vector<1x16x6xf32>
    %247 = vector.shape_cast %246 : vector<1x16x6xf32> to vector<16x6xf32>
    %248 = vector.extract_strided_slice %139 {offsets = [0, 258], sizes = [6, 595], strides = [1, 1]} : vector<6x859xf32> to vector<6x595xf32>
    %cst_169 = arith.constant dense<0.000000e+00> : vector<16x595xf32>
    %249 = tpu.matmul %247, %248, %cst_169 {dimension_numbers = #tpu.dot_dimension_numbers<[1], [0], [0], [1], [0, 0, 1, 1], [], []>} : vector<16x6xf32>, vector<6x595xf32>, vector<16x595xf32> -> vector<16x595xf32>
    %250 = arith.addf %245, %249 : vector<16x595xf32>
    %c22_170 = arith.constant 22 : index
    %c0_171 = arith.constant 0 : index
    %c0_172 = arith.constant 0 : index
    %251 = vector.load %arg4[%c22_170, %c0_171, %c0_172] : memref<25x16x6xf32, #tpu.memory_space<vmem>>, vector<1x16x6xf32>
    %252 = vector.shape_cast %251 : vector<1x16x6xf32> to vector<16x6xf32>
    %253 = vector.extract_strided_slice %139 {offsets = [0, 260], sizes = [6, 595], strides = [1, 1]} : vector<6x859xf32> to vector<6x595xf32>
    %cst_173 = arith.constant dense<0.000000e+00> : vector<16x595xf32>
    %254 = tpu.matmul %252, %253, %cst_173 {dimension_numbers = #tpu.dot_dimension_numbers<[1], [0], [0], [1], [0, 0, 1, 1], [], []>} : vector<16x6xf32>, vector<6x595xf32>, vector<16x595xf32> -> vector<16x595xf32>
    %255 = arith.addf %250, %254 : vector<16x595xf32>
    %c23_174 = arith.constant 23 : index
    %c0_175 = arith.constant 0 : index
    %c0_176 = arith.constant 0 : index
    %256 = vector.load %arg4[%c23_174, %c0_175, %c0_176] : memref<25x16x6xf32, #tpu.memory_space<vmem>>, vector<1x16x6xf32>
    %257 = vector.shape_cast %256 : vector<1x16x6xf32> to vector<16x6xf32>
    %258 = vector.extract_strided_slice %139 {offsets = [0, 262], sizes = [6, 595], strides = [1, 1]} : vector<6x859xf32> to vector<6x595xf32>
    %cst_177 = arith.constant dense<0.000000e+00> : vector<16x595xf32>
    %259 = tpu.matmul %257, %258, %cst_177 {dimension_numbers = #tpu.dot_dimension_numbers<[1], [0], [0], [1], [0, 0, 1, 1], [], []>} : vector<16x6xf32>, vector<6x595xf32>, vector<16x595xf32> -> vector<16x595xf32>
    %260 = arith.addf %255, %259 : vector<16x595xf32>
    %c24_178 = arith.constant 24 : index
    %c0_179 = arith.constant 0 : index
    %c0_180 = arith.constant 0 : index
    %261 = vector.load %arg4[%c24_178, %c0_179, %c0_180] : memref<25x16x6xf32, #tpu.memory_space<vmem>>, vector<1x16x6xf32>
    %262 = vector.shape_cast %261 : vector<1x16x6xf32> to vector<16x6xf32>
    %263 = vector.extract_strided_slice %139 {offsets = [0, 264], sizes = [6, 595], strides = [1, 1]} : vector<6x859xf32> to vector<6x595xf32>
    %cst_181 = arith.constant dense<0.000000e+00> : vector<16x595xf32>
    %264 = tpu.matmul %262, %263, %cst_181 {dimension_numbers = #tpu.dot_dimension_numbers<[1], [0], [0], [1], [0, 0, 1, 1], [], []>} : vector<16x6xf32>, vector<6x595xf32>, vector<16x595xf32> -> vector<16x595xf32>
    %265 = arith.addf %260, %264 : vector<16x595xf32>
    %c0_182 = arith.constant 0 : index
    %c0_183 = arith.constant 0 : index
    %266 = vector.load %arg5[%c0_182, %c0_183] : memref<16x1xf32, #tpu.memory_space<vmem>>, vector<16x1xf32>
    %267 = vector.broadcast %266 : vector<16x1xf32> to vector<16x595xf32>
    %268 = arith.addf %265, %267 : vector<16x595xf32>
    %cst_184 = arith.constant 0.000000e+00 : f32
    %269 = vector.broadcast %cst_184 : f32 to vector<16x595xf32>
    %270 = arith.maximumf %268, %269 : vector<16x595xf32>
    %271 = vector.extract_strided_slice %270 {offsets = [0, 0], sizes = [16, 529], strides = [1, 1]} : vector<16x595xf32> to vector<16x529xf32>
    %272 = vector.extract_strided_slice %270 {offsets = [0, 2], sizes = [16, 529], strides = [1, 1]} : vector<16x595xf32> to vector<16x529xf32>
    %273 = arith.maximumf %271, %272 : vector<16x529xf32>
    %274 = vector.extract_strided_slice %270 {offsets = [0, 64], sizes = [16, 529], strides = [1, 1]} : vector<16x595xf32> to vector<16x529xf32>
    %275 = vector.extract_strided_slice %270 {offsets = [0, 66], sizes = [16, 529], strides = [1, 1]} : vector<16x595xf32> to vector<16x529xf32>
    %276 = arith.maximumf %274, %275 : vector<16x529xf32>
    %277 = arith.maximumf %273, %276 : vector<16x529xf32>
    %c0_185 = arith.constant 0 : index
    %c0_186 = arith.constant 0 : index
    %278 = vector.load %arg6[%c0_185, %c0_186] : memref<529x25xf32, #tpu.memory_space<vmem>>, vector<529x25xf32>
    %cst_187 = arith.constant dense<0.000000e+00> : vector<16x25xf32>
    %279 = tpu.matmul %277, %278, %cst_187 {dimension_numbers = #tpu.dot_dimension_numbers<[1], [0], [0], [1], [0, 0, 1, 1], [], []>} : vector<16x529xf32>, vector<529x25xf32>, vector<16x25xf32> -> vector<16x25xf32>
    %cst_188 = arith.constant 0.000000e+00 : f32
    %280 = vector.broadcast %cst_188 : f32 to vector<1x120xf32>
    %281 = vector.extract_strided_slice %279 {offsets = [0, 0], sizes = [1, 25], strides = [1, 1]} : vector<16x25xf32> to vector<1x25xf32>
    %c0_189 = arith.constant 0 : index
    %c0_190 = arith.constant 0 : index
    %c0_191 = arith.constant 0 : index
    %282 = vector.load %arg7[%c0_189, %c0_190, %c0_191] : memref<16x25x120xf32, #tpu.memory_space<vmem>>, vector<1x25x120xf32>
    %283 = vector.shape_cast %282 : vector<1x25x120xf32> to vector<25x120xf32>
    %cst_192 = arith.constant dense<0.000000e+00> : vector<1x120xf32>
    %284 = tpu.matmul %281, %283, %cst_192 {dimension_numbers = #tpu.dot_dimension_numbers<[1], [0], [0], [1], [0, 0, 1, 1], [], []>} : vector<1x25xf32>, vector<25x120xf32>, vector<1x120xf32> -> vector<1x120xf32>
    %285 = arith.addf %280, %284 : vector<1x120xf32>
    %286 = vector.extract_strided_slice %279 {offsets = [1, 0], sizes = [1, 25], strides = [1, 1]} : vector<16x25xf32> to vector<1x25xf32>
    %c1_193 = arith.constant 1 : index
    %c0_194 = arith.constant 0 : index
    %c0_195 = arith.constant 0 : index
    %287 = vector.load %arg7[%c1_193, %c0_194, %c0_195] : memref<16x25x120xf32, #tpu.memory_space<vmem>>, vector<1x25x120xf32>
    %288 = vector.shape_cast %287 : vector<1x25x120xf32> to vector<25x120xf32>
    %cst_196 = arith.constant dense<0.000000e+00> : vector<1x120xf32>
    %289 = tpu.matmul %286, %288, %cst_196 {dimension_numbers = #tpu.dot_dimension_numbers<[1], [0], [0], [1], [0, 0, 1, 1], [], []>} : vector<1x25xf32>, vector<25x120xf32>, vector<1x120xf32> -> vector<1x120xf32>
    %290 = arith.addf %285, %289 : vector<1x120xf32>
    %291 = vector.extract_strided_slice %279 {offsets = [2, 0], sizes = [1, 25], strides = [1, 1]} : vector<16x25xf32> to vector<1x25xf32>
    %c2_197 = arith.constant 2 : index
    %c0_198 = arith.constant 0 : index
    %c0_199 = arith.constant 0 : index
    %292 = vector.load %arg7[%c2_197, %c0_198, %c0_199] : memref<16x25x120xf32, #tpu.memory_space<vmem>>, vector<1x25x120xf32>
    %293 = vector.shape_cast %292 : vector<1x25x120xf32> to vector<25x120xf32>
    %cst_200 = arith.constant dense<0.000000e+00> : vector<1x120xf32>
    %294 = tpu.matmul %291, %293, %cst_200 {dimension_numbers = #tpu.dot_dimension_numbers<[1], [0], [0], [1], [0, 0, 1, 1], [], []>} : vector<1x25xf32>, vector<25x120xf32>, vector<1x120xf32> -> vector<1x120xf32>
    %295 = arith.addf %290, %294 : vector<1x120xf32>
    %296 = vector.extract_strided_slice %279 {offsets = [3, 0], sizes = [1, 25], strides = [1, 1]} : vector<16x25xf32> to vector<1x25xf32>
    %c3_201 = arith.constant 3 : index
    %c0_202 = arith.constant 0 : index
    %c0_203 = arith.constant 0 : index
    %297 = vector.load %arg7[%c3_201, %c0_202, %c0_203] : memref<16x25x120xf32, #tpu.memory_space<vmem>>, vector<1x25x120xf32>
    %298 = vector.shape_cast %297 : vector<1x25x120xf32> to vector<25x120xf32>
    %cst_204 = arith.constant dense<0.000000e+00> : vector<1x120xf32>
    %299 = tpu.matmul %296, %298, %cst_204 {dimension_numbers = #tpu.dot_dimension_numbers<[1], [0], [0], [1], [0, 0, 1, 1], [], []>} : vector<1x25xf32>, vector<25x120xf32>, vector<1x120xf32> -> vector<1x120xf32>
    %300 = arith.addf %295, %299 : vector<1x120xf32>
    %301 = vector.extract_strided_slice %279 {offsets = [4, 0], sizes = [1, 25], strides = [1, 1]} : vector<16x25xf32> to vector<1x25xf32>
    %c4_205 = arith.constant 4 : index
    %c0_206 = arith.constant 0 : index
    %c0_207 = arith.constant 0 : index
    %302 = vector.load %arg7[%c4_205, %c0_206, %c0_207] : memref<16x25x120xf32, #tpu.memory_space<vmem>>, vector<1x25x120xf32>
    %303 = vector.shape_cast %302 : vector<1x25x120xf32> to vector<25x120xf32>
    %cst_208 = arith.constant dense<0.000000e+00> : vector<1x120xf32>
    %304 = tpu.matmul %301, %303, %cst_208 {dimension_numbers = #tpu.dot_dimension_numbers<[1], [0], [0], [1], [0, 0, 1, 1], [], []>} : vector<1x25xf32>, vector<25x120xf32>, vector<1x120xf32> -> vector<1x120xf32>
    %305 = arith.addf %300, %304 : vector<1x120xf32>
    %306 = vector.extract_strided_slice %279 {offsets = [5, 0], sizes = [1, 25], strides = [1, 1]} : vector<16x25xf32> to vector<1x25xf32>
    %c5_209 = arith.constant 5 : index
    %c0_210 = arith.constant 0 : index
    %c0_211 = arith.constant 0 : index
    %307 = vector.load %arg7[%c5_209, %c0_210, %c0_211] : memref<16x25x120xf32, #tpu.memory_space<vmem>>, vector<1x25x120xf32>
    %308 = vector.shape_cast %307 : vector<1x25x120xf32> to vector<25x120xf32>
    %cst_212 = arith.constant dense<0.000000e+00> : vector<1x120xf32>
    %309 = tpu.matmul %306, %308, %cst_212 {dimension_numbers = #tpu.dot_dimension_numbers<[1], [0], [0], [1], [0, 0, 1, 1], [], []>} : vector<1x25xf32>, vector<25x120xf32>, vector<1x120xf32> -> vector<1x120xf32>
    %310 = arith.addf %305, %309 : vector<1x120xf32>
    %311 = vector.extract_strided_slice %279 {offsets = [6, 0], sizes = [1, 25], strides = [1, 1]} : vector<16x25xf32> to vector<1x25xf32>
    %c6_213 = arith.constant 6 : index
    %c0_214 = arith.constant 0 : index
    %c0_215 = arith.constant 0 : index
    %312 = vector.load %arg7[%c6_213, %c0_214, %c0_215] : memref<16x25x120xf32, #tpu.memory_space<vmem>>, vector<1x25x120xf32>
    %313 = vector.shape_cast %312 : vector<1x25x120xf32> to vector<25x120xf32>
    %cst_216 = arith.constant dense<0.000000e+00> : vector<1x120xf32>
    %314 = tpu.matmul %311, %313, %cst_216 {dimension_numbers = #tpu.dot_dimension_numbers<[1], [0], [0], [1], [0, 0, 1, 1], [], []>} : vector<1x25xf32>, vector<25x120xf32>, vector<1x120xf32> -> vector<1x120xf32>
    %315 = arith.addf %310, %314 : vector<1x120xf32>
    %316 = vector.extract_strided_slice %279 {offsets = [7, 0], sizes = [1, 25], strides = [1, 1]} : vector<16x25xf32> to vector<1x25xf32>
    %c7_217 = arith.constant 7 : index
    %c0_218 = arith.constant 0 : index
    %c0_219 = arith.constant 0 : index
    %317 = vector.load %arg7[%c7_217, %c0_218, %c0_219] : memref<16x25x120xf32, #tpu.memory_space<vmem>>, vector<1x25x120xf32>
    %318 = vector.shape_cast %317 : vector<1x25x120xf32> to vector<25x120xf32>
    %cst_220 = arith.constant dense<0.000000e+00> : vector<1x120xf32>
    %319 = tpu.matmul %316, %318, %cst_220 {dimension_numbers = #tpu.dot_dimension_numbers<[1], [0], [0], [1], [0, 0, 1, 1], [], []>} : vector<1x25xf32>, vector<25x120xf32>, vector<1x120xf32> -> vector<1x120xf32>
    %320 = arith.addf %315, %319 : vector<1x120xf32>
    %321 = vector.extract_strided_slice %279 {offsets = [8, 0], sizes = [1, 25], strides = [1, 1]} : vector<16x25xf32> to vector<1x25xf32>
    %c8_221 = arith.constant 8 : index
    %c0_222 = arith.constant 0 : index
    %c0_223 = arith.constant 0 : index
    %322 = vector.load %arg7[%c8_221, %c0_222, %c0_223] : memref<16x25x120xf32, #tpu.memory_space<vmem>>, vector<1x25x120xf32>
    %323 = vector.shape_cast %322 : vector<1x25x120xf32> to vector<25x120xf32>
    %cst_224 = arith.constant dense<0.000000e+00> : vector<1x120xf32>
    %324 = tpu.matmul %321, %323, %cst_224 {dimension_numbers = #tpu.dot_dimension_numbers<[1], [0], [0], [1], [0, 0, 1, 1], [], []>} : vector<1x25xf32>, vector<25x120xf32>, vector<1x120xf32> -> vector<1x120xf32>
    %325 = arith.addf %320, %324 : vector<1x120xf32>
    %326 = vector.extract_strided_slice %279 {offsets = [9, 0], sizes = [1, 25], strides = [1, 1]} : vector<16x25xf32> to vector<1x25xf32>
    %c9_225 = arith.constant 9 : index
    %c0_226 = arith.constant 0 : index
    %c0_227 = arith.constant 0 : index
    %327 = vector.load %arg7[%c9_225, %c0_226, %c0_227] : memref<16x25x120xf32, #tpu.memory_space<vmem>>, vector<1x25x120xf32>
    %328 = vector.shape_cast %327 : vector<1x25x120xf32> to vector<25x120xf32>
    %cst_228 = arith.constant dense<0.000000e+00> : vector<1x120xf32>
    %329 = tpu.matmul %326, %328, %cst_228 {dimension_numbers = #tpu.dot_dimension_numbers<[1], [0], [0], [1], [0, 0, 1, 1], [], []>} : vector<1x25xf32>, vector<25x120xf32>, vector<1x120xf32> -> vector<1x120xf32>
    %330 = arith.addf %325, %329 : vector<1x120xf32>
    %331 = vector.extract_strided_slice %279 {offsets = [10, 0], sizes = [1, 25], strides = [1, 1]} : vector<16x25xf32> to vector<1x25xf32>
    %c10_229 = arith.constant 10 : index
    %c0_230 = arith.constant 0 : index
    %c0_231 = arith.constant 0 : index
    %332 = vector.load %arg7[%c10_229, %c0_230, %c0_231] : memref<16x25x120xf32, #tpu.memory_space<vmem>>, vector<1x25x120xf32>
    %333 = vector.shape_cast %332 : vector<1x25x120xf32> to vector<25x120xf32>
    %cst_232 = arith.constant dense<0.000000e+00> : vector<1x120xf32>
    %334 = tpu.matmul %331, %333, %cst_232 {dimension_numbers = #tpu.dot_dimension_numbers<[1], [0], [0], [1], [0, 0, 1, 1], [], []>} : vector<1x25xf32>, vector<25x120xf32>, vector<1x120xf32> -> vector<1x120xf32>
    %335 = arith.addf %330, %334 : vector<1x120xf32>
    %336 = vector.extract_strided_slice %279 {offsets = [11, 0], sizes = [1, 25], strides = [1, 1]} : vector<16x25xf32> to vector<1x25xf32>
    %c11_233 = arith.constant 11 : index
    %c0_234 = arith.constant 0 : index
    %c0_235 = arith.constant 0 : index
    %337 = vector.load %arg7[%c11_233, %c0_234, %c0_235] : memref<16x25x120xf32, #tpu.memory_space<vmem>>, vector<1x25x120xf32>
    %338 = vector.shape_cast %337 : vector<1x25x120xf32> to vector<25x120xf32>
    %cst_236 = arith.constant dense<0.000000e+00> : vector<1x120xf32>
    %339 = tpu.matmul %336, %338, %cst_236 {dimension_numbers = #tpu.dot_dimension_numbers<[1], [0], [0], [1], [0, 0, 1, 1], [], []>} : vector<1x25xf32>, vector<25x120xf32>, vector<1x120xf32> -> vector<1x120xf32>
    %340 = arith.addf %335, %339 : vector<1x120xf32>
    %341 = vector.extract_strided_slice %279 {offsets = [12, 0], sizes = [1, 25], strides = [1, 1]} : vector<16x25xf32> to vector<1x25xf32>
    %c12_237 = arith.constant 12 : index
    %c0_238 = arith.constant 0 : index
    %c0_239 = arith.constant 0 : index
    %342 = vector.load %arg7[%c12_237, %c0_238, %c0_239] : memref<16x25x120xf32, #tpu.memory_space<vmem>>, vector<1x25x120xf32>
    %343 = vector.shape_cast %342 : vector<1x25x120xf32> to vector<25x120xf32>
    %cst_240 = arith.constant dense<0.000000e+00> : vector<1x120xf32>
    %344 = tpu.matmul %341, %343, %cst_240 {dimension_numbers = #tpu.dot_dimension_numbers<[1], [0], [0], [1], [0, 0, 1, 1], [], []>} : vector<1x25xf32>, vector<25x120xf32>, vector<1x120xf32> -> vector<1x120xf32>
    %345 = arith.addf %340, %344 : vector<1x120xf32>
    %346 = vector.extract_strided_slice %279 {offsets = [13, 0], sizes = [1, 25], strides = [1, 1]} : vector<16x25xf32> to vector<1x25xf32>
    %c13_241 = arith.constant 13 : index
    %c0_242 = arith.constant 0 : index
    %c0_243 = arith.constant 0 : index
    %347 = vector.load %arg7[%c13_241, %c0_242, %c0_243] : memref<16x25x120xf32, #tpu.memory_space<vmem>>, vector<1x25x120xf32>
    %348 = vector.shape_cast %347 : vector<1x25x120xf32> to vector<25x120xf32>
    %cst_244 = arith.constant dense<0.000000e+00> : vector<1x120xf32>
    %349 = tpu.matmul %346, %348, %cst_244 {dimension_numbers = #tpu.dot_dimension_numbers<[1], [0], [0], [1], [0, 0, 1, 1], [], []>} : vector<1x25xf32>, vector<25x120xf32>, vector<1x120xf32> -> vector<1x120xf32>
    %350 = arith.addf %345, %349 : vector<1x120xf32>
    %351 = vector.extract_strided_slice %279 {offsets = [14, 0], sizes = [1, 25], strides = [1, 1]} : vector<16x25xf32> to vector<1x25xf32>
    %c14_245 = arith.constant 14 : index
    %c0_246 = arith.constant 0 : index
    %c0_247 = arith.constant 0 : index
    %352 = vector.load %arg7[%c14_245, %c0_246, %c0_247] : memref<16x25x120xf32, #tpu.memory_space<vmem>>, vector<1x25x120xf32>
    %353 = vector.shape_cast %352 : vector<1x25x120xf32> to vector<25x120xf32>
    %cst_248 = arith.constant dense<0.000000e+00> : vector<1x120xf32>
    %354 = tpu.matmul %351, %353, %cst_248 {dimension_numbers = #tpu.dot_dimension_numbers<[1], [0], [0], [1], [0, 0, 1, 1], [], []>} : vector<1x25xf32>, vector<25x120xf32>, vector<1x120xf32> -> vector<1x120xf32>
    %355 = arith.addf %350, %354 : vector<1x120xf32>
    %356 = vector.extract_strided_slice %279 {offsets = [15, 0], sizes = [1, 25], strides = [1, 1]} : vector<16x25xf32> to vector<1x25xf32>
    %c15_249 = arith.constant 15 : index
    %c0_250 = arith.constant 0 : index
    %c0_251 = arith.constant 0 : index
    %357 = vector.load %arg7[%c15_249, %c0_250, %c0_251] : memref<16x25x120xf32, #tpu.memory_space<vmem>>, vector<1x25x120xf32>
    %358 = vector.shape_cast %357 : vector<1x25x120xf32> to vector<25x120xf32>
    %cst_252 = arith.constant dense<0.000000e+00> : vector<1x120xf32>
    %359 = tpu.matmul %356, %358, %cst_252 {dimension_numbers = #tpu.dot_dimension_numbers<[1], [0], [0], [1], [0, 0, 1, 1], [], []>} : vector<1x25xf32>, vector<25x120xf32>, vector<1x120xf32> -> vector<1x120xf32>
    %360 = arith.addf %355, %359 : vector<1x120xf32>
    %c0_253 = arith.constant 0 : index
    %c0_254 = arith.constant 0 : index
    %361 = vector.load %arg8[%c0_253, %c0_254] : memref<1x120xf32, #tpu.memory_space<vmem>>, vector<1x120xf32>
    %362 = arith.addf %360, %361 : vector<1x120xf32>
    %cst_255 = arith.constant 0.000000e+00 : f32
    %363 = vector.broadcast %cst_255 : f32 to vector<1x120xf32>
    %364 = arith.maximumf %362, %363 : vector<1x120xf32>
    %c0_256 = arith.constant 0 : index
    %c0_257 = arith.constant 0 : index
    %365 = vector.load %arg9[%c0_256, %c0_257] : memref<120x84xf32, #tpu.memory_space<vmem>>, vector<120x84xf32>
    %cst_258 = arith.constant dense<0.000000e+00> : vector<1x84xf32>
    %366 = tpu.matmul %364, %365, %cst_258 {dimension_numbers = #tpu.dot_dimension_numbers<[1], [0], [0], [1], [0, 0, 1, 1], [], []>} : vector<1x120xf32>, vector<120x84xf32>, vector<1x84xf32> -> vector<1x84xf32>
    %c0_259 = arith.constant 0 : index
    %c0_260 = arith.constant 0 : index
    %367 = vector.load %arg10[%c0_259, %c0_260] : memref<1x84xf32, #tpu.memory_space<vmem>>, vector<1x84xf32>
    %368 = arith.addf %366, %367 : vector<1x84xf32>
    %cst_261 = arith.constant 0.000000e+00 : f32
    %369 = vector.broadcast %cst_261 : f32 to vector<1x84xf32>
    %370 = arith.maximumf %368, %369 : vector<1x84xf32>
    %c0_262 = arith.constant 0 : index
    %c0_263 = arith.constant 0 : index
    %371 = vector.load %arg11[%c0_262, %c0_263] : memref<84x10xf32, #tpu.memory_space<vmem>>, vector<84x10xf32>
    %cst_264 = arith.constant dense<0.000000e+00> : vector<1x10xf32>
    %372 = tpu.matmul %370, %371, %cst_264 {dimension_numbers = #tpu.dot_dimension_numbers<[1], [0], [0], [1], [0, 0, 1, 1], [], []>} : vector<1x84xf32>, vector<84x10xf32>, vector<1x10xf32> -> vector<1x10xf32>
    %c0_265 = arith.constant 0 : index
    %c0_266 = arith.constant 0 : index
    %373 = vector.load %arg12[%c0_265, %c0_266] : memref<1x10xf32, #tpu.memory_space<vmem>>, vector<1x10xf32>
    %374 = arith.addf %372, %373 : vector<1x10xf32>
    %c0_267 = arith.constant 0 : index
    %c0_268 = arith.constant 0 : index
    %c0_269 = arith.constant 0 : index
    %375 = vector.load %arg13[%c0_267, %c0_268, %c0_269] : memref<1x1x10xf32, #tpu.memory_space<vmem>>, vector<1x1x10xf32>
    %376 = vector.shape_cast %375 : vector<1x1x10xf32> to vector<1x10xf32>
    %377 = vector.shape_cast %374 : vector<1x10xf32> to vector<1x1x10xf32>
    tpu.vector_store %arg13[%c0_267, %c0_268, %c0_269], %377 {strides = array<i32>} : memref<1x1x10xf32, #tpu.memory_space<vmem>>, vector<1x1x10xf32>,
    return
  }
  func.func @transform_0(%arg0: i32) -> (i32, i32, i32) {
    %c0_i32 = arith.constant 0 : i32
    %c0_i32_0 = arith.constant 0 : i32
    %c0_i32_1 = arith.constant 0 : i32
    return %arg0, %c0_i32, %c0_i32_0 : i32, i32, i32
  }
  func.func @transform_1(%arg0: i32) -> (i32, i32, i32) {
    %c0_i32 = arith.constant 0 : i32
    %c0_i32_0 = arith.constant 0 : i32
    %c0_i32_1 = arith.constant 0 : i32
    %c0_i32_2 = arith.constant 0 : i32
    return %c0_i32, %c0_i32_0, %c0_i32_1 : i32, i32, i32
  }
  func.func @transform_2(%arg0: i32) -> (i32, i32) {
    %c0_i32 = arith.constant 0 : i32
    %c0_i32_0 = arith.constant 0 : i32
    %c0_i32_1 = arith.constant 0 : i32
    return %c0_i32, %c0_i32_0 : i32, i32
  }
  func.func @transform_3(%arg0: i32) -> (i32, i32, i32) {
    %c0_i32 = arith.constant 0 : i32
    %c0_i32_0 = arith.constant 0 : i32
    %c0_i32_1 = arith.constant 0 : i32
    %c0_i32_2 = arith.constant 0 : i32
    return %c0_i32, %c0_i32_0, %c0_i32_1 : i32, i32, i32
  }
  func.func @transform_4(%arg0: i32) -> (i32, i32) {
    %c0_i32 = arith.constant 0 : i32
    %c0_i32_0 = arith.constant 0 : i32
    %c0_i32_1 = arith.constant 0 : i32
    return %c0_i32, %c0_i32_0 : i32, i32
  }
  func.func @transform_5(%arg0: i32) -> (i32, i32) {
    %c0_i32 = arith.constant 0 : i32
    %c0_i32_0 = arith.constant 0 : i32
    %c0_i32_1 = arith.constant 0 : i32
    return %c0_i32, %c0_i32_0 : i32, i32
  }
  func.func @transform_6(%arg0: i32) -> (i32, i32, i32) {
    %c0_i32 = arith.constant 0 : i32
    %c0_i32_0 = arith.constant 0 : i32
    %c0_i32_1 = arith.constant 0 : i32
    %c0_i32_2 = arith.constant 0 : i32
    return %c0_i32, %c0_i32_0, %c0_i32_1 : i32, i32, i32
  }
  func.func @transform_7(%arg0: i32) -> (i32, i32) {
    %c0_i32 = arith.constant 0 : i32
    %c0_i32_0 = arith.constant 0 : i32
    %c0_i32_1 = arith.constant 0 : i32
    return %c0_i32, %c0_i32_0 : i32, i32
  }
  func.func @transform_8(%arg0: i32) -> (i32, i32) {
    %c0_i32 = arith.constant 0 : i32
    %c0_i32_0 = arith.constant 0 : i32
    %c0_i32_1 = arith.constant 0 : i32
    return %c0_i32, %c0_i32_0 : i32, i32
  }
  func.func @transform_9(%arg0: i32) -> (i32, i32) {
    %c0_i32 = arith.constant 0 : i32
    %c0_i32_0 = arith.constant 0 : i32
    %c0_i32_1 = arith.constant 0 : i32
    return %c0_i32, %c0_i32_0 : i32, i32
  }
  func.func @transform_10(%arg0: i32) -> (i32, i32) {
    %c0_i32 = arith.constant 0 : i32
    %c0_i32_0 = arith.constant 0 : i32
    %c0_i32_1 = arith.constant 0 : i32
    return %c0_i32, %c0_i32_0 : i32, i32
  }
  func.func @transform_11(%arg0: i32) -> (i32, i32) {
    %c0_i32 = arith.constant 0 : i32
    %c0_i32_0 = arith.constant 0 : i32
    %c0_i32_1 = arith.constant 0 : i32
    return %c0_i32, %c0_i32_0 : i32, i32
  }
  func.func @transform_12(%arg0: i32) -> (i32, i32, i32) {
    %c0_i32 = arith.constant 0 : i32
    %c0_i32_0 = arith.constant 0 : i32
    %c0_i32_1 = arith.constant 0 : i32
    return %arg0, %c0_i32, %c0_i32_0 : i32, i32, i32
  }
}

</mosaic_0001>

<bundles_post_ra>
// kernel: net_forward.1
= control target key start
LH: loop header
LB: loop body
LE: loop exit
PB: predicated region body
PF: predicated region fallthrough
CT: control target
= control target key end

     0   :  { %s22782_s0 = inlined_call_operand.vmem [shape: f32[2,3,1024], index: 0, kind: input, shape index: {}]   ;;  %s22783_s1 = inlined_call_operand.vmem [shape: f32[25,6,3], index: 1, kind: input, shape index: {}]   ;;  %s22784_s2 = inlined_call_operand.vmem [shape: f32[6,1], index: 2, kind: input, shape index: {}]   ;;  %s22785_s3 = inlined_call_operand.vmem [shape: f32[25,16,6], index: 3, kind: input, shape index: {}]   ;;  %s22786_s4 = inlined_call_operand.vmem [shape: f32[16,1], index: 4, kind: input, shape index: {}]   ;;  %s22787_s5 = inlined_call_operand.vmem [shape: f32[529,25], index: 5, kind: input, shape index: {}]   ;;  %s22788_s6 = inlined_call_operand.vmem [shape: f32[16,25,120], index: 6, kind: input, shape index: {}]   ;;  %s22789_s7 = inlined_call_operand.vmem [shape: f32[1,120], index: 7, kind: input, shape index: {}]   ;;  %s22790_s8 = inlined_call_operand.vmem [shape: f32[120,84], index: 8, kind: input, shape index: {}]   ;;  %s22791_s9 = inlined_call_operand.vmem [shape: f32[1,84], index: 9, kind: input, shape index: {}]   ;;  %s22792_s10 = inlined_call_operand.vmem [shape: f32[84,10], index: 10, kind: input, shape index: {}]   ;;  %s22793_s11 = inlined_call_operand.vmem [shape: f32[1,10], index: 11, kind: input, shape index: {}]   ;;  %s22794_s12 = inlined_call_operand.hbm [shape: f32[2,1,10], index: 12, kind: output, shape index: {}]  }
   0x1   :  { %22822 = sst [smem:[#allocation13_spill]] %s22782_s0 }
   0x2   :  { %22823 = sst [smem:[#allocation14_spill]] %s22783_s1 }
   0x3   :  { %17 = vsyncpa [#allocation3], 0 }
   0x4   :  { %19 = vsyncpa [#allocation3 + $0x1], 0  ;;  %s19580_s21 = smov 0   ;;  %s19582_s22 = smov 0  }
   0x5   :  { %s19584_s23 = smov 0   ;;  %s19586_s24 = smov 0  }
   0x6 LB: > { %s19601_s25 = sadd.s32 4294967295, %s19484_s24   ;;  %s17173_s26 = sadd.s32 4294967294, %s19484_s24   ;;  %s19484_s24 = sphi %s19586_s24, %s22859_s24   ;;  %s19480_s23 = sphi %s19584_s23, %s22858_s23   ;;  %s19476_s22 = sphi %s19582_s22, %s22857_s22   ;;  %s19472_s21 = sphi %s19580_s21, %s22856_s21  }
   0x7   : > { %s19605_s27 = sadd.s32 1, %s19484_s24   ;;  %s289_s28 = sadd.s32 1, %s19480_s23 }
   0x8   : > { %s286_s29 = ssub.s32 %s19484_s24, %s19605_s27  ;;  %p299_p0 = scmp.ne.s32.totalorder %s19480_s23, %s19476_s22 }
   0x9   : > { %p287_p1 = scmp.eq.s32.totalorder %s286_s29, 0  ;;  %p300_p2 = scmp.eq.s32.totalorder %s19601_s25, 1 }
   0xa   : > { %p305_p3 = scmp.ne.s32.totalorder %s19476_s22, %s19472_s21  ;;  %p306_p4 = scmp.eq.s32.totalorder %s17173_s26, 1 }
   0xb   : > { %s19616_s30 = scalar_select %p287_p1, %s19480_s23, %s289_s28  }
   0xc   : > { %p19618_p5 = por %p300_p2, %p299_p0  ;;  %p19622_p6 = por %p306_p4, %p305_p3 }
   0xd   : > { %p17176_p7 = scmp.ge.s32.totalorder %s19484_s24, 1  ;;  %p365_p8 = scmp.lt.s32.totalorder %s19484_s24, 3 }
   0xf   : > { %p366_p9 = pnand %p17176_p7, %p365_p8 }
  0x11   : > { %369 = sbr.rel (%p366_p9) target bundleno = 2860 (0xb2c), region = 68 }
  0x18   : > { %p406_p10 = scmp.lt.s32.totalorder %s19601_s25, 1  ;;  %s22826_s0 = sld [smem:[#allocation13_spill]]  ;;  %v22811_v0 = vmov 0.0   ;;  %vm439_vm0 = vcmask 1039360   ;;  %vm450_vm1 = vcmask 1042432   ;;  %vm446_vm2 = vcmask 23552  }
  0x19   : > { %529 = vmatprep.mubr.f32.mxu1 %v22811_v0  ;;  %671 = vmatprep.mubr.f32.mxu0 %v22811_v0  ;;  %s19487_s20 = smov 127   ;;  %s22801_s26 = smov 126   ;;  %vm1064_vm3 = vcmask 1031168   ;;  %vm19496_vm4 = vmmov 0   ;;  %vm1394_vm5 = vcmask 1022976   ;;  %vm1724_vm6 = vcmask 1014784  }
  0x1a   : > { %s407_s15 = scalar_select %p406_p10, %s19601_s25, 1  ;;  %vm2057_vm7 = vcmask 785408   ;;  %vm2390_vm8 = vcmask 777216   ;;  %vm2723_vm9 = vcmask 769024   ;;  %vm3056_vm10 = vcmask 760832  }
  0x1b   : > { %s19489_s28 = smov 125   ;;  %s22809_s29 = smov 124   ;;  %vm3389_vm11 = vcmask 752640   ;;  %vm3722_vm12 = vcmask 523264   ;;  %vm4055_vm13 = vcmask 515072   ;;  %vm4388_vm14 = vcmask 506880  }
  0x1c   : > { %s17902_s16 = sshll.u32 %s407_s15, 5  ;;  %s19491_s15 = smov 96   ;;  %vm4721_vm15 = vcmask 498688  }
  0x1d   : > { %s19493_s17 = smov 94   ;;  %s19494_s18 = smov 93  }
  0x1e   : > { %s19633_s19 = scalar_lea.vmem %s22826_s0, %s17902_s16  ;;  %s19492_s16 = smov 95  }
  0x1f   : > { %v19638_v1 = vld [vmem:[%s19633_s19 + $0x8] sm:$0x77]  ;;  %v19641_v2 = vld [vmem:[%s19633_s19] sm:$0x77]  ;;  %v19652_v4 = vld [vmem:[%s19633_s19 + $0x10] sm:$0x77] }
  0x20   : > { %429 = vrot.lane.b32.xlu0 %v19638_v1, %s19487_s20  ;;  %425 = vrot.lane.b32.xlu1 %v19641_v2, %s19487_s20  ;;  %v19649_v3 = vcombine.high %v19638_v1, %v19638_v1  ;;  %v19660_v5 = vcombine.high %v19652_v4, %v19652_v4  ;;  %v19664_v6 = vcombine.high %v19641_v2, %v19641_v2  ;;  %v19671_v7 = vld [vmem:[%s19633_s19 + $0x18] sm:$0x77]  ;;  %s22827_s1 = sld [smem:[#allocation14_spill]] }
  0x21   : > { %v19731_v8 = vcombine.high %v19671_v7, %v19671_v7 }
  0x24   : > { %433 = vrot.lane.b32.xlu0 %v19652_v4, %s19487_s20  ;;  %431 = vrot.lane.b32.xlu1 %v19649_v3, %s19487_s20 }
  0x26   : > { %v17179_v17 = vld [vmem:[%s22827_s1 + $0x8] sm:$0x3f]  ;;  %v415_v27 = vld [vmem:[%s22827_s1] sm:$0x3f]  ;;  %v17202_v37 = vld [vmem:[%s22827_s1 + $0x10] sm:$0x3f] }
  0x27   : > { %v17214_v49 = vld [vmem:[%s22827_s1 + $0x18] sm:$0x3f] }
  0x28   : > { %435 = vrot.lane.b32.xlu1 %v19660_v5, %s19487_s20  ;;  %427 = vrot.lane.b32.xlu0 %v19664_v6, %s19487_s20 }
  0x2c   : > { %1052 = vrot.lane.b32.xlu1 %v19664_v6, %s22801_s26  ;;  %437 = vrot.lane.b32.xlu0 %v19671_v7, %s19487_s20 }
  0x30   : > { %1050 = vrot.lane.b32.xlu1 %v19641_v2, %s22801_s26  ;;  %1054 = vrot.lane.b32.xlu0 %v19638_v1, %s22801_s26 }
  0x34   : > { %1058 = vrot.lane.b32.xlu1 %v19652_v4, %s22801_s26  ;;  %1056 = vrot.lane.b32.xlu0 %v19649_v3, %s22801_s26 }
  0x38   : > { %1062 = vrot.lane.b32.xlu1 %v19671_v7, %s22801_s26  ;;  %1060 = vrot.lane.b32.xlu0 %v19660_v5, %s22801_s26 }
  0x3c   : > { %1384 = vrot.lane.b32.xlu1 %v19638_v1, %s19489_s28  ;;  %1382 = vrot.lane.b32.xlu0 %v19664_v6, %s19489_s28 }
  0x40   : > { %1386 = vrot.lane.b32.xlu1 %v19649_v3, %s19489_s28  ;;  %1380 = vrot.lane.b32.xlu0 %v19641_v2, %s19489_s28 }
  0x44   : > { %1390 = vrot.lane.b32.xlu1 %v19660_v5, %s19489_s28  ;;  %1388 = vrot.lane.b32.xlu0 %v19652_v4, %s19489_s28 }
  0x48   : > { %1712 = vrot.lane.b32.xlu1 %v19664_v6, %s22809_s29  ;;  %1392 = vrot.lane.b32.xlu0 %v19671_v7, %s19489_s28 }
  0x4c   : > { %1710 = vrot.lane.b32.xlu1 %v19641_v2, %s22809_s29  ;;  %1714 = vrot.lane.b32.xlu0 %v19638_v1, %s22809_s29 }
  0x50   : > { %1718 = vrot.lane.b32.xlu1 %v19652_v4, %s22809_s29  ;;  %1716 = vrot.lane.b32.xlu0 %v19649_v3, %s22809_s29 }
  0x54   : > { %1722 = vrot.lane.b32.xlu1 %v19671_v7, %s22809_s29  ;;  %1720 = vrot.lane.b32.xlu0 %v19660_v5, %s22809_s29 }
  0x58   : > { %2045 = vrot.lane.b32.xlu1 %v19638_v1, %s19491_s15  ;;  %2043 = vrot.lane.b32.xlu0 %v19664_v6, %s19491_s15 }
  0x5c   : > { %2047 = vrot.lane.b32.xlu1 %v19649_v3, %s19491_s15  ;;  %2041 = vrot.lane.b32.xlu0 %v19641_v2, %s19491_s15 }
  0x60   : > { %2051 = vrot.lane.b32.xlu1 %v19660_v5, %s19491_s15  ;;  %2049 = vrot.lane.b32.xlu0 %v19652_v4, %s19491_s15 }
  0x64   : > { %2055 = vrot.lane.b32.xlu1 %v19731_v8, %s19491_s15  ;;  %2053 = vrot.lane.b32.xlu0 %v19671_v7, %s19491_s15 }
  0x68   : > { %2378 = vrot.lane.b32.xlu1 %v19638_v1, %s19492_s16  ;;  %2376 = vrot.lane.b32.xlu0 %v19664_v6, %s19492_s16 }
  0x6c   : > { %2380 = vrot.lane.b32.xlu1 %v19649_v3, %s19492_s16  ;;  %2374 = vrot.lane.b32.xlu0 %v19641_v2, %s19492_s16 }
  0x70   : > { %2384 = vrot.lane.b32.xlu1 %v19660_v5, %s19492_s16  ;;  %2382 = vrot.lane.b32.xlu0 %v19652_v4, %s19492_s16 }
  0x74   : > { %2388 = vrot.lane.b32.xlu1 %v19731_v8, %s19492_s16  ;;  %2386 = vrot.lane.b32.xlu0 %v19671_v7, %s19492_s16  ;;  %s19495_s16 = smov 92  }
  0x78   : > { %2711 = vrot.lane.b32.xlu1 %v19638_v1, %s19493_s17  ;;  %2709 = vrot.lane.b32.xlu0 %v19664_v6, %s19493_s17 }
  0x7c   : > { %2713 = vrot.lane.b32.xlu1 %v19649_v3, %s19493_s17  ;;  %2707 = vrot.lane.b32.xlu0 %v19641_v2, %s19493_s17 }
  0x80   : > { %2717 = vrot.lane.b32.xlu1 %v19660_v5, %s19493_s17  ;;  %2715 = vrot.lane.b32.xlu0 %v19652_v4, %s19493_s17 }
  0x84   : > { %2721 = vrot.lane.b32.xlu1 %v19731_v8, %s19493_s17  ;;  %2719 = vrot.lane.b32.xlu0 %v19671_v7, %s19493_s17  ;;  %s22797_s17 = smov 62  }
  0x88   : > { %3044 = vrot.lane.b32.xlu1 %v19638_v1, %s19494_s18  ;;  %3042 = vrot.lane.b32.xlu0 %v19664_v6, %s19494_s18 }
  0x8c   : > { %3046 = vrot.lane.b32.xlu1 %v19649_v3, %s19494_s18  ;;  %3040 = vrot.lane.b32.xlu0 %v19641_v2, %s19494_s18 }
  0x90   : > { %3050 = vrot.lane.b32.xlu1 %v19660_v5, %s19494_s18  ;;  %3048 = vrot.lane.b32.xlu0 %v19652_v4, %s19494_s18 }
  0x92   : > { %v430_v9 = vpop.permute.xlu0 %429  ;;  %v426_v10 = vpop.permute.xlu1 %425 }
  0x94   : > { %3054 = vrot.lane.b32.xlu1 %v19731_v8, %s19494_s18  ;;  %3052 = vrot.lane.b32.xlu0 %v19671_v7, %s19494_s18  ;;  %s22832_s18 = smov 60  }
  0x96   : > { %v434_v11 = vpop.permute.xlu0 %433  ;;  %v432_v12 = vpop.permute.xlu1 %431 }
  0x97   : > { %v19780_v19 = vsel %vm439_vm0, %v432_v12, %v434_v11  ;;  %v19785_v21 = vsel %vm439_vm0, %v430_v9, %v432_v12 }
  0x98   : > { %3377 = vrot.lane.b32.xlu1 %v19638_v1, %s19495_s16  ;;  %3375 = vrot.lane.b32.xlu0 %v19664_v6, %s19495_s16 }
  0x9a   : > { %v436_v13 = vpop.permute.xlu1 %435  ;;  %v428_v14 = vpop.permute.xlu0 %427 }
  0x9b   : > { %v19766_v15 = vsel %vm439_vm0, %v428_v14, %v430_v9  ;;  %v440_v16 = vsel %vm439_vm0, %v426_v10, %v428_v14  ;;  %v19803_v23 = vsel %vm439_vm0, %v434_v11, %v436_v13  ;;  %v17226_v9 = vld [vmem:[%s22827_s1 + $0x20] sm:$0x3f] }
  0x9c   : > { %3379 = vrot.lane.b32.xlu1 %v19649_v3, %s19495_s16  ;;  %3373 = vrot.lane.b32.xlu0 %v19641_v2, %s19495_s16 }
  0x9d   : > { %17180 = vmatprep.subr.msk.mxu1 %vm450_vm1, %v19766_v15 }
  0x9e   : > { %17181 = vmatpush1.msk.msra.mxu1 %vm450_vm1, %v440_v16  ;;  %v1053_v18 = vpop.permute.xlu1 %1052  ;;  %v19782_v20 = vpop.permute.xlu0 %437 }
  0x9f   : > { %17182 = vmatmul.mubr.msk.f32.vlgmr.msra.gmra.mrb[0].mxu1 %vm446_vm2, %v17179_v17  ;;  %17183 = vmatprep.subr.msk.mxu1 %vm450_vm1, %v19780_v19  ;;  %v19792_v22 = vsel %vm439_vm0, %v436_v13, %v19782_v20 }
  0xa0   : > { %17184 = vmatpush1.msk.msra.mxu1 %vm450_vm1, %v19785_v21  ;;  %3383 = vrot.lane.b32.xlu1 %v19660_v5, %s19495_s16 }
  0xa1   : > { %3381 = vrot.lane.b32.xlu0 %v19652_v4, %s19495_s16  ;;  %17186 = vmatprep.subr.msk.mxu0 %vm450_vm1, %v19792_v22 }
  0xa2   : > { %600 = vmatprep.mubr.f32.mxu1 %v22811_v0  ;;  %17187 = vmatpush1.msk.msra.mxu0 %vm450_vm1, %v19803_v23  ;;  %v1051_v24 = vpop.permute.xlu1 %1050  ;;  %v1055_v25 = vpop.permute.xlu0 %1054 }
  0xa3   : > { %18217 = vmatprep.subr.mxu1 %v22811_v0  ;;  %17185 = vmatmul.mubr.msk.f32.vlgmr.msra.gmra.mrb[2].mxu1 %vm446_vm2, %v17179_v17  ;;  %v19836_v29 = vsel %vm1064_vm3, %v1053_v18, %v1055_v25  ;;  %v1065_v32 = vsel %vm1064_vm3, %v1051_v24, %v1053_v18  ;;  %v17238_v18 = vld [vmem:[%s22827_s1 + $0x28] sm:$0x3f] }
  0xa4   : > { %17188 = vmatmul.mubr.msk.f32.vlgmr.msra.gmra.mrb[0].mxu0 %vm446_vm2, %v17179_v17  ;;  %18218 = vmatpush3.msk.msra.mxu1 %vm450_vm1, %v19782_v20 }
  0xa5   : > { %17191 = vmatprep.subr.msk.mxu0 %vm450_vm1, %v19664_v6  ;;  %3387 = vrot.lane.b32.xlu1 %v19731_v8, %s19495_s16 }
  0xa6   : > { %3385 = vrot.lane.b32.xlu0 %v19671_v7, %s19495_s16  ;;  %17192 = vmatpush1.msk.msra.mxu0 %vm450_vm1, %v19641_v2  ;;  %v1059_v26 = vpop.permute.xlu1 %1058  ;;  %v1057_v28 = vpop.permute.xlu0 %1056  ;;  %s22795_s16 = smov 64  }
  0xa7   : > { %18219 = vmatprep.mubr.msk.f32.mxu1 %vm19496_vm4, %v22811_v0  ;;  %829 = vmatprep.mubr.f32.mxu0 %v22811_v0  ;;  %v19862_v36 = vsel %vm1064_vm3, %v1057_v28, %v1059_v26  ;;  %v19879_v40 = vsel %vm1064_vm3, %v1055_v25, %v1057_v28 }
  0xa8   : > { %17197 = vmatprep.subr.msk.mxu0 %vm450_vm1, %v19660_v5  ;;  %18220 = vmatmul.mubr.msk.f32.vlgmr.msra.gmra.mrb[4].mxu1 %vm446_vm2, %v17179_v17 }
  0xa9   : > { %17193 = vmatmul.mubr.msk.f32.vlgmr.msra.gmra.mrb[2].mxu0 %vm446_vm2, %v415_v27  ;;  %17194 = vmatprep.subr.msk.mxu1 %vm450_vm1, %v19649_v3 }
  0xaa   : > { %17198 = vmatpush1.msk.msra.mxu0 %vm450_vm1, %v19652_v4  ;;  %3710 = vrot.lane.b32.xlu1 %v19638_v1, %s22795_s16  ;;  %v19840_v30 = vpop.permute.xlu1 %1062  ;;  %v1061_v31 = vpop.permute.xlu0 %1060 }
  0xab   : > { %17203 = vmatprep.subr.msk.mxu0 %vm450_vm1, %v19836_v29  ;;  %3708 = vrot.lane.b32.xlu0 %v19664_v6, %s22795_s16  ;;  %v19856_v33 = vsel %vm1064_vm3, %v1061_v31, %v19840_v30  ;;  %v19882_v41 = vsel %vm1064_vm3, %v1059_v26, %v1061_v31 }
  0xac   : > { %17195 = vmatpush1.msk.msra.mxu1 %vm450_vm1, %v19638_v1  ;;  %900 = vmatprep.mubr.f32.mxu1 %v22811_v0 }
  0xad   : > { %971 = vmatprep.mubr.f32.mxu0 %v22811_v0  ;;  %18222 = vmatprep.subr.mxu1 %v22811_v0 }
  0xae   : > { %17196 = vmatmul.mubr.msk.f32.vlgmr.msra.gmra.mrb[2].mxu1 %vm446_vm2, %v415_v27  ;;  %17199 = vmatmul.mubr.msk.f32.vlgmr.msra.gmra.mrb[0].mxu0 %vm446_vm2, %v415_v27  ;;  %v1385_v34 = vpop.permute.xlu1 %1384  ;;  %v1383_v35 = vpop.permute.xlu0 %1382 }
  0xaf   : > { %18223 = vmatpush3.msk.msra.mxu1 %vm450_vm1, %v19671_v7  ;;  %17204 = vmatpush1.msk.msra.mxu0 %vm450_vm1, %v1065_v32  ;;  %v19887_v42 = vsel %vm1394_vm5, %v1383_v35, %v1385_v34 }
  0xb0   : > { %17206 = vmatprep.subr.msk.mxu1 %vm450_vm1, %v19862_v36  ;;  %3712 = vrot.lane.b32.xlu1 %v19649_v3, %s22795_s16 }
  0xb1   : > { %3706 = vrot.lane.b32.xlu0 %v19641_v2, %s22795_s16  ;;  %17209 = vmatprep.subr.msk.mxu0 %vm450_vm1, %v19856_v33 }
  0xb2   : > { %18224 = vmatprep.mubr.msk.f32.mxu1 %vm19496_vm4, %v22811_v0  ;;  %1152 = vmatprep.mubr.f32.mxu0 %v22811_v0  ;;  %v1387_v38 = vpop.permute.xlu1 %1386  ;;  %v1381_v39 = vpop.permute.xlu0 %1380 }
  0xb3   : > { %18225 = vmatmul.mubr.msk.f32.vlgmr.msra.gmra.mrb[6].mxu1 %vm446_vm2, %v415_v27  ;;  %17205 = vmatmul.mubr.msk.f32.vlgmr.msra.gmra.mrb[2].mxu0 %vm446_vm2, %v17202_v37  ;;  %v1395_v45 = vsel %vm1394_vm5, %v1381_v39, %v1383_v35  ;;  %v19927_v50 = vsel %vm1394_vm5, %v1385_v34, %v1387_v38 }
  0xb4   : > { %17207 = vmatpush1.msk.msra.mxu1 %vm450_vm1, %v19879_v40  ;;  %17210 = vmatpush1.msk.msra.mxu0 %vm450_vm1, %v19882_v41 }
  0xb5   : > { %3716 = vrot.lane.b32.xlu1 %v19660_v5, %s22795_s16  ;;  %3714 = vrot.lane.b32.xlu0 %v19652_v4, %s22795_s16 }
  0xb6   : > { %17215 = vmatprep.subr.msk.mxu0 %vm450_vm1, %v19887_v42  ;;  %1223 = vmatprep.mubr.f32.mxu1 %v22811_v0  ;;  %v1391_v43 = vpop.permute.xlu1 %1390  ;;  %v1389_v44 = vpop.permute.xlu0 %1388 }
  0xb7   : > { %18227 = vmatprep.subr.mxu1 %v22811_v0  ;;  %17208 = vmatmul.mubr.msk.f32.vlgmr.msra.gmra.mrb[2].mxu1 %vm446_vm2, %v17202_v37  ;;  %v19911_v46 = vsel %vm1394_vm5, %v1387_v38, %v1389_v44  ;;  %v19954_v55 = vsel %vm1394_vm5, %v1389_v44, %v1391_v43 }
  0xb8   : > { %18228 = vmatpush3.msk.msra.mxu1 %vm450_vm1, %v19840_v30  ;;  %1294 = vmatprep.mubr.f32.mxu0 %v22811_v0 }
  0xb9   : > { %3720 = vrot.lane.b32.xlu1 %v19731_v8, %s22795_s16  ;;  %3718 = vrot.lane.b32.xlu0 %v19671_v7, %s22795_s16  ;;  %s19498_s16 = smov 63  }
  0xba   : > { %17211 = vmatmul.mubr.msk.f32.vlgmr.msra.gmra.mrb[0].mxu0 %vm446_vm2, %v17202_v37  ;;  %18229 = vmatprep.mubr.msk.f32.mxu1 %vm19496_vm4, %v22811_v0  ;;  %v1713_v47 = vpop.permute.xlu1 %1712  ;;  %v19916_v48 = vpop.permute.xlu0 %1392 }
  0xbb   : > { %17216 = vmatpush1.msk.msra.mxu0 %vm450_vm1, %v1395_v45  ;;  %18230 = vmatmul.mubr.msk.f32.vlgmr.msra.gmra.mrb[8].mxu1 %vm446_vm2, %v17202_v37  ;;  %v19935_v51 = vsel %vm1394_vm5, %v1391_v43, %v19916_v48 }
  0xbc   : > { %17218 = vmatprep.subr.msk.mxu1 %vm450_vm1, %v19911_v46  ;;  %1553 = vmatprep.mubr.f32.mxu1 %v22811_v0 }
  0xbd   : > { %4043 = vrot.lane.b32.xlu1 %v19638_v1, %s19498_s16  ;;  %4041 = vrot.lane.b32.xlu0 %v19664_v6, %s19498_s16 }
  0xbe   : > { %17219 = vmatpush1.msk.msra.mxu1 %vm450_vm1, %v19927_v50  ;;  %1482 = vmatprep.mubr.f32.mxu0 %v22811_v0  ;;  %v1711_v52 = vpop.permute.xlu1 %1710  ;;  %v1715_v53 = vpop.permute.xlu0 %1714 }
  0xbf   : > { %18232 = vmatprep.subr.mxu1 %v22811_v0  ;;  %17220 = vmatmul.mubr.msk.f32.vlgmr.msra.gmra.mrb[2].mxu1 %vm446_vm2, %v17214_v49  ;;  %v19951_v54 = vsel %vm1724_vm6, %v1713_v47, %v1715_v53  ;;  %v1725_v59 = vsel %vm1724_vm6, %v1711_v52, %v1713_v47  ;;  %v17250_v47 = vld [vmem:[%s22827_s1 + $0x30] sm:$0x3f] }
  0xc0   : > { %18233 = vmatpush3.msk.msra.mxu1 %vm450_vm1, %v19916_v48  ;;  %17221 = vmatprep.subr.msk.mxu0 %vm450_vm1, %v19935_v51 }
  0xc1   : > { %4045 = vrot.lane.b32.xlu1 %v19649_v3, %s19498_s16  ;;  %4039 = vrot.lane.b32.xlu0 %v19641_v2, %s19498_s16 }
  0xc2   : > { %17217 = vmatmul.mubr.msk.f32.vlgmr.msra.gmra.mrb[2].mxu0 %vm446_vm2, %v17214_v49  ;;  %v1719_v56 = vpop.permute.xlu1 %1718  ;;  %v1717_v57 = vpop.permute.xlu0 %1716  ;;  %18234 = vmatprep.mubr.msk.f32.mxu1 %vm19496_vm4, %v22811_v0 }
  0xc3   : > { %17222 = vmatpush1.msk.msra.mxu0 %vm450_vm1, %v19954_v55  ;;  %1624 = vmatprep.mubr.f32.mxu0 %v22811_v0  ;;  %v19963_v58 = vsel %vm1724_vm6, %v1717_v57, %v1719_v56  ;;  %v19969_v60 = vsel %vm1724_vm6, %v1715_v53, %v1717_v57 }
  0xc4   : > { %17227 = vmatprep.subr.msk.mxu0 %vm450_vm1, %v19951_v54  ;;  %17230 = vmatprep.subr.msk.mxu1 %vm450_vm1, %v19963_v58 }
  0xc5   : > { %4049 = vrot.lane.b32.xlu1 %v19660_v5, %s19498_s16  ;;  %4047 = vrot.lane.b32.xlu0 %v19652_v4, %s19498_s16 }
  0xc6   : > { %17223 = vmatmul.mubr.msk.f32.vlgmr.msra.gmra.mrb[0].mxu0 %vm446_vm2, %v17214_v49  ;;  %18235 = vmatmul.mubr.msk.f32.vlgmr.msra.gmra.mrb[10].mxu1 %vm446_vm2, %v17214_v49  ;;  %v19979_v61 = vpop.permute.xlu1 %1722  ;;  %v1721_v62 = vpop.permute.xlu0 %1720 }
  0xc7   : > { %17228 = vmatpush1.msk.msra.mxu0 %vm450_vm1, %v1725_v59  ;;  %17231 = vmatpush1.msk.msra.mxu1 %vm450_vm1, %v19969_v60  ;;  %v19986_v63 = vsel %vm1724_vm6, %v1721_v62, %v19979_v61  ;;  %v19992_v10 = vsel %vm1724_vm6, %v1719_v56, %v1721_v62 }
  0xc8   : > { %1812 = vmatprep.mubr.f32.mxu0 %v22811_v0  ;;  %17233 = vmatprep.subr.msk.mxu0 %vm450_vm1, %v19986_v63 }
  0xc9   : > { %4053 = vrot.lane.b32.xlu1 %v19731_v8, %s19498_s16  ;;  %4051 = vrot.lane.b32.xlu0 %v19671_v7, %s19498_s16  ;;  %s19500_s16 = smov 61  }
  0xca   : > { %17229 = vmatmul.mubr.msk.f32.vlgmr.msra.gmra.mrb[2].mxu0 %vm446_vm2, %v17226_v9  ;;  %v2046_v11 = vpop.permute.xlu1 %2045  ;;  %1883 = vmatprep.mubr.f32.mxu1 %v22811_v0  ;;  %v2044_v12 = vpop.permute.xlu0 %2043 }
  0xcb   : > { %17234 = vmatpush1.msk.msra.mxu0 %vm450_vm1, %v19992_v10  ;;  %18237 = vmatprep.subr.mxu1 %v22811_v0  ;;  %v2059_v13 = vsel %vm2057_vm7, %v2044_v12, %v2046_v11 }
  0xcc   : > { %17232 = vmatmul.mubr.msk.f32.vlgmr.msra.gmra.mrb[2].mxu1 %vm446_vm2, %v17226_v9  ;;  %17239 = vmatprep.subr.msk.mxu0 %vm450_vm1, %v2059_v13 }
  0xcd   : > { %4376 = vrot.lane.b32.xlu1 %v19638_v1, %s22797_s17  ;;  %4374 = vrot.lane.b32.xlu0 %v19664_v6, %s22797_s17 }
  0xce   : > { %18238 = vmatpush3.msk.msra.mxu1 %vm450_vm1, %v19979_v61  ;;  %v2048_v14 = vpop.permute.xlu1 %2047  ;;  %v2042_v16 = vpop.permute.xlu0 %2041  ;;  %1954 = vmatprep.mubr.f32.mxu0 %v22811_v0 }
  0xcf   : > { %v2058_v17 = vsel %vm2057_vm7, %v2042_v16, %v2044_v12  ;;  %17235 = vmatmul.mubr.msk.f32.vlgmr.msra.gmra.mrb[0].mxu0 %vm446_vm2, %v17226_v9  ;;  %18239 = vmatprep.mubr.msk.f32.mxu1 %vm19496_vm4, %v22811_v0  ;;  %v2060_v27 = vsel %vm2057_vm7, %v2046_v11, %v2048_v14 }
  0xd0   : > { %17240 = vmatpush1.msk.msra.mxu0 %vm450_vm1, %v2058_v17  ;;  %18240 = vmatmul.mubr.msk.f32.vlgmr.msra.gmra.mrb[12].mxu1 %vm446_vm2, %v17226_v9 }
  0xd1   : > { %4378 = vrot.lane.b32.xlu1 %v19649_v3, %s22797_s17  ;;  %4372 = vrot.lane.b32.xlu0 %v19641_v2, %s22797_s17 }
  0xd2   : > { %v2052_v24 = vpop.permute.xlu1 %2051  ;;  %v2050_v25 = vpop.permute.xlu0 %2049  ;;  %2217 = vmatprep.mubr.f32.mxu1 %v22811_v0  ;;  %2146 = vmatprep.mubr.f32.mxu0 %v22811_v0 }
  0xd3   : > { %v2061_v26 = vsel %vm2057_vm7, %v2048_v14, %v2050_v25  ;;  %17241 = vmatmul.mubr.msk.f32.vlgmr.msra.gmra.mrb[2].mxu0 %vm446_vm2, %v17238_v18  ;;  %v2062_v35 = vsel %vm2057_vm7, %v2050_v25, %v2052_v24 }
  0xd4   : > { %17242 = vmatprep.subr.msk.mxu1 %vm450_vm1, %v2061_v26  ;;  %2288 = vmatprep.mubr.f32.mxu0 %v22811_v0 }
  0xd5   : > { %4382 = vrot.lane.b32.xlu1 %v19660_v5, %s22797_s17  ;;  %4380 = vrot.lane.b32.xlu0 %v19652_v4, %s22797_s17 }
  0xd6   : > { %17243 = vmatpush1.msk.msra.mxu1 %vm450_vm1, %v2060_v27  ;;  %v2056_v28 = vpop.permute.xlu1 %2055  ;;  %v2054_v31 = vpop.permute.xlu0 %2053 }
  0xd7   : > { %v2064_v32 = vsel %vm2057_vm7, %v2054_v31, %v2056_v28  ;;  %18242 = vmatprep.subr.mxu1 %v22811_v0  ;;  %17244 = vmatmul.mubr.msk.f32.vlgmr.msra.gmra.mrb[2].mxu1 %vm446_vm2, %v17238_v18  ;;  %v2063_v34 = vsel %vm2057_vm7, %v2052_v24, %v2054_v31  ;;  %v17262_v24 = vld [vmem:[%s22827_s1 + $0x38] sm:$0x3f] }
  0xd8   : > { %17245 = vmatprep.subr.msk.mxu0 %vm450_vm1, %v2063_v34  ;;  %18243 = vmatpush3.msk.msra.mxu1 %vm450_vm1, %v2064_v32 }
  0xd9   : > { %4386 = vrot.lane.b32.xlu1 %v19731_v8, %s22797_s17  ;;  %4384 = vrot.lane.b32.xlu0 %v19671_v7, %s22797_s17  ;;  %s22799_s17 = smov 60  }
  0xda   : > { %17246 = vmatpush1.msk.msra.mxu0 %vm450_vm1, %v2062_v35  ;;  %v2379_v37 = vpop.permute.xlu1 %2378  ;;  %v2377_v38 = vpop.permute.xlu0 %2376  ;;  %18244 = vmatprep.mubr.msk.f32.mxu1 %vm19496_vm4, %v22811_v0 }
  0xdb   : > { %v2392_v39 = vsel %vm2390_vm8, %v2377_v38, %v2379_v37  ;;  %17247 = vmatmul.mubr.msk.f32.vlgmr.msra.gmra.mrb[0].mxu0 %vm446_vm2, %v17238_v18  ;;  %18245 = vmatmul.mubr.msk.f32.vlgmr.msra.gmra.mrb[14].mxu1 %vm446_vm2, %v17238_v18 }
  0xdc   : > { %17251 = vmatprep.subr.msk.mxu0 %vm450_vm1, %v2392_v39  ;;  %2550 = vmatprep.mubr.f32.mxu1 %v22811_v0 }
  0xdd   : > { %4709 = vrot.lane.b32.xlu1 %v19638_v1, %s19500_s16  ;;  %4707 = vrot.lane.b32.xlu0 %v19664_v6, %s19500_s16 }
  0xde   : > { %v2381_v43 = vpop.permute.xlu1 %2380  ;;  %v2375_v44 = vpop.permute.xlu0 %2374  ;;  %2479 = vmatprep.mubr.f32.mxu0 %v22811_v0 }
  0xdf   : > { %v2391_v45 = vsel %vm2390_vm8, %v2375_v44, %v2377_v38  ;;  %v2393_v56 = vsel %vm2390_vm8, %v2379_v37, %v2381_v43 }
  0xe0   : > { %17252 = vmatpush1.msk.msra.mxu0 %vm450_vm1, %v2391_v45 }
  0xe1   : > { %4711 = vrot.lane.b32.xlu1 %v19649_v3, %s19500_s16  ;;  %4705 = vrot.lane.b32.xlu0 %v19641_v2, %s19500_s16 }
  0xe2   : > { %v2385_v49 = vpop.permute.xlu1 %2384  ;;  %v2383_v52 = vpop.permute.xlu0 %2382  ;;  %17253 = vmatmul.mubr.msk.f32.vlgmr.msra.gmra.mrb[2].mxu0 %vm446_vm2, %v17250_v47 }
  0xe3   : > { %v2394_v53 = vsel %vm2390_vm8, %v2381_v43, %v2383_v52  ;;  %2621 = vmatprep.mubr.f32.mxu0 %v22811_v0  ;;  %v2395_v11 = vsel %vm2390_vm8, %v2383_v52, %v2385_v49 }
  0xe4   : > { %17254 = vmatprep.subr.msk.mxu1 %vm450_vm1, %v2394_v53 }
  0xe5   : > { %4715 = vrot.lane.b32.xlu1 %v19660_v5, %s19500_s16  ;;  %4713 = vrot.lane.b32.xlu0 %v19652_v4, %s19500_s16 }
  0xe6   : > { %17255 = vmatpush1.msk.msra.mxu1 %vm450_vm1, %v2393_v56  ;;  %v2389_v57 = vpop.permute.xlu1 %2388  ;;  %v2387_v59 = vpop.permute.xlu0 %2386 }
  0xe7   : > { %v2397_v62 = vsel %vm2390_vm8, %v2387_v59, %v2389_v57  ;;  %18247 = vmatprep.subr.mxu1 %v22811_v0  ;;  %17256 = vmatmul.mubr.msk.f32.vlgmr.msra.gmra.mrb[2].mxu1 %vm446_vm2, %v17250_v47  ;;  %v2396_v9 = vsel %vm2390_vm8, %v2385_v49, %v2387_v59  ;;  %v17274_v49 = vld [vmem:[%s22827_s1 + $0x40] sm:$0x3f]  ;;  %vm5054_vm8 = vcmask 490496  }
  0xe8   : > { %17257 = vmatprep.subr.msk.mxu0 %vm450_vm1, %v2396_v9  ;;  %18248 = vmatpush3.msk.msra.mxu1 %vm450_vm1, %v2397_v62 }
  0xe9   : > { %4719 = vrot.lane.b32.xlu1 %v19731_v8, %s19500_s16  ;;  %4717 = vrot.lane.b32.xlu0 %v19671_v7, %s19500_s16  ;;  %s19502_s16 = smov 32  }
  0xea   : > { %17258 = vmatpush1.msk.msra.mxu0 %vm450_vm1, %v2395_v11  ;;  %v2712_v12 = vpop.permute.xlu1 %2711  ;;  %v2710_v13 = vpop.permute.xlu0 %2709  ;;  %18249 = vmatprep.mubr.msk.f32.mxu1 %vm19496_vm4, %v22811_v0 }
  0xeb   : > { %v2725_v14 = vsel %vm2723_vm9, %v2710_v13, %v2712_v12  ;;  %17259 = vmatmul.mubr.msk.f32.vlgmr.msra.gmra.mrb[0].mxu0 %vm446_vm2, %v17250_v47  ;;  %18250 = vmatmul.mubr.msk.f32.vlgmr.msra.gmra.mrb[16].mxu1 %vm446_vm2, %v17250_v47 }
  0xec   : > { %17263 = vmatprep.subr.msk.mxu0 %vm450_vm1, %v2725_v14  ;;  %2883 = vmatprep.mubr.f32.mxu1 %v22811_v0 }
  0xed   : > { %5042 = vrot.lane.b32.xlu1 %v19638_v1, %s22799_s17  ;;  %5040 = vrot.lane.b32.xlu0 %v19664_v6, %s22799_s17 }
  0xee   : > { %v2714_v16 = vpop.permute.xlu1 %2713  ;;  %v2708_v17 = vpop.permute.xlu0 %2707  ;;  %2812 = vmatprep.mubr.f32.mxu0 %v22811_v0 }
  0xef   : > { %v2724_v18 = vsel %vm2723_vm9, %v2708_v17, %v2710_v13  ;;  %v2726_v28 = vsel %vm2723_vm9, %v2712_v12, %v2714_v16 }
  0xf0   : > { %17264 = vmatpush1.msk.msra.mxu0 %vm450_vm1, %v2724_v18 }
  0xf1   : > { %5044 = vrot.lane.b32.xlu1 %v19649_v3, %s22799_s17  ;;  %5038 = vrot.lane.b32.xlu0 %v19641_v2, %s22799_s17 }
  0xf2   : > { %v2718_v25 = vpop.permute.xlu1 %2717  ;;  %v2716_v26 = vpop.permute.xlu0 %2715  ;;  %17265 = vmatmul.mubr.msk.f32.vlgmr.msra.gmra.mrb[2].mxu0 %vm446_vm2, %v17262_v24 }
  0xf3   : > { %v2727_v27 = vsel %vm2723_vm9, %v2714_v16, %v2716_v26  ;;  %2954 = vmatprep.mubr.f32.mxu0 %v22811_v0  ;;  %v2728_v37 = vsel %vm2723_vm9, %v2716_v26, %v2718_v25 }
  0xf4   : > { %17266 = vmatprep.subr.msk.mxu1 %vm450_vm1, %v2727_v27 }
  0xf5   : > { %5048 = vrot.lane.b32.xlu1 %v19660_v5, %s22799_s17  ;;  %5046 = vrot.lane.b32.xlu0 %v19652_v4, %s22799_s17 }
  0xf6   : > { %17267 = vmatpush1.msk.msra.mxu1 %vm450_vm1, %v2726_v28  ;;  %v2722_v31 = vpop.permute.xlu1 %2721  ;;  %v2720_v32 = vpop.permute.xlu0 %2719 }
  0xf7   : > { %v2730_v34 = vsel %vm2723_vm9, %v2720_v32, %v2722_v31  ;;  %18252 = vmatprep.subr.mxu1 %v22811_v0  ;;  %17268 = vmatmul.mubr.msk.f32.vlgmr.msra.gmra.mrb[2].mxu1 %vm446_vm2, %v17262_v24  ;;  %v2729_v35 = vsel %vm2723_vm9, %v2718_v25, %v2720_v32  ;;  %v17286_v25 = vld [vmem:[%s22827_s1 + $0x48] sm:$0x3f]  ;;  %vm5387_vm9 = vcmask 261120  }
  0xf8   : > { %17269 = vmatprep.subr.msk.mxu0 %vm450_vm1, %v2729_v35  ;;  %18253 = vmatpush3.msk.msra.mxu1 %vm450_vm1, %v2730_v34 }
  0xf9   : > { %5052 = vrot.lane.b32.xlu1 %v19731_v8, %s22799_s17  ;;  %5050 = vrot.lane.b32.xlu0 %v19671_v7, %s22799_s17  ;;  %s19503_s17 = smov 31  }
  0xfa   : > { %17270 = vmatpush1.msk.msra.mxu0 %vm450_vm1, %v2728_v37  ;;  %v3045_v38 = vpop.permute.xlu1 %3044  ;;  %v3043_v39 = vpop.permute.xlu0 %3042  ;;  %18254 = vmatprep.mubr.msk.f32.mxu1 %vm19496_vm4, %v22811_v0 }
  0xfb   : > { %v3058_v43 = vsel %vm3056_vm10, %v3043_v39, %v3045_v38  ;;  %17271 = vmatmul.mubr.msk.f32.vlgmr.msra.gmra.mrb[0].mxu0 %vm446_vm2, %v17262_v24  ;;  %18255 = vmatmul.mubr.msk.f32.vlgmr.msra.gmra.mrb[18].mxu1 %vm446_vm2, %v17262_v24 }
  0xfc   : > { %17275 = vmatprep.subr.msk.mxu0 %vm450_vm1, %v3058_v43  ;;  %3216 = vmatprep.mubr.f32.mxu1 %v22811_v0 }
  0xfd   : > { %5375 = vrot.lane.b32.xlu1 %v19638_v1, %s19502_s16  ;;  %5373 = vrot.lane.b32.xlu0 %v19664_v6, %s19502_s16 }
  0xfe   : > { %v3047_v44 = vpop.permute.xlu1 %3046  ;;  %v3041_v45 = vpop.permute.xlu0 %3040  ;;  %3145 = vmatprep.mubr.f32.mxu0 %v22811_v0 }
  0xff   : > { %v3057_v47 = vsel %vm3056_vm10, %v3041_v45, %v3043_v39  ;;  %v3059_v57 = vsel %vm3056_vm10, %v3045_v38, %v3047_v44 }
 0x100   : > { %17276 = vmatpush1.msk.msra.mxu0 %vm450_vm1, %v3057_v47 }
 0x101   : > { %5377 = vrot.lane.b32.xlu1 %v19649_v3, %s19502_s16  ;;  %5371 = vrot.lane.b32.xlu0 %v19641_v2, %s19502_s16 }
 0x102   : > { %v3051_v52 = vpop.permute.xlu1 %3050  ;;  %v3049_v53 = vpop.permute.xlu0 %3048  ;;  %17277 = vmatmul.mubr.msk.f32.vlgmr.msra.gmra.mrb[2].mxu0 %vm446_vm2, %v17274_v49 }
 0x103   : > { %v3060_v56 = vsel %vm3056_vm10, %v3047_v44, %v3049_v53  ;;  %3287 = vmatprep.mubr.f32.mxu0 %v22811_v0  ;;  %v3061_v12 = vsel %vm3056_vm10, %v3049_v53, %v3051_v52 }
 0x104   : > { %17278 = vmatprep.subr.msk.mxu1 %vm450_vm1, %v3060_v56 }
 0x105   : > { %5381 = vrot.lane.b32.xlu1 %v19660_v5, %s19502_s16  ;;  %5379 = vrot.lane.b32.xlu0 %v19652_v4, %s19502_s16 }
 0x106   : > { %17279 = vmatpush1.msk.msra.mxu1 %vm450_vm1, %v3059_v57  ;;  %v3055_v59 = vpop.permute.xlu1 %3054  ;;  %v3053_v62 = vpop.permute.xlu0 %3052 }
 0x107   : > { %v3063_v9 = vsel %vm3056_vm10, %v3053_v62, %v3055_v59  ;;  %18257 = vmatprep.subr.mxu1 %v22811_v0  ;;  %17280 = vmatmul.mubr.msk.f32.vlgmr.msra.gmra.mrb[2].mxu1 %vm446_vm2, %v17274_v49  ;;  %v3062_v11 = vsel %vm3056_vm10, %v3051_v52, %v3053_v62  ;;  %v17298_v52 = vld [vmem:[%s22827_s1 + $0x50] sm:$0x3f]  ;;  %vm5720_vm10 = vcmask 252928  }
 0x108   : > { %17281 = vmatprep.subr.msk.mxu0 %vm450_vm1, %v3062_v11  ;;  %18258 = vmatpush3.msk.msra.mxu1 %vm450_vm1, %v3063_v9 }
 0x109   : > { %5385 = vrot.lane.b32.xlu1 %v19731_v8, %s19502_s16  ;;  %5383 = vrot.lane.b32.xlu0 %v19671_v7, %s19502_s16  ;;  %s19505_s16 = smov 29  }
 0x10a   : > { %17282 = vmatpush1.msk.msra.mxu0 %vm450_vm1, %v3061_v12  ;;  %v3378_v13 = vpop.permute.xlu1 %3377  ;;  %v3376_v14 = vpop.permute.xlu0 %3375  ;;  %18259 = vmatprep.mubr.msk.f32.mxu1 %vm19496_vm4, %v22811_v0 }
 0x10b   : > { %v3391_v16 = vsel %vm3389_vm11, %v3376_v14, %v3378_v13  ;;  %17283 = vmatmul.mubr.msk.f32.vlgmr.msra.gmra.mrb[0].mxu0 %vm446_vm2, %v17274_v49  ;;  %18260 = vmatmul.mubr.msk.f32.vlgmr.msra.gmra.mrb[20].mxu1 %vm446_vm2, %v17274_v49 }
 0x10c   : > { %17287 = vmatprep.subr.msk.mxu0 %vm450_vm1, %v3391_v16  ;;  %3549 = vmatprep.mubr.f32.mxu1 %v22811_v0 }
 0x10d   : > { %5708 = vrot.lane.b32.xlu1 %v19638_v1, %s19503_s17  ;;  %5706 = vrot.lane.b32.xlu0 %v19664_v6, %s19503_s17 }
 0x10e   : > { %v3380_v17 = vpop.permute.xlu1 %3379  ;;  %v3374_v18 = vpop.permute.xlu0 %3373  ;;  %3478 = vmatprep.mubr.f32.mxu0 %v22811_v0 }
 0x10f   : > { %v3390_v24 = vsel %vm3389_vm11, %v3374_v18, %v3376_v14  ;;  %v3392_v31 = vsel %vm3389_vm11, %v3378_v13, %v3380_v17 }
 0x110   : > { %17288 = vmatpush1.msk.msra.mxu0 %vm450_vm1, %v3390_v24 }
 0x111   : > { %5710 = vrot.lane.b32.xlu1 %v19649_v3, %s19503_s17  ;;  %5704 = vrot.lane.b32.xlu0 %v19641_v2, %s19503_s17 }
 0x112   : > { %v3384_v26 = vpop.permute.xlu1 %3383  ;;  %17289 = vmatmul.mubr.msk.f32.vlgmr.msra.gmra.mrb[2].mxu0 %vm446_vm2, %v17286_v25 }
 0x113   : > { %v3382_v27 = vpop.permute.xlu0 %3381  ;;  %3620 = vmatprep.mubr.f32.mxu0 %v22811_v0 }
 0x114   : > { %v3393_v28 = vsel %vm3389_vm11, %v3380_v17, %v3382_v27  ;;  %v3394_v38 = vsel %vm3389_vm11, %v3382_v27, %v3384_v26 }
 0x115   : > { %5714 = vrot.lane.b32.xlu1 %v19660_v5, %s19503_s17  ;;  %5712 = vrot.lane.b32.xlu0 %v19652_v4, %s19503_s17 }
 0x116   : > { %17290 = vmatprep.subr.msk.mxu1 %vm450_vm1, %v3393_v28 }
 0x117   : > { %17291 = vmatpush1.msk.msra.mxu1 %vm450_vm1, %v3392_v31  ;;  %v3388_v32 = vpop.permute.xlu1 %3387 }
 0x118   : > { %v3386_v34 = vpop.permute.xlu0 %3385  ;;  %18262 = vmatprep.subr.mxu1 %v22811_v0  ;;  %17292 = vmatmul.mubr.msk.f32.vlgmr.msra.gmra.mrb[2].mxu1 %vm446_vm2, %v17286_v25 }
 0x119   : > { %5718 = vrot.lane.b32.xlu1 %v19731_v8, %s19503_s17  ;;  %5716 = vrot.lane.b32.xlu0 %v19671_v7, %s19503_s17  ;;  %v3396_v35 = vsel %vm3389_vm11, %v3386_v34, %v3388_v32  ;;  %v3395_v37 = vsel %vm3389_vm11, %v3384_v26, %v3386_v34  ;;  %s19504_s17 = smov 30   ;;  %vm6053_vm11 = vcmask 244736  }
 0x11a   : > { %17293 = vmatprep.subr.msk.mxu0 %vm450_vm1, %v3395_v37  ;;  %18263 = vmatpush3.msk.msra.mxu1 %vm450_vm1, %v3396_v35  ;;  %v20292_v35 = vld [vmem:[%s19633_s19 + $0x8] sm:$0x77] }
 0x11b   : > { %17294 = vmatpush1.msk.msra.mxu0 %vm450_vm1, %v3394_v38  ;;  %18264 = vmatprep.mubr.msk.f32.mxu1 %vm19496_vm4, %v22811_v0 }
 0x11c   : > { %v3711_v39 = vpop.permute.xlu1 %3710  ;;  %17295 = vmatmul.mubr.msk.f32.vlgmr.msra.gmra.mrb[0].mxu0 %vm446_vm2, %v17286_v25  ;;  %18265 = vmatmul.mubr.msk.f32.vlgmr.msra.gmra.mrb[22].mxu1 %vm446_vm2, %v17286_v25  ;;  %v17310_v25 = vld [vmem:[%s22827_s1 + $0x58] sm:$0x3f] }
 0x11d   : > { %6041 = vrot.lane.b32.xlu1 %v19638_v1, %s19504_s17  ;;  %6039 = vrot.lane.b32.xlu0 %v19664_v6, %s19504_s17  ;;  %v3709_v43 = vpop.permute.xlu0 %3708 }
 0x11e   : > { %v3724_v44 = vsel %vm3722_vm12, %v3709_v43, %v3711_v39  ;;  %3882 = vmatprep.mubr.f32.mxu1 %v22811_v0  ;;  %3811 = vmatprep.mubr.f32.mxu0 %v22811_v0 }
 0x11f   : > { %17299 = vmatprep.subr.msk.mxu0 %vm450_vm1, %v3724_v44 }
 0x121   : > { %6043 = vrot.lane.b32.xlu1 %v19649_v3, %s19504_s17  ;;  %6037 = vrot.lane.b32.xlu0 %v19641_v2, %s19504_s17 }
 0x122   : > { %v3713_v45 = vpop.permute.xlu1 %3712 }
 0x123   : > { %v3707_v47 = vpop.permute.xlu0 %3706  ;;  %v3725_v59 = vsel %vm3722_vm12, %v3711_v39, %v3713_v45 }
 0x124   : > { %v3723_v49 = vsel %vm3722_vm12, %v3707_v47, %v3709_v43  ;;  %v19419_v43 = vld [vmem:[%s19633_s19] sm:$0x77] }
 0x125   : > { %6047 = vrot.lane.b32.xlu1 %v19660_v5, %s19504_s17  ;;  %6045 = vrot.lane.b32.xlu0 %v19652_v4, %s19504_s17 }
 0x126   : > { %17300 = vmatpush1.msk.msra.mxu0 %vm450_vm1, %v3723_v49  ;;  %v20318_v49 = vld [vmem:[%s19633_s19 + $0x10] sm:$0x77] }
 0x127   : > { %v3717_v53 = vpop.permute.xlu1 %3716  ;;  %v3715_v56 = vpop.permute.xlu0 %3714  ;;  %17301 = vmatmul.mubr.msk.f32.vlgmr.msra.gmra.mrb[2].mxu0 %vm446_vm2, %v17298_v52 }
 0x128   : > { %v3726_v57 = vsel %vm3722_vm12, %v3713_v45, %v3715_v56  ;;  %3953 = vmatprep.mubr.f32.mxu0 %v22811_v0  ;;  %v3727_v13 = vsel %vm3722_vm12, %v3715_v56, %v3717_v53 }
 0x129   : > { %6051 = vrot.lane.b32.xlu1 %v19731_v8, %s19504_s17  ;;  %6049 = vrot.lane.b32.xlu0 %v19671_v7, %s19504_s17  ;;  %s22837_s17 = smov 56  }
 0x12a   : > { %17302 = vmatprep.subr.msk.mxu1 %vm450_vm1, %v3726_v57 }
 0x12b   : > { %17303 = vmatpush1.msk.msra.mxu1 %vm450_vm1, %v3725_v59  ;;  %v3721_v62 = vpop.permute.xlu1 %3720  ;;  %v3719_v9 = vpop.permute.xlu0 %3718  ;;  %v20332_v59 = vld [vmem:[%s19633_s19 + $0x18] sm:$0x77]  ;;  %s22807_s19 = smov 58  }
 0x12c   : > { %v3729_v11 = vsel %vm3722_vm12, %v3719_v9, %v3721_v62  ;;  %18267 = vmatprep.subr.mxu1 %v22811_v0  ;;  %17304 = vmatmul.mubr.msk.f32.vlgmr.msra.gmra.mrb[2].mxu1 %vm446_vm2, %v17298_v52  ;;  %v3728_v12 = vsel %vm3722_vm12, %v3717_v53, %v3719_v9 }
 0x12d   : > { %6374 = vrot.lane.b32.xlu1 %v19638_v1, %s19505_s16  ;;  %6372 = vrot.lane.b32.xlu0 %v19664_v6, %s19505_s16 }
 0x12e   : > { %17305 = vmatprep.subr.msk.mxu0 %vm450_vm1, %v3728_v12  ;;  %18268 = vmatpush3.msk.msra.mxu1 %vm450_vm1, %v3729_v11 }
 0x12f   : > { %17306 = vmatpush1.msk.msra.mxu0 %vm450_vm1, %v3727_v13  ;;  %v4044_v14 = vpop.permute.xlu1 %4043  ;;  %v4042_v16 = vpop.permute.xlu0 %4041  ;;  %18269 = vmatprep.mubr.msk.f32.mxu1 %vm19496_vm4, %v22811_v0 }
 0x130   : > { %v4057_v17 = vsel %vm4055_vm13, %v4042_v16, %v4044_v14  ;;  %17307 = vmatmul.mubr.msk.f32.vlgmr.msra.gmra.mrb[0].mxu0 %vm446_vm2, %v17298_v52  ;;  %18270 = vmatmul.mubr.msk.f32.vlgmr.msra.gmra.mrb[24].mxu1 %vm446_vm2, %v17298_v52  ;;  %v17322_v52 = vld [vmem:[%s22827_s1 + $0x60] sm:$0x3f] }
 0x131   : > { %6376 = vrot.lane.b32.xlu1 %v19649_v3, %s19505_s16  ;;  %6370 = vrot.lane.b32.xlu0 %v19641_v2, %s19505_s16 }
 0x132   : > { %17311 = vmatprep.subr.msk.mxu0 %vm450_vm1, %v4057_v17  ;;  %4215 = vmatprep.mubr.f32.mxu1 %v22811_v0 }
 0x133   : > { %v4046_v1 = vpop.permute.xlu1 %4045  ;;  %v4040_v18 = vpop.permute.xlu0 %4039  ;;  %4144 = vmatprep.mubr.f32.mxu0 %v22811_v0 }
 0x134   : > { %v4056_v24 = vsel %vm4055_vm13, %v4040_v18, %v4042_v16  ;;  %v4058_v28 = vsel %vm4055_vm13, %v4044_v14, %v4046_v1 }
 0x135   : > { %6380 = vrot.lane.b32.xlu1 %v19660_v5, %s19505_s16  ;;  %6378 = vrot.lane.b32.xlu0 %v19652_v4, %s19505_s16 }
 0x136   : > { %17312 = vmatpush1.msk.msra.mxu0 %vm450_vm1, %v4056_v24 }
 0x137   : > { %v4050_v2 = vpop.permute.xlu1 %4049  ;;  %v4048_v26 = vpop.permute.xlu0 %4047  ;;  %17313 = vmatmul.mubr.msk.f32.vlgmr.msra.gmra.mrb[2].mxu0 %vm446_vm2, %v17310_v25 }
 0x138   : > { %v4059_v27 = vsel %vm4055_vm13, %v4046_v1, %v4048_v26  ;;  %4286 = vmatprep.mubr.f32.mxu0 %v22811_v0 }
 0x139   : > { %6384 = vrot.lane.b32.xlu1 %v19731_v8, %s19505_s16  ;;  %6382 = vrot.lane.b32.xlu0 %v19671_v7, %s19505_s16  ;;  %s19506_s16 = smov 28   ;;  %v4060_v7 = vsel %vm4055_vm13, %v4048_v26, %v4050_v2 }
 0x13a   : > { %17314 = vmatprep.subr.msk.mxu1 %vm450_vm1, %v4059_v27 }
 0x13b   : > { %17315 = vmatpush1.msk.msra.mxu1 %vm450_vm1, %v4058_v28  ;;  %v4054_v4 = vpop.permute.xlu1 %4053  ;;  %v4052_v31 = vpop.permute.xlu0 %4051 }
 0x13c   : > { %v4062_v32 = vsel %vm4055_vm13, %v4052_v31, %v4054_v4  ;;  %18272 = vmatprep.subr.mxu1 %v22811_v0  ;;  %17316 = vmatmul.mubr.msk.f32.vlgmr.msra.gmra.mrb[2].mxu1 %vm446_vm2, %v17310_v25  ;;  %v4061_v34 = vsel %vm4055_vm13, %v4050_v2, %v4052_v31  ;;  %v17334_v2 = vld [vmem:[%s22827_s1 + $0x68] sm:$0x3f]  ;;  %vm6386_vm13 = vcmask 236544  }
 0x13d   : > { %6707 = vrot.lane.b32.xlu1 %v20292_v35, %s19506_s16  ;;  %6705 = vrot.lane.b32.xlu0 %v19664_v6, %s19506_s16 }
 0x13e   : > { %17317 = vmatprep.subr.msk.mxu0 %vm450_vm1, %v4061_v34  ;;  %18273 = vmatpush3.msk.msra.mxu1 %vm450_vm1, %v4062_v32 }
 0x13f   : > { %17318 = vmatpush1.msk.msra.mxu0 %vm450_vm1, %v4060_v7  ;;  %v4377_v37 = vpop.permute.xlu1 %4376  ;;  %v4375_v38 = vpop.permute.xlu0 %4374  ;;  %18274 = vmatprep.mubr.msk.f32.mxu1 %vm19496_vm4, %v22811_v0 }
 0x140   : > { %v4390_v39 = vsel %vm4388_vm14, %v4375_v38, %v4377_v37  ;;  %18275 = vmatmul.mubr.msk.f32.vlgmr.msra.gmra.mrb[26].mxu1 %vm446_vm2, %v17310_v25  ;;  %17319 = vmatmul.mubr.msk.f32.vlgmr.msra.gmra.mrb[0].mxu0 %vm446_vm2, %v17310_v25 }
 0x141   : > { %6709 = vrot.lane.b32.xlu1 %v19649_v3, %s19506_s16  ;;  %6703 = vrot.lane.b32.xlu0 %v19419_v43, %s19506_s16 }
 0x142   : > { %17323 = vmatprep.subr.msk.mxu0 %vm450_vm1, %v4390_v39  ;;  %4548 = vmatprep.mubr.f32.mxu1 %v22811_v0 }
 0x143   : > { %v4379_v44 = vpop.permute.xlu1 %4378  ;;  %v4373_v45 = vpop.permute.xlu0 %4372  ;;  %4477 = vmatprep.mubr.f32.mxu0 %v22811_v0 }
 0x144   : > { %v4389_v47 = vsel %vm4388_vm14, %v4373_v45, %v4375_v38  ;;  %v4391_v62 = vsel %vm4388_vm14, %v4377_v37, %v4379_v44 }
 0x145   : > { %6713 = vrot.lane.b32.xlu1 %v19660_v5, %s19506_s16  ;;  %6711 = vrot.lane.b32.xlu0 %v20318_v49, %s19506_s16 }
 0x146   : > { %17324 = vmatpush1.msk.msra.mxu0 %vm450_vm1, %v4389_v47 }
 0x147   : > { %v4383_v53 = vpop.permute.xlu1 %4382  ;;  %v4381_v56 = vpop.permute.xlu0 %4380  ;;  %17325 = vmatmul.mubr.msk.f32.vlgmr.msra.gmra.mrb[2].mxu0 %vm446_vm2, %v17322_v52 }
 0x148   : > { %v4392_v57 = vsel %vm4388_vm14, %v4379_v44, %v4381_v56  ;;  %4619 = vmatprep.mubr.f32.mxu0 %v22811_v0  ;;  %v4393_v14 = vsel %vm4388_vm14, %v4381_v56, %v4383_v53 }
 0x149   : > { %6717 = vrot.lane.b32.xlu1 %v19731_v8, %s19506_s16  ;;  %6715 = vrot.lane.b32.xlu0 %v20332_v59, %s19506_s16  ;;  %s22829_s16 = smov 64  }
 0x14a   : > { %17326 = vmatprep.subr.msk.mxu1 %vm450_vm1, %v4392_v57 }
 0x14b   : > { %17327 = vmatpush1.msk.msra.mxu1 %vm450_vm1, %v4391_v62  ;;  %v4387_v9 = vpop.permute.xlu1 %4386  ;;  %v4385_v11 = vpop.permute.xlu0 %4384 }
 0x14c   : > { %17328 = vmatmul.mubr.msk.f32.vlgmr.msra.gmra.mrb[2].mxu1 %vm446_vm2, %v17322_v52  ;;  %v4395_v12 = vsel %vm4388_vm14, %v4385_v11, %v4387_v9  ;;  %18277 = vmatprep.subr.mxu1 %v22811_v0  ;;  %v4394_v13 = vsel %vm4388_vm14, %v4383_v53, %v4385_v11 }
 0x14d   : > { %7635 = vrot.lane.b32.xlu1 %v19731_v8, %s22801_s26  ;;  %7333 = vrot.lane.b32.xlu0 %v19731_v8, %s19487_s20 }
 0x14e   : > { %17329 = vmatprep.subr.msk.mxu0 %vm450_vm1, %v4394_v13  ;;  %18278 = vmatpush3.msk.msra.mxu1 %vm450_vm1, %v4395_v12 }
 0x14f   : > { %17330 = vmatpush1.msk.msra.mxu0 %vm450_vm1, %v4393_v14  ;;  %18279 = vmatprep.mubr.msk.f32.mxu1 %vm19496_vm4, %v22811_v0  ;;  %v4710_v16 = vpop.permute.xlu1 %4709  ;;  %v4708_v17 = vpop.permute.xlu0 %4707 }
 0x150   : > { %18280 = vmatmul.mubr.msk.f32.vlgmr.msra.gmra.mrb[28].mxu1 %vm446_vm2, %v17322_v52  ;;  %v4723_v1 = vsel %vm4721_vm15, %v4708_v17, %v4710_v16  ;;  %17331 = vmatmul.mubr.msk.f32.vlgmr.msra.gmra.mrb[0].mxu0 %vm446_vm2, %v17322_v52  ;;  %v17346_v52 = vld [vmem:[%s22827_s1 + $0x70] sm:$0x3f] }
 0x151   : > { %8239 = vrot.lane.b32.xlu1 %v19731_v8, %s22809_s29  ;;  %7937 = vrot.lane.b32.xlu0 %v19731_v8, %s19489_s28  ;;  %s22830_s28 = smov 62  }
 0x152   : > { %17335 = vmatprep.subr.msk.mxu0 %vm450_vm1, %v4723_v1  ;;  %4881 = vmatprep.mubr.f32.mxu1 %v22811_v0 }
 0x153   : > { %v4712_v18 = vpop.permute.xlu1 %4711  ;;  %v4706_v24 = vpop.permute.xlu0 %4705  ;;  %4810 = vmatprep.mubr.f32.mxu0 %v22811_v0 }
 0x154   : > { %v4722_v25 = vsel %vm4721_vm15, %v4706_v24, %v4708_v17  ;;  %v4724_v4 = vsel %vm4721_vm15, %v4710_v16, %v4712_v18 }
 0x155   : > { %17336 = vmatpush1.msk.msra.mxu0 %vm450_vm1, %v4722_v25 }
 0x156   : > { %17337 = vmatmul.mubr.msk.f32.vlgmr.msra.gmra.mrb[2].mxu0 %vm446_vm2, %v17334_v2 }
 0x157   : > { %v4716_v26 = vpop.permute.xlu1 %4715  ;;  %v4714_v27 = vpop.permute.xlu0 %4713  ;;  %4952 = vmatprep.mubr.f32.mxu0 %v22811_v0 }
 0x158   : > { %v4725_v28 = vsel %vm4721_vm15, %v4712_v18, %v4714_v27  ;;  %v4726_v37 = vsel %vm4721_vm15, %v4714_v27, %v4716_v26  ;;  %v17358_v27 = vld [vmem:[%s22827_s1 + $0x78] sm:$0x3f] }
 0x159   : > { %17338 = vmatprep.subr.msk.mxu1 %vm450_vm1, %v4725_v28 }
 0x15a   : > { %17339 = vmatpush1.msk.msra.mxu1 %vm450_vm1, %v4724_v4 }
 0x15b   : > { %v4720_v31 = vpop.permute.xlu1 %4719  ;;  %17340 = vmatmul.mubr.msk.f32.vlgmr.msra.gmra.mrb[2].mxu1 %vm446_vm2, %v17334_v2  ;;  %v4718_v32 = vpop.permute.xlu0 %4717  ;;  %18282 = vmatprep.subr.mxu1 %v22811_v0 }
 0x15c   : > { %v4728_v34 = vsel %vm4721_vm15, %v4718_v32, %v4720_v31  ;;  %v4727_v7 = vsel %vm4721_vm15, %v4716_v26, %v4718_v32  ;;  %18284 = vmatprep.mubr.msk.f32.mxu1 %vm19496_vm4, %v22811_v0  ;;  %vm6719_vm15 = vcmask 228352  }
 0x15d   : > { %17341 = vmatprep.subr.msk.mxu0 %vm450_vm1, %v4727_v7  ;;  %18283 = vmatpush3.msk.msra.mxu1 %vm450_vm1, %v4728_v34 }
 0x15e   : > { %17342 = vmatpush1.msk.msra.mxu0 %vm450_vm1, %v4726_v37 }
 0x15f   : > { %v5043_v38 = vpop.permute.xlu1 %5042  ;;  %18285 = vmatmul.mubr.msk.f32.vlgmr.msra.gmra.mrb[30].mxu1 %vm446_vm2, %v17334_v2  ;;  %v5041_v39 = vpop.permute.xlu0 %5040  ;;  %17343 = vmatmul.mubr.msk.f32.vlgmr.msra.gmra.mrb[0].mxu0 %vm446_vm2, %v17334_v2 }
 0x160   : > { %v5056_v43 = vsel %vm5054_vm8, %v5041_v39, %v5043_v38  ;;  %5214 = vmatprep.mubr.f32.mxu1 %v22811_v0  ;;  %5143 = vmatprep.mubr.f32.mxu0 %v22811_v0 }
 0x161   : > { %17347 = vmatprep.subr.msk.mxu0 %vm450_vm1, %v5056_v43 }
 0x163   : > { %v5045_v44 = vpop.permute.xlu1 %5044  ;;  %v5039_v45 = vpop.permute.xlu0 %5038 }
 0x164   : > { %v5055_v47 = vsel %vm5054_vm8, %v5039_v45, %v5041_v39  ;;  %v5057_v62 = vsel %vm5054_vm8, %v5043_v38, %v5045_v44 }
 0x165   : > { %17348 = vmatpush1.msk.msra.mxu0 %vm450_vm1, %v5055_v47 }
 0x166   : > { %17349 = vmatmul.mubr.msk.f32.vlgmr.msra.gmra.mrb[2].mxu0 %vm446_vm2, %v17346_v52 }
 0x167   : > { %v5049_v53 = vpop.permute.xlu1 %5048  ;;  %v5047_v56 = vpop.permute.xlu0 %5046  ;;  %5285 = vmatprep.mubr.f32.mxu0 %v22811_v0 }
 0x168   : > { %v5058_v57 = vsel %vm5054_vm8, %v5045_v44, %v5047_v56  ;;  %v5059_v14 = vsel %vm5054_vm8, %v5047_v56, %v5049_v53 }
 0x169   : > { %17350 = vmatprep.subr.msk.mxu1 %vm450_vm1, %v5058_v57 }
 0x16a   : > { %17351 = vmatpush1.msk.msra.mxu1 %vm450_vm1, %v5057_v62  ;;  %v17370_v62 = vld [vmem:[%s22827_s1 + $0x80] sm:$0x3f] }
 0x16b   : > { %v5053_v9 = vpop.permute.xlu1 %5052  ;;  %17352 = vmatmul.mubr.msk.f32.vlgmr.msra.gmra.mrb[2].mxu1 %vm446_vm2, %v17346_v52  ;;  %v5051_v11 = vpop.permute.xlu0 %5050  ;;  %18287 = vmatprep.subr.mxu1 %v22811_v0 }
 0x16c   : > { %v5061_v12 = vsel %vm5054_vm8, %v5051_v11, %v5053_v9  ;;  %v5060_v13 = vsel %vm5054_vm8, %v5049_v53, %v5051_v11  ;;  %18289 = vmatprep.mubr.msk.f32.mxu1 %vm19496_vm4, %v22811_v0 }
 0x16d   : > { %17353 = vmatprep.subr.msk.mxu0 %vm450_vm1, %v5060_v13  ;;  %18288 = vmatpush3.msk.msra.mxu1 %vm450_vm1, %v5061_v12 }
 0x16e   : > { %17354 = vmatpush1.msk.msra.mxu0 %vm450_vm1, %v5059_v14 }
 0x16f   : > { %v5376_v16 = vpop.permute.xlu1 %5375  ;;  %18290 = vmatmul.mubr.msk.f32.vlgmr.msra.gmra.mrb[32].mxu1 %vm446_vm2, %v17346_v52  ;;  %v5374_v17 = vpop.permute.xlu0 %5373  ;;  %17355 = vmatmul.mubr.msk.f32.vlgmr.msra.gmra.mrb[0].mxu0 %vm446_vm2, %v17346_v52 }
 0x170   : > { %v5389_v1 = vsel %vm5387_vm9, %v5374_v17, %v5376_v16  ;;  %5547 = vmatprep.mubr.f32.mxu1 %v22811_v0  ;;  %5476 = vmatprep.mubr.f32.mxu0 %v22811_v0 }
 0x171   : > { %17359 = vmatprep.subr.msk.mxu0 %vm450_vm1, %v5389_v1 }
 0x172   : > { %v20417_v18 = vpop.f32.mrb[0].mxu1 }
 0x173   : > { %v5378_v24 = vpop.permute.xlu1 %5377  ;;  %v5372_v25 = vpop.permute.xlu0 %5371 }
 0x174   : > { %v5388_v2 = vsel %vm5387_vm9, %v5372_v25, %v5374_v17  ;;  %v20420_v26 = vpop.f32.mrb[1].mxu1  ;;  %v5390_v32 = vsel %vm5387_vm9, %v5376_v16, %v5378_v24 }
 0x175   : > { %17360 = vmatpush1.msk.msra.mxu0 %vm450_vm1, %v5388_v2 }
 0x176   : > { %17361 = vmatmul.mubr.msk.f32.vlgmr.msra.gmra.mrb[2].mxu0 %vm446_vm2, %v17358_v27 }
 0x177   : > { %v5382_v28 = vpop.permute.xlu1 %5381  ;;  %v5380_v4 = vpop.permute.xlu0 %5379  ;;  %5618 = vmatprep.mubr.f32.mxu0 %v22811_v0 }
 0x178   : > { %v5391_v31 = vsel %vm5387_vm9, %v5378_v24, %v5380_v4  ;;  %v5392_v43 = vsel %vm5387_vm9, %v5380_v4, %v5382_v28 }
 0x179   : > { %17362 = vmatprep.subr.msk.mxu1 %vm450_vm1, %v5391_v31 }
 0x17a   : > { %17363 = vmatpush1.msk.msra.mxu1 %vm450_vm1, %v5390_v32 }
 0x17b   : > { %v5386_v34 = vpop.permute.xlu1 %5385  ;;  %17364 = vmatmul.mubr.msk.f32.vlgmr.msra.gmra.mrb[2].mxu1 %vm446_vm2, %v17358_v27  ;;  %v5384_v7 = vpop.permute.xlu0 %5383  ;;  %18292 = vmatprep.subr.mxu1 %v22811_v0 }
 0x17c   : > { %v5394_v37 = vsel %vm5387_vm9, %v5384_v7, %v5386_v34  ;;  %v5393_v38 = vsel %vm5387_vm9, %v5382_v28, %v5384_v7  ;;  %18294 = vmatprep.mubr.msk.f32.mxu1 %vm19496_vm4, %v22811_v0  ;;  %v744_v39 = vpop.f32.mrb[4].mxu1  ;;  %vm11092_vm9 = vcmask 457728  }
 0x17d   : > { %17365 = vmatprep.subr.msk.mxu0 %vm450_vm1, %v5393_v38  ;;  %18293 = vmatpush3.msk.msra.mxu1 %vm450_vm1, %v5394_v37  ;;  %v18221_v44 = vpop.f32.mrb[5].mxu1 }
 0x17e   : > { %17366 = vmatpush1.msk.msra.mxu0 %vm450_vm1, %v5392_v43  ;;  %v17382_v43 = vld [vmem:[%s22827_s1 + $0x88] sm:$0x3f] }
 0x17f   : > { %v5709_v45 = vpop.permute.xlu1 %5708  ;;  %18295 = vmatmul.mubr.msk.f32.vlgmr.msra.gmra.mrb[34].mxu1 %vm446_vm2, %v17358_v27  ;;  %v5707_v47 = vpop.permute.xlu0 %5706  ;;  %17367 = vmatmul.mubr.msk.f32.vlgmr.msra.gmra.mrb[0].mxu0 %vm446_vm2, %v17358_v27 }
 0x180   : > { %v5722_v52 = vsel %vm5720_vm10, %v5707_v47, %v5709_v45  ;;  %5880 = vmatprep.mubr.f32.mxu1 %v22811_v0  ;;  %5809 = vmatprep.mubr.f32.mxu0 %v22811_v0 }
 0x181   : > { %17371 = vmatprep.subr.msk.mxu0 %vm450_vm1, %v5722_v52 }
 0x183   : > { %v5711_v53 = vpop.permute.xlu1 %5710  ;;  %v5705_v56 = vpop.permute.xlu0 %5704 }
 0x184   : > { %v5721_v57 = vsel %vm5720_vm10, %v5705_v56, %v5707_v47  ;;  %v5723_v17 = vsel %vm5720_vm10, %v5709_v45, %v5711_v53 }
 0x185   : > { %17372 = vmatpush1.msk.msra.mxu0 %vm450_vm1, %v5721_v57 }
 0x186   : > { %17373 = vmatmul.mubr.msk.f32.vlgmr.msra.gmra.mrb[2].mxu0 %vm446_vm2, %v17370_v62  ;;  %v1044_v9 = vpop.f32.mrb[6].mxu1 }
 0x187   : > { %v5715_v11 = vpop.permute.xlu1 %5714  ;;  %v5713_v12 = vpop.permute.xlu0 %5712  ;;  %5951 = vmatprep.mubr.f32.mxu0 %v22811_v0  ;;  %v1045_v13 = vadd.f32 %v1044_v9, %v744_v39 }
 0x188   : > { %v5724_v14 = vsel %vm5720_vm10, %v5711_v53, %v5713_v12  ;;  %v18226_v16 = vpop.f32.mrb[7].mxu1  ;;  %v5725_v27 = vsel %vm5720_vm10, %v5713_v12, %v5715_v11 }
 0x189   : > { %17374 = vmatprep.subr.msk.mxu1 %vm450_vm1, %v5724_v14 }
 0x18a   : > { %17375 = vmatpush1.msk.msra.mxu1 %vm450_vm1, %v5723_v17 }
 0x18b   : > { %v5719_v1 = vpop.permute.xlu1 %5718  ;;  %17376 = vmatmul.mubr.msk.f32.vlgmr.msra.gmra.mrb[2].mxu1 %vm446_vm2, %v17370_v62  ;;  %v5717_v24 = vpop.permute.xlu0 %5716  ;;  %18297 = vmatprep.subr.mxu1 %v22811_v0 }
 0x18c   : > { %v5727_v25 = vsel %vm5720_vm10, %v5717_v24, %v5719_v1  ;;  %v5726_v2 = vsel %vm5720_vm10, %v5715_v11, %v5717_v24  ;;  %18299 = vmatprep.mubr.msk.f32.mxu1 %vm19496_vm4, %v22811_v0  ;;  %vm17025_vm10 = vcmask 687104  }
 0x18d   : > { %17377 = vmatprep.subr.msk.mxu0 %vm450_vm1, %v5726_v2  ;;  %18298 = vmatpush3.msk.msra.mxu1 %vm450_vm1, %v5727_v25 }
 0x18e   : > { %17378 = vmatpush1.msk.msra.mxu0 %vm450_vm1, %v5725_v27  ;;  %v1367_v28 = vpop.f32.mrb[8].mxu1  ;;  %v17394_v27 = vld [vmem:[%s22827_s1 + $0x90] sm:$0x3f] }
 0x18f   : > { %v6042_v4 = vpop.permute.xlu1 %6041  ;;  %18300 = vmatmul.mubr.msk.f32.vlgmr.msra.gmra.mrb[36].mxu1 %vm446_vm2, %v17370_v62  ;;  %v6040_v31 = vpop.permute.xlu0 %6039  ;;  %17379 = vmatmul.mubr.msk.f32.vlgmr.msra.gmra.mrb[0].mxu0 %vm446_vm2, %v17370_v62  ;;  %v1377_v32 = vadd.f32 %v1367_v28, %v1045_v13 }
 0x190   : > { %v6055_v34 = vsel %vm6053_vm11, %v6040_v31, %v6042_v4  ;;  %6213 = vmatprep.mubr.f32.mxu1 %v22811_v0  ;;  %6142 = vmatprep.mubr.f32.mxu0 %v22811_v0  ;;  %v18231_v7 = vpop.f32.mrb[9].mxu1 }
 0x191   : > { %17383 = vmatprep.subr.msk.mxu0 %vm450_vm1, %v6055_v34 }
 0x193   : > { %v6044_v37 = vpop.permute.xlu1 %6043  ;;  %v6038_v38 = vpop.permute.xlu0 %6037 }
 0x194   : > { %v6054_v39 = vsel %vm6053_vm11, %v6038_v38, %v6040_v31  ;;  %v6056_v52 = vsel %vm6053_vm11, %v6042_v4, %v6044_v37 }
 0x195   : > { %17384 = vmatpush1.msk.msra.mxu0 %vm450_vm1, %v6054_v39 }
 0x196   : > { %17385 = vmatmul.mubr.msk.f32.vlgmr.msra.gmra.mrb[2].mxu0 %vm446_vm2, %v17382_v43 }
 0x197   : > { %v6048_v44 = vpop.permute.xlu1 %6047  ;;  %v6046_v45 = vpop.permute.xlu0 %6045  ;;  %6284 = vmatprep.mubr.f32.mxu0 %v22811_v0 }
 0x198   : > { %v6057_v47 = vsel %vm6053_vm11, %v6044_v37, %v6046_v45  ;;  %v6058_v13 = vsel %vm6053_vm11, %v6046_v45, %v6048_v44 }
 0x199   : > { %17386 = vmatprep.subr.msk.mxu1 %vm450_vm1, %v6057_v47  ;;  %v1697_v53 = vpop.f32.mrb[10].mxu1 }
 0x19a   : > { %17387 = vmatpush1.msk.msra.mxu1 %vm450_vm1, %v6056_v52  ;;  %v1707_v56 = vadd.f32 %v1697_v53, %v1377_v32  ;;  %v18236_v57 = vpop.f32.mrb[11].mxu1 }
 0x19b   : > { %v6052_v62 = vpop.permute.xlu1 %6051  ;;  %17388 = vmatmul.mubr.msk.f32.vlgmr.msra.gmra.mrb[2].mxu1 %vm446_vm2, %v17382_v43  ;;  %v6050_v9 = vpop.permute.xlu0 %6049  ;;  %18302 = vmatprep.subr.mxu1 %v22811_v0 }
 0x19c   : > { %v6060_v11 = vsel %vm6053_vm11, %v6050_v9, %v6052_v62  ;;  %v6059_v12 = vsel %vm6053_vm11, %v6048_v44, %v6050_v9  ;;  %18304 = vmatprep.mubr.msk.f32.mxu1 %vm19496_vm4, %v22811_v0  ;;  %vm17103_vm11 = vcmask 73728  }
 0x19d   : > { %17389 = vmatprep.subr.msk.mxu0 %vm450_vm1, %v6059_v12  ;;  %18303 = vmatpush3.msk.msra.mxu1 %vm450_vm1, %v6060_v11  ;;  %v17406_v11 = vld [vmem:[%s22827_s1 + $0x98] sm:$0x3f]  ;;  %v8539_v12 = vld [vmem:[%s22784_s2] sm:$0x3f] }
 0x19e   : > { %17390 = vmatpush1.msk.msra.mxu0 %vm450_vm1, %v6058_v13 }
 0x19f   : > { %v6375_v14 = vpop.permute.xlu1 %6374  ;;  %18305 = vmatmul.mubr.msk.f32.vlgmr.msra.gmra.mrb[38].mxu1 %vm446_vm2, %v17382_v43  ;;  %v6373_v16 = vpop.permute.xlu0 %6372  ;;  %17391 = vmatmul.mubr.msk.f32.vlgmr.msra.gmra.mrb[0].mxu0 %vm446_vm2, %v17382_v43 }
 0x1a0   : > { %v6388_v17 = vsel %vm6386_vm13, %v6373_v16, %v6375_v14  ;;  %6546 = vmatprep.mubr.f32.mxu1 %v22811_v0  ;;  %6475 = vmatprep.mubr.f32.mxu0 %v22811_v0 }
 0x1a1   : > { %17395 = vmatprep.subr.msk.mxu0 %vm450_vm1, %v6388_v17 }
 0x1a3   : > { %v6377_v1 = vpop.permute.xlu1 %6376  ;;  %v6371_v24 = vpop.permute.xlu0 %6370 }
 0x1a4   : > { %v6387_v25 = vsel %vm6386_vm13, %v6371_v24, %v6373_v16  ;;  %v2027_v2 = vpop.f32.mrb[12].mxu1  ;;  %v6389_v7 = vsel %vm6386_vm13, %v6375_v14, %v6377_v1  ;;  %v19507_v14 = vmov 0  }
 0x1a5   : > { %17396 = vmatpush1.msk.msra.mxu0 %vm450_vm1, %v6387_v25  ;;  %v2037_v28 = vadd.f32 %v2027_v2, %v1707_v56  ;;  %v18241_v4 = vpop.f32.mrb[13].mxu1  ;;  %19377 = vset.pattern.permute.xlu0 %v19507_v14 }
 0x1a6   : > { %17397 = vmatmul.mubr.msk.f32.vlgmr.msra.gmra.mrb[2].mxu0 %vm446_vm2, %v17394_v27  ;;  %19378 = vset.pattern.permute.xlu1 %v19507_v14 }
 0x1a7   : > { %v6381_v31 = vpop.permute.xlu1 %6380  ;;  %v6379_v32 = vpop.permute.xlu0 %6378  ;;  %6617 = vmatprep.mubr.f32.mxu0 %v22811_v0  ;;  %8542 = vperm.xlu0 %19377, %v8539_v12  }
 0x1a8   : > { %v6390_v34 = vsel %vm6386_vm13, %v6377_v1, %v6379_v32  ;;  %v6391_v44 = vsel %vm6386_vm13, %v6379_v32, %v6381_v31 }
 0x1a9   : > { %17398 = vmatprep.subr.msk.mxu1 %vm450_vm1, %v6390_v34  ;;  %v17418_v34 = vld [vmem:[%s22827_s1 + $0xa0] sm:$0x3f] }
 0x1aa   : > { %17399 = vmatpush1.msk.msra.mxu1 %vm450_vm1, %v6389_v7 }
 0x1ab   : > { %v6385_v37 = vpop.permute.xlu1 %6384  ;;  %17400 = vmatmul.mubr.msk.f32.vlgmr.msra.gmra.mrb[2].mxu1 %vm446_vm2, %v17394_v27  ;;  %v6383_v38 = vpop.permute.xlu0 %6382  ;;  %18307 = vmatprep.subr.mxu1 %v22811_v0 }
 0x1ac   : > { %v6393_v39 = vsel %vm6386_vm13, %v6383_v38, %v6385_v37  ;;  %v6392_v43 = vsel %vm6386_vm13, %v6381_v31, %v6383_v38  ;;  %18309 = vmatprep.mubr.msk.f32.mxu1 %vm19496_vm4, %v22811_v0 }
 0x1ad   : > { %17401 = vmatprep.subr.msk.mxu0 %vm450_vm1, %v6392_v43  ;;  %18308 = vmatpush3.msk.msra.mxu1 %vm450_vm1, %v6393_v39 }
 0x1ae   : > { %17402 = vmatpush1.msk.msra.mxu0 %vm450_vm1, %v6391_v44  ;;  %v2361_v45 = vpop.f32.mrb[14].mxu1 }
 0x1af   : > { %v6708_v47 = vpop.permute.xlu1 %6707  ;;  %18310 = vmatmul.mubr.msk.f32.vlgmr.msra.gmra.mrb[40].mxu1 %vm446_vm2, %v17394_v27  ;;  %v6706_v52 = vpop.permute.xlu0 %6705  ;;  %17403 = vmatmul.mubr.msk.f32.vlgmr.msra.gmra.mrb[0].mxu0 %vm446_vm2, %v17394_v27  ;;  %v2371_v53 = vadd.f32 %v2361_v45, %v2037_v28 }
 0x1b0   : > { %v6721_v56 = vsel %vm6719_vm15, %v6706_v52, %v6708_v47  ;;  %6808 = vmatprep.mubr.f32.mxu0 %v22811_v0  ;;  %6879 = vmatprep.mubr.f32.mxu1 %v22811_v0  ;;  %v18246_v57 = vpop.f32.mrb[15].mxu1 }
 0x1b1   : > { %17407 = vmatprep.subr.msk.mxu0 %vm450_vm1, %v6721_v56 }
 0x1b3   : > { %v6710_v62 = vpop.permute.xlu1 %6709  ;;  %v6704_v9 = vpop.permute.xlu0 %6703 }
 0x1b4   : > { %v6720_v13 = vsel %vm6719_vm15, %v6704_v9, %v6706_v52  ;;  %v6722_v24 = vsel %vm6719_vm15, %v6708_v47, %v6710_v62 }
 0x1b5   : > { %17408 = vmatpush1.msk.msra.mxu0 %vm450_vm1, %v6720_v13 }
 0x1b6   : > { %17409 = vmatmul.mubr.msk.f32.vlgmr.msra.gmra.mrb[2].mxu0 %vm446_vm2, %v17406_v11 }
 0x1b7   : > { %v6714_v16 = vpop.permute.xlu1 %6713  ;;  %v6712_v17 = vpop.permute.xlu0 %6711  ;;  %6950 = vmatprep.mubr.f32.mxu0 %v22811_v0 }
 0x1b8   : > { %v6723_v1 = vsel %vm6719_vm15, %v6710_v62, %v6712_v17  ;;  %v6724_v4 = vsel %vm6719_vm15, %v6712_v17, %v6714_v16 }
 0x1b9   : > { %17410 = vmatprep.subr.msk.mxu1 %vm450_vm1, %v6723_v1 }
 0x1ba   : > { %17411 = vmatpush1.msk.msra.mxu1 %vm450_vm1, %v6722_v24 }
 0x1bb   : > { %v6718_v25 = vpop.permute.xlu1 %6717  ;;  %17412 = vmatmul.mubr.msk.f32.vlgmr.msra.gmra.mrb[2].mxu1 %vm446_vm2, %v17406_v11  ;;  %v6716_v2 = vpop.permute.xlu0 %6715  ;;  %18312 = vmatprep.subr.mxu1 %v22811_v0 }
 0x1bc   : > { %v6725_v27 = vsel %vm6719_vm15, %v6714_v16, %v6716_v2  ;;  %v6726_v28 = vsel %vm6719_vm15, %v6716_v2, %v6718_v25  ;;  %18314 = vmatprep.mubr.msk.f32.mxu1 %vm19496_vm4, %v22811_v0 }
 0x1bd   : > { %17413 = vmatprep.subr.msk.mxu0 %vm450_vm1, %v6725_v27  ;;  %18313 = vmatpush3.msk.msra.mxu1 %vm450_vm1, %v6726_v28 }
 0x1be   : > { %17414 = vmatpush1.msk.msra.mxu0 %vm450_vm1, %v6724_v4  ;;  %17422 = vmatprep.subr.msk.mxu1 %vm450_vm1, %v20318_v49  ;;  %v2694_v31 = vpop.f32.mrb[16].mxu1 }
 0x1bf   : > { %17415 = vmatmul.mubr.msk.f32.vlgmr.msra.gmra.mrb[0].mxu0 %vm446_vm2, %v17406_v11  ;;  %18315 = vmatmul.mubr.msk.f32.vlgmr.msra.gmra.mrb[42].mxu1 %vm446_vm2, %v17406_v11  ;;  %v2704_v32 = vadd.f32 %v2694_v31, %v2371_v53  ;;  %v18251_v7 = vpop.f32.mrb[17].mxu1 }
 0x1c0   : > { %17419 = vmatprep.subr.msk.mxu0 %vm450_vm1, %v20292_v35  ;;  %17423 = vmatpush1.msk.msra.mxu1 %vm450_vm1, %v19649_v3  ;;  %v7334_v3 = vpop.permute.xlu0 %7333 }
 0x1c1   : > { %17420 = vmatpush1.msk.msra.mxu0 %vm450_vm1, %v19664_v6  ;;  %7105 = vmatprep.mubr.f32.mxu0 %v22811_v0  ;;  %v17430_v6 = vld [vmem:[%s22827_s1 + $0xa8] sm:$0x3f] }
 0x1c2   : > { %7176 = vmatprep.mubr.f32.mxu1 %v22811_v0  ;;  %17425 = vmatprep.subr.msk.mxu0 %vm450_vm1, %v20332_v59 }
 0x1c3   : > { %18317 = vmatprep.subr.mxu1 %v22811_v0  ;;  %17421 = vmatmul.mubr.msk.f32.vlgmr.msra.gmra.mrb[2].mxu0 %vm446_vm2, %v17418_v34 }
 0x1c4   : > { %17424 = vmatmul.mubr.msk.f32.vlgmr.msra.gmra.mrb[2].mxu1 %vm446_vm2, %v17418_v34  ;;  %17426 = vmatpush1.msk.msra.mxu0 %vm450_vm1, %v19660_v5  ;;  %v7335_v5 = vsel %vm439_vm0, %v19782_v20, %v7334_v3 }
 0x1c5   : > { %18318 = vmatpush3.msk.msra.mxu1 %vm450_vm1, %v19731_v8  ;;  %17431 = vmatprep.subr.msk.mxu0 %vm450_vm1, %v19785_v21  ;;  %v7636_v8 = vpop.permute.xlu1 %7635 }
 0x1c6   : > { %17434 = vmatprep.subr.msk.mxu1 %vm450_vm1, %v19803_v23  ;;  %7247 = vmatprep.mubr.f32.mxu0 %v22811_v0  ;;  %v7637_v21 = vsel %vm1064_vm3, %v19840_v30, %v7636_v8  ;;  %v7938_v23 = vpop.permute.xlu0 %7937  ;;  %v17454_v30 = vld [vmem:[%s22827_s1 + $0xb8] sm:$0x3f] }
 0x1c7   : > { %18319 = vmatprep.mubr.msk.f32.mxu1 %vm19496_vm4, %v22811_v0  ;;  %17427 = vmatmul.mubr.msk.f32.vlgmr.msra.gmra.mrb[0].mxu0 %vm446_vm2, %v17418_v34 }
 0x1c8   : > { %18320 = vmatmul.mubr.msk.f32.vlgmr.msra.gmra.mrb[44].mxu1 %vm446_vm2, %v17418_v34  ;;  %17432 = vmatpush1.msk.msra.mxu0 %vm450_vm1, %v19766_v15 }
 0x1c9   : > { %17435 = vmatpush1.msk.msra.mxu1 %vm450_vm1, %v19780_v19  ;;  %17437 = vmatprep.subr.msk.mxu0 %vm450_vm1, %v7335_v5 }
 0x1ca   : > { %7407 = vmatprep.mubr.f32.mxu0 %v22811_v0  ;;  %7478 = vmatprep.mubr.f32.mxu1 %v22811_v0 }
 0x1cb   : > { %18322 = vmatprep.subr.mxu1 %v22811_v0  ;;  %17433 = vmatmul.mubr.msk.f32.vlgmr.msra.gmra.mrb[2].mxu0 %vm446_vm2, %v17430_v6 }
 0x1cc   : > { %17436 = vmatmul.mubr.msk.f32.vlgmr.msra.gmra.mrb[2].mxu1 %vm446_vm2, %v17430_v6  ;;  %17438 = vmatpush1.msk.msra.mxu0 %vm450_vm1, %v19792_v22  ;;  %v17442_v22 = vld [vmem:[%s22827_s1 + $0xb0] sm:$0x3f] }
 0x1cd   : > { %18323 = vmatpush3.msk.msra.mxu1 %vm450_vm1, %v7334_v3  ;;  %17443 = vmatprep.subr.msk.mxu0 %vm450_vm1, %v19879_v40 }
 0x1ce   : > { %17446 = vmatprep.subr.msk.mxu1 %vm450_vm1, %v19882_v41  ;;  %7549 = vmatprep.mubr.f32.mxu0 %v22811_v0  ;;  %v3027_v15 = vpop.f32.mrb[18].mxu1 }
 0x1cf   : > { %18324 = vmatprep.mubr.msk.f32.mxu1 %vm19496_vm4, %v22811_v0  ;;  %17439 = vmatmul.mubr.msk.f32.vlgmr.msra.gmra.mrb[0].mxu0 %vm446_vm2, %v17430_v6  ;;  %v3037_v19 = vadd.f32 %v3027_v15, %v2704_v32  ;;  %v18256_v20 = vpop.f32.mrb[19].mxu1 }
 0x1d0   : > { %18325 = vmatmul.mubr.msk.f32.vlgmr.msra.gmra.mrb[46].mxu1 %vm446_vm2, %v17430_v6  ;;  %17444 = vmatpush1.msk.msra.mxu0 %vm450_vm1, %v19836_v29  ;;  %v7939_v29 = vsel %vm1394_vm5, %v19916_v48, %v7938_v23  ;;  %vm9715_vm5 = vcmask 982016  }
 0x1d1   : > { %17447 = vmatpush1.msk.msra.mxu1 %vm450_vm1, %v19862_v36  ;;  %17449 = vmatprep.subr.msk.mxu0 %vm450_vm1, %v7637_v21 }
 0x1d2   : > { %7709 = vmatprep.mubr.f32.mxu0 %v22811_v0  ;;  %7780 = vmatprep.mubr.f32.mxu1 %v22811_v0 }
 0x1d3   : > { %18327 = vmatprep.subr.mxu1 %v22811_v0  ;;  %17445 = vmatmul.mubr.msk.f32.vlgmr.msra.gmra.mrb[2].mxu0 %vm446_vm2, %v17442_v22 }
 0x1d4   : > { %17448 = vmatmul.mubr.msk.f32.vlgmr.msra.gmra.mrb[2].mxu1 %vm446_vm2, %v17442_v22  ;;  %17450 = vmatpush1.msk.msra.mxu0 %vm450_vm1, %v19856_v33  ;;  %v8240_v33 = vpop.permute.xlu1 %8239 }
 0x1d5   : > { %18328 = vmatpush3.msk.msra.mxu1 %vm450_vm1, %v7636_v8  ;;  %17455 = vmatprep.subr.msk.mxu0 %vm450_vm1, %v19927_v50 }
 0x1d6   : > { %17458 = vmatprep.subr.msk.mxu1 %vm450_vm1, %v19954_v55  ;;  %7851 = vmatprep.mubr.f32.mxu0 %v22811_v0 }
 0x1d7   : > { %18329 = vmatprep.mubr.msk.f32.mxu1 %vm19496_vm4, %v22811_v0  ;;  %17451 = vmatmul.mubr.msk.f32.vlgmr.msra.gmra.mrb[0].mxu0 %vm446_vm2, %v17442_v22 }
 0x1d8   : > { %18330 = vmatmul.mubr.msk.f32.vlgmr.msra.gmra.mrb[48].mxu1 %vm446_vm2, %v17442_v22  ;;  %17456 = vmatpush1.msk.msra.mxu0 %vm450_vm1, %v19887_v42  ;;  %v8241_v42 = vsel %vm1724_vm6, %v19979_v61, %v8240_v33 }
 0x1d9   : > { %17459 = vmatpush1.msk.msra.mxu1 %vm450_vm1, %v19911_v46  ;;  %17461 = vmatprep.subr.msk.mxu0 %vm450_vm1, %v7939_v29  ;;  %v17466_v46 = vld [vmem:[%s22827_s1 + $0xc0] sm:$0x3f] }
 0x1da   : > { %8011 = vmatprep.mubr.f32.mxu0 %v22811_v0  ;;  %8082 = vmatprep.mubr.f32.mxu1 %v22811_v0 }
 0x1db   : > { %18332 = vmatprep.subr.mxu1 %v22811_v0  ;;  %17457 = vmatmul.mubr.msk.f32.vlgmr.msra.gmra.mrb[2].mxu0 %vm446_vm2, %v17454_v30 }
 0x1dc   : > { %17460 = vmatmul.mubr.msk.f32.vlgmr.msra.gmra.mrb[2].mxu1 %vm446_vm2, %v17454_v30  ;;  %17462 = vmatpush1.msk.msra.mxu0 %vm450_vm1, %v19935_v51 }
 0x1dd   : > { %18333 = vmatpush3.msk.msra.mxu1 %vm450_vm1, %v7938_v23  ;;  %17467 = vmatprep.subr.msk.mxu0 %vm450_vm1, %v19969_v60 }
 0x1de   : > { %17470 = vmatprep.subr.msk.mxu1 %vm450_vm1, %v19992_v10  ;;  %8153 = vmatprep.mubr.f32.mxu0 %v22811_v0  ;;  %v3360_v36 = vpop.f32.mrb[20].mxu1 }
 0x1df   : > { %18334 = vmatprep.mubr.msk.f32.mxu1 %vm19496_vm4, %v22811_v0  ;;  %17463 = vmatmul.mubr.msk.f32.vlgmr.msra.gmra.mrb[0].mxu0 %vm446_vm2, %v17454_v30  ;;  %v3370_v40 = vadd.f32 %v3360_v36, %v3037_v19  ;;  %v18261_v41 = vpop.f32.mrb[21].mxu1 }
 0x1e0   : > { %18335 = vmatmul.mubr.msk.f32.vlgmr.msra.gmra.mrb[50].mxu1 %vm446_vm2, %v17454_v30  ;;  %17468 = vmatpush1.msk.msra.mxu0 %vm450_vm1, %v19951_v54 }
 0x1e1   : > { %17471 = vmatpush1.msk.msra.mxu1 %vm450_vm1, %v19963_v58  ;;  %17473 = vmatprep.subr.msk.mxu0 %vm450_vm1, %v8241_v42 }
 0x1e2   : > { %8313 = vmatprep.mubr.f32.mxu0 %v22811_v0  ;;  %8384 = vmatprep.mubr.f32.mxu1 %v22811_v0 }
 0x1e3   : > { %17469 = vmatmul.mubr.msk.f32.vlgmr.msra.gmra.mrb[2].mxu0 %vm446_vm2, %v17466_v46  ;;  %18337 = vmatprep.subr.mxu1 %v22811_v0 }
 0x1e4   : > { %17472 = vmatmul.mubr.msk.f32.vlgmr.msra.gmra.mrb[2].mxu1 %vm446_vm2, %v17466_v46  ;;  %17474 = vmatpush1.msk.msra.mxu0 %vm450_vm1, %v19986_v63 }
 0x1e5   : > { %8455 = vmatprep.mubr.f32.mxu0 %v22811_v0  ;;  %18338 = vmatpush3.msk.msra.mxu1 %vm450_vm1, %v8240_v33  ;;  %vm8665_vm1 = vcmask 48128  }
 0x1e6   : > { %18339 = vmatprep.mubr.msk.f32.mxu1 %vm19496_vm4, %v22811_v0 }
 0x1e7   : > { %17475 = vmatmul.mubr.msk.f32.vlgmr.msra.gmra.mrb[0].mxu0 %vm446_vm2, %v17466_v46 }
 0x1e8   : > { %18340 = vmatmul.mubr.msk.f32.vlgmr.msra.gmra.mrb[52].mxu1 %vm446_vm2, %v17466_v46  ;;  %8747 = vmatprep.mubr.f32.mxu0 %v22811_v0  ;;  %vm9442_vm2 = vcmask 998400  }
 0x1e9   : > { %8824 = vmatprep.mubr.f32.mxu1 %v22811_v0 }
 0x1ef   : > { %v3693_v48 = vpop.f32.mrb[22].mxu1 }
 0x1f0   : > { %v3703_v50 = vadd.f32 %v3693_v48, %v3370_v40  ;;  %v18266_v51 = vpop.f32.mrb[23].mxu1 }
 0x203   : > { %v4026_v54 = vpop.f32.mrb[24].mxu1 }
 0x204   : > { %v4036_v55 = vadd.f32 %v4026_v54, %v3703_v50  ;;  %v18271_v58 = vpop.f32.mrb[25].mxu1 }
 0x213   : > { %v4359_v60 = vpop.f32.mrb[26].mxu1 }
 0x214   : > { %v4369_v61 = vadd.f32 %v4359_v60, %v4036_v55  ;;  %v18276_v63 = vpop.f32.mrb[27].mxu1 }
 0x223   : > { %v4692_v10 = vpop.f32.mrb[28].mxu1 }
 0x224   : > { %v4702_v35 = vadd.f32 %v4692_v10, %v4369_v61  ;;  %v18281_v49 = vpop.f32.mrb[29].mxu1 }
 0x226   : > { %v8543_v8 = vpop.permute.xlu0 %8542 }
 0x232   : > { %v5025_v59 = vpop.f32.mrb[30].mxu1 }
 0x233   : > { %v5035_v37 = vadd.f32 %v5025_v59, %v4702_v35  ;;  %v18286_v38 = vpop.f32.mrb[31].mxu1 }
 0x242   : > { %v5358_v39 = vpop.f32.mrb[32].mxu1 }
 0x243   : > { %v5368_v43 = vadd.f32 %v5358_v39, %v5035_v37  ;;  %v18291_v44 = vpop.f32.mrb[33].mxu1 }
 0x252   : > { %v5691_v45 = vpop.f32.mrb[34].mxu1 }
 0x253   : > { %v5701_v47 = vadd.f32 %v5691_v45, %v5368_v43  ;;  %v18296_v52 = vpop.f32.mrb[35].mxu1 }
 0x262   : > { %v6024_v53 = vpop.f32.mrb[36].mxu1 }
 0x263   : > { %v6034_v56 = vadd.f32 %v6024_v53, %v5701_v47  ;;  %v18301_v57 = vpop.f32.mrb[37].mxu1 }
 0x272   : > { %v6357_v62 = vpop.f32.mrb[38].mxu1 }
 0x273   : > { %v6367_v9 = vadd.f32 %v6357_v62, %v6034_v56  ;;  %v18306_v11 = vpop.f32.mrb[39].mxu1 }
 0x282   : > { %v6690_v12 = vpop.f32.mrb[40].mxu1 }
 0x283   : > { %v6700_v13 = vadd.f32 %v6690_v12, %v6367_v9  ;;  %v18311_v14 = vpop.f32.mrb[41].mxu1 }
 0x292   : > { %v7023_v16 = vpop.f32.mrb[42].mxu1 }
 0x293   : > { %v7033_v17 = vadd.f32 %v7023_v16, %v6700_v13  ;;  %v18316_v1 = vpop.f32.mrb[43].mxu1 }
 0x29b   : > { %v7320_v24 = vpop.f32.mrb[44].mxu1 }
 0x29c   : > { %v7330_v25 = vadd.f32 %v7320_v24, %v7033_v17  ;;  %v18321_v2 = vpop.f32.mrb[45].mxu1 }
 0x2a3   : > { %v7622_v27 = vpop.f32.mrb[46].mxu1 }
 0x2a4   : > { %v7632_v28 = vadd.f32 %v7622_v27, %v7330_v25  ;;  %v18326_v4 = vpop.f32.mrb[47].mxu1 }
 0x2ab   : > { %v7924_v31 = vpop.f32.mrb[48].mxu1 }
 0x2ac   : > { %v7934_v32 = vadd.f32 %v7924_v31, %v7632_v28  ;;  %v18331_v34 = vpop.f32.mrb[49].mxu1 }
 0x2b3   : > { %v8226_v7 = vpop.f32.mrb[50].mxu1 }
 0x2b4   : > { %v8236_v3 = vadd.f32 %v8226_v7, %v7934_v32  ;;  %v18336_v5 = vpop.f32.mrb[51].mxu1 }
 0x2b6   : > { %v8315_v6 = vpop.f32.mrb[2].mxu0 }
 0x2b7   : > { %v18926_v15 = vadd.f32 %v8315_v6, %v20417_v18  ;;  %v8386_v19 = vpop.f32.mrb[2].mxu1  ;;  %v8317_v20 = vpop.f32.mrb[3].mxu0 }
 0x2b8   : > { %v18927_v21 = vadd.f32 %v8317_v20, %v20420_v26  ;;  %v8388_v22 = vpop.f32.mrb[3].mxu1  ;;  %v8547_v48 = vadd.f32 %v8543_v8, %v8386_v19 }
 0x2b9   : > { %v8548_v23 = vadd.f32 %v8543_v8, %v8388_v22  ;;  %v8545_v41 = vadd.f32 %v18926_v15, %v8543_v8  ;;  %v20786_v15 = vld [vmem:[%s22785_s3 + $0x10] sm:$0xff] }
 0x2ba   : > { %v8546_v29 = vadd.f32 %v18927_v21, %v8543_v8  ;;  %v8457_v30 = vpop.f32.mrb[0].mxu0  ;;  %v8554_v26 = vmax.f32 %v8547_v48, 0.0 }
 0x2bb   : > { %v8555_v33 = vmax.f32 %v8548_v23, 0.0  ;;  %v8528_v36 = vpop.f32.mrb[52].mxu1  ;;  %v8459_v40 = vpop.f32.mrb[1].mxu0  ;;  %v8552_v51 = vmax.f32 %v8545_v41, 0.0  ;;  %v8549_v54 = vadd.f32 %v8543_v8, %v8457_v30  ;;  %v20809_v23 = vld [vmem:[%s22785_s3 + $0x18] sm:$0xff] }
 0x2bc   : > { %v8553_v42 = vmax.f32 %v8546_v29, 0.0  ;;  %v8538_v46 = vadd.f32 %v8528_v36, %v8236_v3  ;;  %v18341_v50 = vpop.f32.mrb[53].mxu1  ;;  %v8550_v60 = vadd.f32 %v8543_v8, %v8459_v40 }
 0x2bd   : > { %8572 = vrot.lane.b32.xlu0 %v8555_v33, %s19487_s20  ;;  %v8556_v58 = vmax.f32 %v8549_v54, 0.0 }
 0x2be   : > { %8568 = vrot.lane.b32.xlu1 %v8553_v42, %s19487_s20  ;;  %v8551_v18 = vadd.f32 %v8543_v8, %v8538_v46  ;;  %v8557_v61 = vmax.f32 %v8550_v60, 0.0 }
 0x2c0   : > { %v8558_v55 = vmax.f32 %v8551_v18, 0.0  ;;  %v20885_v18 = vld [vmem:[%s22785_s3 + $0x20] sm:$0xff] }
 0x2c1   : > { %8566 = vrot.lane.b32.xlu0 %v8552_v51, %s19487_s20 }
 0x2c2   : > { %8570 = vrot.lane.b32.xlu1 %v8554_v26, %s19487_s20 }
 0x2c5   : > { %8578 = vrot.lane.b32.xlu0 %v8558_v55, %s19487_s20 }
 0x2c6   : > { %8574 = vrot.lane.b32.xlu1 %v8556_v58, %s19487_s20 }
 0x2ca   : > { %8576 = vrot.lane.b32.xlu1 %v8557_v61, %s19487_s20  ;;  %s22810_s20 = smov 122  }
 0x32f   : > { %v8573_v63 = vpop.permute.xlu0 %8572 }
 0x330   : > { %v8569_v10 = vpop.permute.xlu1 %8568 }
 0x333   : > { %v8567_v35 = vpop.permute.xlu0 %8566 }
 0x334   : > { %v8571_v49 = vpop.permute.xlu1 %8570  ;;  %v8580_v43 = vsel %vm439_vm0, %v8567_v35, %v8569_v10 }
 0x335   : > { %v8581_v59 = vsel %vm439_vm0, %v8569_v10, %v8571_v49  ;;  %v8582_v37 = vsel %vm439_vm0, %v8571_v49, %v8573_v63  ;;  %v8593_v47 = vmax.f32 %v8552_v51, %v8580_v43  ;;  %v20981_v43 = vld [vmem:[%s22785_s3 + $0x40] sm:$0xff] }
 0x336   : > { %v8594_v38 = vmax.f32 %v8553_v42, %v8581_v59  ;;  %v8595_v39 = vmax.f32 %v8554_v26, %v8582_v37  ;;  %v20859_v42 = vld [vmem:[%s22785_s3 + $0x8] sm:$0xff]  ;;  %v20955_v59 = vld [vmem:[%s22785_s3 + $0x38] sm:$0xff] }
 0x337   : > { %v8579_v53 = vpop.permute.xlu0 %8578 }
 0x338   : > { %8611 = vrot.lane.b32.xlu0 %v8595_v39, %s19491_s15  ;;  %8609 = vrot.lane.b32.xlu1 %v8594_v38, %s19491_s15  ;;  %v8575_v44 = vpop.permute.xlu1 %8574  ;;  %v20732_v32 = vmax.f32 %v8558_v55, %v8579_v53  ;;  %v20907_v55 = vld [vmem:[%s22785_s3 + $0x28] sm:$0xff] }
 0x339   : > { %v8583_v45 = vsel %vm439_vm0, %v8573_v63, %v8575_v44  ;;  %v20933_v63 = vld [vmem:[%s22785_s3 + $0x30] sm:$0xff] }
 0x33a   : > { %v20707_v52 = vmax.f32 %v8555_v33, %v8583_v45  ;;  %v20837_v33 = vld [vmem:[%s22785_s3] sm:$0xff] }
 0x33c   : > { %8607 = vrot.lane.b32.xlu0 %v8593_v47, %s19491_s15  ;;  %8613 = vrot.lane.b32.xlu1 %v20707_v52, %s19491_s15  ;;  %v8577_v56 = vpop.permute.xlu1 %8576 }
 0x33d   : > { %v8584_v57 = vsel %vm439_vm0, %v8575_v44, %v8577_v56  ;;  %v8585_v62 = vsel %vm439_vm0, %v8577_v56, %v8579_v53  ;;  %vm8672_vm0 = vcmask 1045504  }
 0x33e   : > { %v8597_v9 = vmax.f32 %v8556_v58, %v8584_v57  ;;  %v8598_v11 = vmax.f32 %v8557_v61, %v8585_v62  ;;  %v21027_v57 = vld [vmem:[%s22785_s3 + $0x50] sm:$0xff] }
 0x340   : > { %8617 = vrot.lane.b32.xlu0 %v8598_v11, %s19491_s15  ;;  %8615 = vrot.lane.b32.xlu1 %v8597_v9, %s19491_s15 }
 0x3aa   : > { %v8612_v12 = vpop.permute.xlu0 %8611  ;;  %v8610_v13 = vpop.permute.xlu1 %8609 }
 0x3ab   : > { %v8622_v14 = vsel %vm2057_vm7, %v8610_v13, %v8612_v12 }
 0x3ac   : > { %v20717_v16 = vmax.f32 %v8594_v38, %v8622_v14 }
 0x3ae   : > { %v8608_v17 = vpop.permute.xlu0 %8607  ;;  %8653 = vrot.lane.b32.xlu1 %v20717_v16, %s22801_s26  ;;  %v8614_v1 = vpop.permute.xlu1 %8613 }
 0x3af   : > { %v8621_v24 = vsel %vm2057_vm7, %v8608_v17, %v8610_v13  ;;  %v8623_v25 = vsel %vm2057_vm7, %v8612_v12, %v8614_v1 }
 0x3b0   : > { %v20723_v2 = vmax.f32 %v8593_v47, %v8621_v24  ;;  %v20725_v27 = vmax.f32 %v8595_v39, %v8623_v25 }
 0x3b2   : > { %22828 = vst [vmem:[#allocation5_spill] sm:$0xff] %v20725_v27  ;;  %v8618_v28 = vpop.permute.xlu0 %8617  ;;  %8651 = vrot.lane.b32.xlu1 %v20723_v2, %s22801_s26  ;;  %8655 = vrot.lane.b32.xlu0 %v20725_v27, %s22801_s26  ;;  %v8616_v4 = vpop.permute.xlu1 %8615 }
 0x3b3   : > { %v8625_v31 = vsel %vm2057_vm7, %v8616_v4, %v8618_v28  ;;  %v8624_v29 = vsel %vm2057_vm7, %v8614_v1, %v8616_v4  ;;  %v21103_v4 = vld [vmem:[%s22785_s3 + $0x60] sm:$0xff] }
 0x3b4   : > { %v20734_v34 = vmax.f32 %v8597_v9, %v8625_v31  ;;  %v20829_v30 = vmax.f32 %v20707_v52, %v8624_v29  ;;  %v21003_v52 = vld [vmem:[%s22785_s3 + $0x48] sm:$0xff]  ;;  %v21043_v9 = vld [vmem:[%s22785_s3 + $0x58] sm:$0xff] }
 0x3b6   : > { %8619 = vrot.lane.b32.xlu0 %v20732_v32, %s19491_s15  ;;  %8659 = vrot.lane.b32.xlu1 %v20734_v34, %s22801_s26  ;;  %s22803_s15 = smov 120  }
 0x3ba   : > { %9162 = vrot.lane.b32.xlu0 %v20717_v16, %s22809_s29  ;;  %9164 = vrot.lane.b32.xlu1 %v20725_v27, %s22809_s29 }
 0x3be   : > { %9160 = vrot.lane.b32.xlu0 %v20723_v2, %s22809_s29  ;;  %9168 = vrot.lane.b32.xlu1 %v20734_v34, %s22809_s29 }
 0x3c2   : > { %9434 = vrot.lane.b32.xlu0 %v20717_v16, %s22810_s20  ;;  %9436 = vrot.lane.b32.xlu1 %v20725_v27, %s22810_s20 }
 0x3c6   : > { %9432 = vrot.lane.b32.xlu0 %v20723_v2, %s22810_s20  ;;  %9440 = vrot.lane.b32.xlu1 %v20734_v34, %s22810_s20 }
 0x3ca   : > { %9707 = vrot.lane.b32.xlu0 %v20717_v16, %s22803_s15  ;;  %9709 = vrot.lane.b32.xlu1 %v20725_v27, %s22803_s15 }
 0x3ce   : > { %9705 = vrot.lane.b32.xlu0 %v20723_v2, %s22803_s15  ;;  %9713 = vrot.lane.b32.xlu1 %v20734_v34, %s22803_s15  ;;  %s22805_s15 = smov 56  }
 0x3d2   : > { %9981 = vrot.lane.b32.xlu0 %v20717_v16, %s22829_s16  ;;  %9983 = vrot.lane.b32.xlu1 %v20725_v27, %s22829_s16 }
 0x3d6   : > { %9979 = vrot.lane.b32.xlu0 %v20723_v2, %s22829_s16  ;;  %9987 = vrot.lane.b32.xlu1 %v20734_v34, %s22829_s16 }
 0x3da   : > { %10256 = vrot.lane.b32.xlu1 %v20717_v16, %s22830_s28 }
 0x3de   : > { %10254 = vrot.lane.b32.xlu1 %v20723_v2, %s22830_s28 }
 0x420   : > { %v8654_v7 = vpop.permute.xlu1 %8653 }
 0x424   : > { %v20776_v3 = vpop.permute.xlu0 %8655  ;;  %v8652_v5 = vpop.permute.xlu1 %8651 }
 0x425   : > { %v20780_v6 = vsel %vm1064_vm3, %v8654_v7, %v20776_v3  ;;  %v8661_v8 = vsel %vm1064_vm3, %v8652_v5, %v8654_v7 }
 0x426   : > { %17480 = vmatprep.subr.msk.mxu0 %vm8672_vm0, %v20780_v6 }
 0x427   : > { %17481 = vmatpush1.msk.msra.mxu0 %vm8672_vm0, %v8661_v8 }
 0x428   : > { %v20791_v19 = vpop.permute.xlu0 %8619  ;;  %17482 = vmatmul.mubr.msk.f32.vlgmr.msra.gmra.mrb[4].mxu0 %vm8665_vm1, %v20786_v15  ;;  %v20795_v20 = vpop.permute.xlu1 %8659 }
 0x429   : > { %v8626_v21 = vsel %vm2057_vm7, %v8618_v28, %v20791_v19  ;;  %18342 = vmatprep.subr.msk.mxu0 %vm8672_vm0, %v20795_v20  ;;  %8753 = vmatprep.mubr.f32.mxu0 %v22811_v0  ;;  %v21037_v62 = vmax.f32 %v20732_v32, %v20791_v19  ;;  %vm10816_vm7 = vcmask 474112  }
 0x42a   : > { %v20802_v22 = vmax.f32 %v8598_v11, %v8626_v21  ;;  %18343 = vmatpush3.msk.msra.mxu0 %vm8672_vm0, %v20795_v20  ;;  %v15160_v11 = vld [vmem:[%s22786_s4 + $0x8] sm:$0xff] }
 0x42b   : > { %17491 = vmatprep.subr.msk.mxu0 %vm8672_vm0, %v20717_v16  ;;  %22835 = vst [vmem:[#allocation7_spill] sm:$0xff] %v21037_v62  ;;  %v21130_v21 = vld [vmem:[%s22785_s3 + $0x68] sm:$0xff] }
 0x42c   : > { %22831 = vst [vmem:[#allocation6_spill] sm:$0xff] %v20802_v22  ;;  %9989 = vrot.lane.b32.xlu0 %v20802_v22, %s22829_s16  ;;  %10264 = vrot.lane.b32.xlu1 %v20802_v22, %s22830_s28  ;;  %v9163_v36 = vpop.permute.xlu0 %9162  ;;  %v20839_v40 = vpop.permute.xlu1 %9164 }
 0x42d   : > { %17483 = vmatmul.mubr.msk.f32.gmra.mrb[6].mxu0 %vm8665_vm1, %v20809_v23  ;;  %v20851_v41 = vsel %vm1724_vm6, %v9163_v36, %v20839_v40 }
 0x42e   : > { %18344 = vmatprep.mubr.msk.f32.mxu0 %vm8665_vm1, %v20786_v15 }
 0x430   : > { %10258 = vrot.lane.b32.xlu0 %v20725_v27, %s22830_s28  ;;  %10533 = vrot.lane.b32.xlu1 %v20725_v27, %s22832_s18  ;;  %v9161_v46 = vpop.permute.xlu0 %9160  ;;  %v20867_v48 = vpop.permute.xlu1 %9168 }
 0x431   : > { %18345 = vmatmul.mubr.msk.f32.vlgmr.msra.gmra.mrb[8].mxu0 %vm8665_vm1, %v20809_v23  ;;  %v9170_v50 = vsel %vm1724_vm6, %v9161_v46, %v9163_v36 }
 0x432   : > { %17492 = vmatpush1.msk.msra.mxu0 %vm8672_vm0, %v20723_v2  ;;  %8992 = vmatprep.mubr.f32.mxu0 %v22811_v0 }
 0x433   : > { %18347 = vmatprep.subr.msk.mxu0 %vm8672_vm0, %v20734_v34 }
 0x434   : > { %10262 = vrot.lane.b32.xlu0 %v20734_v34, %s22830_s28  ;;  %8657 = vrot.lane.b32.xlu1 %v20829_v30, %s22801_s26  ;;  %v9435_v51 = vpop.permute.xlu0 %9434  ;;  %v20887_v54 = vpop.permute.xlu1 %9436  ;;  %s22836_s26 = smov 58  }
 0x435   : > { %17493 = vmatmul.mubr.msk.f32.vlgmr.msra.gmra.mrb[4].mxu0 %vm8665_vm1, %v20837_v33  ;;  %v20899_v26 = vsel %vm9442_vm2, %v9435_v51, %v20887_v54 }
 0x436   : > { %18348 = vmatpush3.msk.msra.mxu0 %vm8672_vm0, %v20734_v34  ;;  %8998 = vmatprep.mubr.f32.mxu0 %v22811_v0 }
 0x437   : > { %17504 = vmatprep.subr.msk.mxu0 %vm8672_vm0, %v20851_v41 }
 0x438   : > { %10531 = vrot.lane.b32.xlu0 %v20717_v16, %s22832_s18  ;;  %10537 = vrot.lane.b32.xlu1 %v20734_v34, %s22832_s18  ;;  %v9433_v58 = vpop.permute.xlu0 %9432  ;;  %v20915_v60 = vpop.permute.xlu1 %9440 }
 0x439   : > { %17494 = vmatmul.mubr.msk.f32.gmra.mrb[6].mxu0 %vm8665_vm1, %v20859_v42  ;;  %v9443_v61 = vsel %vm9442_vm2, %v9433_v58, %v9435_v51 }
 0x43a   : > { %18349 = vmatprep.mubr.msk.f32.mxu0 %vm8665_vm1, %v20837_v33 }
 0x43c   : > { %10529 = vrot.lane.b32.xlu0 %v20723_v2, %s22832_s18  ;;  %10808 = vrot.lane.b32.xlu1 %v20725_v27, %s22807_s19  ;;  %v9708_v10 = vpop.permute.xlu0 %9707  ;;  %v20935_v35 = vpop.permute.xlu1 %9709 }
 0x43d   : > { %18350 = vmatmul.mubr.msk.f32.vlgmr.msra.gmra.mrb[8].mxu0 %vm8665_vm1, %v20859_v42  ;;  %v20947_v49 = vsel %vm9715_vm5, %v9708_v10, %v20935_v35 }
 0x43e   : > { %17505 = vmatpush1.msk.msra.mxu0 %vm8672_vm0, %v9170_v50  ;;  %9254 = vmatprep.mubr.f32.mxu0 %v22811_v0 }
 0x43f   : > { %18352 = vmatprep.subr.msk.mxu0 %vm8672_vm0, %v20867_v48 }
 0x440   : > { %10539 = vrot.lane.b32.xlu0 %v20802_v22, %s22832_s18  ;;  %10812 = vrot.lane.b32.xlu1 %v20734_v34, %s22807_s19  ;;  %v9706_v37 = vpop.permute.xlu0 %9705  ;;  %v20963_v38 = vpop.permute.xlu1 %9713 }
 0x441   : > { %17506 = vmatmul.mubr.msk.f32.vlgmr.msra.gmra.mrb[4].mxu0 %vm8665_vm1, %v20885_v18  ;;  %v9716_v39 = vsel %vm9715_vm5, %v9706_v37, %v9708_v10 }
 0x442   : > { %18353 = vmatpush3.msk.msra.mxu0 %vm8672_vm0, %v20867_v48  ;;  %9260 = vmatprep.mubr.f32.mxu0 %v22811_v0 }
 0x443   : > { %17517 = vmatprep.subr.msk.mxu0 %vm8672_vm0, %v20899_v26 }
 0x444   : > { %10806 = vrot.lane.b32.xlu0 %v20717_v16, %s22807_s19  ;;  %11082 = vrot.lane.b32.xlu1 %v20717_v16, %s22805_s15  ;;  %v9982_v44 = vpop.permute.xlu0 %9981  ;;  %v20983_v45 = vpop.permute.xlu1 %9983 }
 0x445   : > { %17507 = vmatmul.mubr.msk.f32.gmra.mrb[6].mxu0 %vm8665_vm1, %v20907_v55  ;;  %v20995_v47 = vsel %vm3722_vm12, %v9982_v44, %v20983_v45 }
 0x446   : > { %18354 = vmatprep.mubr.msk.f32.mxu0 %vm8665_vm1, %v20885_v18 }
 0x448   : > { %10804 = vrot.lane.b32.xlu0 %v20723_v2, %s22807_s19  ;;  %11080 = vrot.lane.b32.xlu1 %v20723_v2, %s22805_s15  ;;  %v9980_v53 = vpop.permute.xlu0 %9979  ;;  %v21074_v12 = vpop.permute.xlu1 %9987 }
 0x449   : > { %18355 = vmatmul.mubr.msk.f32.vlgmr.msra.gmra.mrb[8].mxu0 %vm8665_vm1, %v20907_v55  ;;  %v9991_v56 = vsel %vm3722_vm12, %v9980_v53, %v9982_v44 }
 0x44a   : > { %17518 = vmatpush1.msk.msra.mxu0 %vm8672_vm0, %v9443_v61  ;;  %9527 = vmatprep.mubr.f32.mxu0 %v22811_v0 }
 0x44b   : > { %18357 = vmatprep.subr.msk.mxu0 %vm8672_vm0, %v20915_v60 }
 0x44c   : > { %10814 = vrot.lane.b32.xlu0 %v20802_v22, %s22807_s19  ;;  %11088 = vrot.lane.b32.xlu1 %v20734_v34, %s22805_s15  ;;  %s22834_s19 = smov 126   ;;  %v10257_v13 = vpop.permute.xlu1 %10256 }
 0x44d   : > { %17519 = vmatmul.mubr.msk.f32.vlgmr.msra.gmra.mrb[4].mxu0 %vm8665_vm1, %v20933_v63 }
 0x44e   : > { %18358 = vmatpush3.msk.msra.mxu0 %vm8672_vm0, %v20915_v60  ;;  %9533 = vmatprep.mubr.f32.mxu0 %v22811_v0 }
 0x44f   : > { %17530 = vmatprep.subr.msk.mxu0 %vm8672_vm0, %v20947_v49 }
 0x450   : > { %11084 = vrot.lane.b32.xlu0 %v20725_v27, %s22805_s15  ;;  %9438 = vrot.lane.b32.xlu1 %v20829_v30, %s22810_s20  ;;  %v10255_v14 = vpop.permute.xlu1 %10254 }
 0x451   : > { %17520 = vmatmul.mubr.msk.f32.gmra.mrb[6].mxu0 %vm8665_vm1, %v20955_v59  ;;  %v10266_v31 = vsel %vm4388_vm14, %v10255_v14, %v10257_v13 }
 0x452   : > { %18359 = vmatprep.mubr.msk.f32.mxu0 %vm8665_vm1, %v20933_v63 }
 0x454   : > { %9166 = vrot.lane.b32.xlu0 %v20829_v30, %s22809_s29  ;;  %9985 = vrot.lane.b32.xlu1 %v20829_v30, %s22829_s16 }
 0x455   : > { %18360 = vmatmul.mubr.msk.f32.vlgmr.msra.gmra.mrb[8].mxu0 %vm8665_vm1, %v20955_v59 }
 0x456   : > { %17531 = vmatpush1.msk.msra.mxu0 %vm8672_vm0, %v9716_v39  ;;  %9800 = vmatprep.mubr.f32.mxu0 %v22811_v0 }
 0x457   : > { %18362 = vmatprep.subr.msk.mxu0 %vm8672_vm0, %v20963_v38 }
 0x458   : > { %11090 = vrot.lane.b32.xlu0 %v20802_v22, %s22805_s15  ;;  %10260 = vrot.lane.b32.xlu1 %v20829_v30, %s22830_s28  ;;  %s22833_s15 = smov 120  }
 0x459   : > { %17532 = vmatmul.mubr.msk.f32.vlgmr.msra.gmra.mrb[4].mxu0 %vm8665_vm1, %v20981_v43 }
 0x45a   : > { %18363 = vmatpush3.msk.msra.mxu0 %vm8672_vm0, %v20963_v38  ;;  %9806 = vmatprep.mubr.f32.mxu0 %v22811_v0 }
 0x45b   : > { %17543 = vmatprep.subr.msk.mxu0 %vm8672_vm0, %v20995_v47 }
 0x45c   : > { %9711 = vrot.lane.b32.xlu0 %v20829_v30, %s22833_s15  ;;  %11861 = vrot.lane.b32.xlu1 %v20802_v22, %s22809_s29  ;;  %s22838_s29 = smov 122  }
 0x45d   : > { %17533 = vmatmul.mubr.msk.f32.gmra.mrb[6].mxu0 %vm8665_vm1, %v21003_v52 }
 0x45e   : > { %18364 = vmatprep.mubr.msk.f32.mxu0 %vm8665_vm1, %v20981_v43 }
 0x460   : > { %11606 = vrot.lane.b32.xlu0 %v20802_v22, %s22834_s19  ;;  %12116 = vrot.lane.b32.xlu1 %v20802_v22, %s22810_s20  ;;  %s22839_s20 = smov 124  }
 0x461   : > { %18365 = vmatmul.mubr.msk.f32.vlgmr.msra.gmra.mrb[8].mxu0 %vm8665_vm1, %v21003_v52 }
 0x462   : > { %17544 = vmatpush1.msk.msra.mxu0 %vm8672_vm0, %v9991_v56  ;;  %10076 = vmatprep.mubr.f32.mxu0 %v22811_v0 }
 0x464   : > { %10535 = vrot.lane.b32.xlu0 %v20829_v30, %s22832_s18  ;;  %12371 = vrot.lane.b32.xlu1 %v20802_v22, %s22833_s15 }
 0x465   : > { %17545 = vmatmul.mubr.msk.f32.vlgmr.msra.gmra.mrb[4].mxu0 %vm8665_vm1, %v21027_v57 }
 0x466   : > { %10082 = vmatprep.mubr.f32.mxu0 %v22811_v0 }
 0x468   : > { %10810 = vrot.lane.b32.xlu0 %v20829_v30, %s22836_s26  ;;  %12880 = vrot.lane.b32.xlu1 %v21037_v62, %s22830_s28 }
 0x469   : > { %17546 = vmatmul.mubr.msk.f32.gmra.mrb[6].mxu0 %vm8665_vm1, %v21043_v9 }
 0x46a   : > { %18369 = vmatprep.mubr.msk.f32.mxu0 %vm8665_vm1, %v21027_v57 }
 0x46c   : > { %11086 = vrot.lane.b32.xlu0 %v20829_v30, %s22837_s17  ;;  %13386 = vrot.lane.b32.xlu1 %v21037_v62, %s22836_s26  ;;  %s404_s26 = sand.u32 1, %s19476_s22  }
 0x470   : > { %12627 = vrot.lane.b32.xlu0 %v21037_v62, %s22829_s16  ;;  %14142 = vrot.lane.b32.xlu1 %v21037_v62, %s22834_s19 }
 0x474   : > { %13133 = vrot.lane.b32.xlu0 %v21037_v62, %s22832_s18  ;;  %14652 = vrot.lane.b32.xlu1 %v21037_v62, %s22838_s29  ;;  %s17899_s18 = sshll.u32 %s19601_s25, 4  ;;  %s19514_s25 = smov [#allocation2]  }
 0x475   : > { %s22740_s28 = scalar_lea.hbm %s22794_s12, %s17899_s18  ;;  %s19426_s1 = sshll.u32 %s19514_s25, 4  ;;  %s19427_s1 = int_to_ptr.vmem [resolvable:$false] %s19426_s1 }
 0x478   : > { %13639 = vrot.lane.b32.xlu0 %v21037_v62, %s22837_s17  ;;  %s405_s17 = scalar_lea.vmem [#allocation2], %s404_s26 }
 0x47c   : > { %14397 = vrot.lane.b32.xlu0 %v21037_v62, %s22839_s20 }
 0x480   : > { %14907 = vrot.lane.b32.xlu0 %v21037_v62, %s22833_s15  ;;  %v22844_v62 = vmov 0.0   ;;  %s19428_s15 = scalar_lea.vmem %s19427_s1, 32 }
 0x484   : > { %15168 = vperm.xlu0 %19377, %v15160_v11   ;;  %v21218_v11 = vld [vmem:[%s22785_s3 + $0x80] sm:$0xff] }
 0x49e   : > { %v21076_v17 = vpop.permute.xlu0 %9989  ;;  %v21078_v1 = vpop.permute.xlu1 %10264 }
 0x49f   : > { %v21083_v24 = vsel %vm3722_vm12, %v21074_v12, %v21076_v17 }
 0x4a0   : > { %18367 = vmatprep.subr.msk.mxu0 %vm8672_vm0, %v21083_v24 }
 0x4a1   : > { %18368 = vmatpush3.msk.msra.mxu0 %vm8672_vm0, %v21083_v24 }
 0x4a2   : > { %v21089_v25 = vpop.permute.xlu0 %10258  ;;  %18370 = vmatmul.mubr.msk.f32.vlgmr.msra.gmra.mrb[8].mxu0 %vm8665_vm1, %v21043_v9  ;;  %v21093_v2 = vpop.permute.xlu1 %10533 }
 0x4a3   : > { %v21097_v28 = vsel %vm4388_vm14, %v10257_v13, %v21089_v25  ;;  %10351 = vmatprep.mubr.f32.mxu0 %v22811_v0 }
 0x4a4   : > { %17556 = vmatprep.subr.msk.mxu0 %vm8672_vm0, %v21097_v28 }
 0x4a5   : > { %17557 = vmatpush1.msk.msra.mxu0 %vm8672_vm0, %v10266_v31  ;;  %v21236_v31 = vld [vmem:[%s22785_s3 + $0x88] sm:$0xff] }
 0x4a6   : > { %v21109_v32 = vpop.permute.xlu0 %10262  ;;  %17558 = vmatmul.mubr.msk.f32.vlgmr.msra.gmra.mrb[4].mxu0 %vm8665_vm1, %v21103_v4  ;;  %v8658_v7 = vpop.permute.xlu1 %8657 }
 0x4a7   : > { %v21116_v5 = vsel %vm4388_vm14, %v21109_v32, %v21078_v1  ;;  %v21120_v8 = vsel %vm1064_vm3, %v20776_v3, %v8658_v7  ;;  %v21124_v19 = vsel %vm1064_vm3, %v8658_v7, %v20795_v20  ;;  %10357 = vmatprep.mubr.f32.mxu0 %v22811_v0 }
 0x4a8   : > { %17484 = vmatprep.subr.msk.mxu1 %vm8672_vm0, %v21124_v19  ;;  %18372 = vmatprep.subr.msk.mxu0 %vm8672_vm0, %v21116_v5 }
 0x4a9   : > { %17485 = vmatpush1.msk.msra.mxu1 %vm8672_vm0, %v21120_v8  ;;  %18373 = vmatpush3.msk.msra.mxu0 %vm8672_vm0, %v21116_v5 }
 0x4aa   : > { %v10532_v3 = vpop.permute.xlu0 %10531  ;;  %17495 = vmatprep.subr.msk.mxu1 %vm8672_vm0, %v20829_v30  ;;  %17559 = vmatmul.mubr.msk.f32.gmra.mrb[6].mxu0 %vm8665_vm1, %v21130_v21  ;;  %v21144_v29 = vpop.permute.xlu1 %10537 }
 0x4ab   : > { %v21148_v36 = vsel %vm5054_vm8, %v10532_v3, %v21093_v2  ;;  %17486 = vmatmul.mubr.msk.f32.vlgmr.msra.gmra.mrb[54].mxu1 %vm8665_vm1, %v20786_v15  ;;  %18374 = vmatprep.mubr.msk.f32.mxu0 %vm8665_vm1, %v21103_v4  ;;  %v21168_v15 = vld [vmem:[%s22785_s3 + $0x70] sm:$0xff] }
 0x4ac   : > { %17496 = vmatpush1.msk.msra.mxu1 %vm8672_vm0, %v20725_v27  ;;  %17569 = vmatprep.subr.msk.mxu0 %vm8672_vm0, %v21148_v36 }
 0x4ad   : > { %8830 = vmatprep.mubr.f32.mxu1 %v22811_v0 }
 0x4ae   : > { %v10530_v46 = vpop.permute.xlu0 %10529  ;;  %18375 = vmatmul.mubr.msk.f32.vlgmr.msra.gmra.mrb[8].mxu0 %vm8665_vm1, %v21130_v21  ;;  %v21161_v50 = vpop.permute.xlu1 %10808 }
 0x4af   : > { %v10541_v51 = vsel %vm5054_vm8, %v10530_v46, %v10532_v3  ;;  %10626 = vmatprep.mubr.f32.mxu0 %v22811_v0  ;;  %17487 = vmatmul.mubr.msk.f32.gmra.mrb[56].mxu1 %vm8665_vm1, %v20809_v23  ;;  %v21189_v23 = vld [vmem:[%s22785_s3 + $0x78] sm:$0xff] }
 0x4b0   : > { %17570 = vmatpush1.msk.msra.mxu0 %vm8672_vm0, %v10541_v51  ;;  %9069 = vmatprep.mubr.f32.mxu1 %v22811_v0 }
 0x4b2   : > { %v21174_v58 = vpop.permute.xlu0 %10539  ;;  %17571 = vmatmul.mubr.msk.f32.vlgmr.msra.gmra.mrb[4].mxu0 %vm8665_vm1, %v21168_v15  ;;  %v21178_v61 = vpop.permute.xlu1 %10812 }
 0x4b3   : > { %v21183_v10 = vsel %vm5054_vm8, %v21144_v29, %v21174_v58  ;;  %10632 = vmatprep.mubr.f32.mxu0 %v22811_v0  ;;  %17497 = vmatmul.mubr.msk.f32.vlgmr.msra.gmra.mrb[54].mxu1 %vm8665_vm1, %v20837_v33 }
 0x4b4   : > { %22840 = vst [vmem:[#allocation8_spill] sm:$0xff] %v21183_v10  ;;  %18377 = vmatprep.subr.msk.mxu0 %vm8672_vm0, %v21183_v10  ;;  %9075 = vmatprep.mubr.f32.mxu1 %v22811_v0 }
 0x4b5   : > { %18378 = vmatpush3.msk.msra.mxu0 %vm8672_vm0, %v21183_v10 }
 0x4b6   : > { %v10807_v37 = vpop.permute.xlu0 %10806  ;;  %17572 = vmatmul.mubr.msk.f32.gmra.mrb[6].mxu0 %vm8665_vm1, %v21189_v23  ;;  %v11083_v39 = vpop.permute.xlu1 %11082 }
 0x4b7   : > { %v21202_v44 = vsel %vm10816_vm7, %v10807_v37, %v21161_v50  ;;  %18379 = vmatprep.mubr.msk.f32.mxu0 %vm8665_vm1, %v21168_v15  ;;  %17498 = vmatmul.mubr.msk.f32.gmra.mrb[56].mxu1 %vm8665_vm1, %v20859_v42 }
 0x4b8   : > { %22841 = vst [vmem:[#allocation9_spill] sm:$0xff] %v21202_v44  ;;  %17582 = vmatprep.subr.msk.mxu0 %vm8672_vm0, %v21202_v44  ;;  %9331 = vmatprep.mubr.f32.mxu1 %v22811_v0 }
 0x4ba   : > { %v10805_v33 = vpop.permute.xlu0 %10804  ;;  %18380 = vmatmul.mubr.msk.f32.vlgmr.msra.gmra.mrb[8].mxu0 %vm8665_vm1, %v21189_v23  ;;  %v11081_v53 = vpop.permute.xlu1 %11080 }
 0x4bb   : > { %v10817_v56 = vsel %vm10816_vm7, %v10805_v33, %v10807_v37  ;;  %10902 = vmatprep.mubr.f32.mxu0 %v22811_v0  ;;  %v11093_v51 = vsel %vm11092_vm9, %v11081_v53, %v11083_v39 }
 0x4bc   : > { %17583 = vmatpush1.msk.msra.mxu0 %vm8672_vm0, %v10817_v56 }
 0x4be   : > { %v21221_v42 = vpop.permute.xlu0 %10814  ;;  %17584 = vmatmul.mubr.msk.f32.vlgmr.msra.gmra.mrb[4].mxu0 %vm8665_vm1, %v21218_v11  ;;  %v21225_v13 = vpop.permute.xlu1 %11088 }
 0x4bf   : > { %v21230_v14 = vsel %vm10816_vm7, %v21178_v61, %v21221_v42  ;;  %10908 = vmatprep.mubr.f32.mxu0 %v22811_v0 }
 0x4c0   : > { %22842 = vst [vmem:[#allocation10_spill] sm:$0xff] %v21230_v14  ;;  %18382 = vmatprep.subr.msk.mxu0 %vm8672_vm0, %v21230_v14 }
 0x4c1   : > { %18383 = vmatpush3.msk.msra.mxu0 %vm8672_vm0, %v21230_v14 }
 0x4c2   : > { %v21242_v7 = vpop.permute.xlu0 %11084  ;;  %17585 = vmatmul.mubr.msk.f32.gmra.mrb[6].mxu0 %vm8665_vm1, %v21236_v31  ;;  %v9439_v3 = vpop.permute.xlu1 %9438 }
 0x4c3   : > { %v21248_v46 = vsel %vm11092_vm9, %v11083_v39, %v21242_v7  ;;  %18384 = vmatprep.mubr.msk.f32.mxu0 %vm8665_vm1, %v21218_v11  ;;  %v21272_v39 = vld [vmem:[%s22785_s3 + $0x90] sm:$0xff]  ;;  %v21282_v53 = vsel %vm9442_vm2, %v20887_v54, %v9439_v3 }
 0x4c4   : > { %22843 = vst [vmem:[#allocation11_spill] sm:$0xff] %v21248_v46  ;;  %17595 = vmatprep.subr.msk.mxu0 %vm8672_vm0, %v21248_v46 }
 0x4c6   : > { %v9167_v37 = vpop.permute.xlu0 %9166  ;;  %18385 = vmatmul.mubr.msk.f32.vlgmr.msra.gmra.mrb[8].mxu0 %vm8665_vm1, %v21236_v31  ;;  %v9986_v33 = vpop.permute.xlu1 %9985 }
 0x4c7   : > { %v21259_v56 = vsel %vm1724_vm6, %v20839_v40, %v9167_v37  ;;  %v21263_v0 = vsel %vm1724_vm6, %v9167_v37, %v20867_v48  ;;  %17596 = vmatpush1.msk.msra.mxu0 %vm8672_vm0, %v11093_v51  ;;  %11178 = vmatprep.mubr.f32.mxu0 %v22844_v62  ;;  %v21276_v40 = vsel %vm9442_vm2, %v9439_v3, %v20915_v60 }
 0x4c8   : > { %17508 = vmatprep.subr.msk.mxu1 %vm8672_vm0, %v21263_v0  ;;  %v21339_v10 = vsel %vm3722_vm12, %v9986_v33, %v21074_v12  ;;  %v21371_v12 = vld [vmem:[%s22785_s3 + $0xa8] sm:$0xff] }
 0x4c9   : > { %17509 = vmatpush1.msk.msra.mxu1 %vm8672_vm0, %v21259_v56 }
 0x4ca   : > { %v21284_v51 = vpop.permute.xlu0 %11090  ;;  %17510 = vmatmul.mubr.msk.f32.vlgmr.msra.gmra.mrb[54].mxu1 %vm8665_vm1, %v20885_v18  ;;  %17521 = vmatprep.subr.msk.mxu1 %vm8672_vm0, %v21276_v40  ;;  %v10261_v37 = vpop.permute.xlu1 %10260  ;;  %v21305_v18 = vld [vmem:[%s22785_s3 + $0x98] sm:$0xff] }
 0x4cb   : > { %v21293_v46 = vsel %vm11092_vm9, %v21225_v13, %v21284_v51  ;;  %17597 = vmatmul.mubr.msk.f32.vlgmr.msra.gmra.mrb[4].mxu0 %vm8665_vm1, %v21272_v39  ;;  %17522 = vmatpush1.msk.msra.mxu1 %vm8672_vm0, %v21282_v53 }
 0x4cc   : > { %22845 = vst [vmem:[#allocation12_spill] sm:$0xff] %v21293_v46  ;;  %18387 = vmatprep.subr.msk.mxu0 %vm8672_vm0, %v21293_v46  ;;  %9337 = vmatprep.mubr.f32.mxu1 %v22844_v62 }
 0x4cd   : > { %11184 = vmatprep.mubr.f32.mxu0 %v22844_v62  ;;  %18388 = vmatpush3.msk.msra.mxu0 %vm8672_vm0, %v21293_v46 }
 0x4ce   : > { %v9712_v54 = vpop.permute.xlu0 %9711  ;;  %17511 = vmatmul.mubr.msk.f32.gmra.mrb[56].mxu1 %vm8665_vm1, %v20907_v55  ;;  %17608 = vmatprep.subr.msk.mxu0 %vm8672_vm0, %v20725_v27  ;;  %v21314_v3 = vpop.permute.xlu1 %11861 }
 0x4cf   : > { %v21318_v14 = vsel %vm9715_vm5, %v9712_v54, %v20963_v38  ;;  %17598 = vmatmul.mubr.msk.f32.gmra.mrb[6].mxu0 %vm8665_vm1, %v21305_v18  ;;  %9604 = vmatprep.mubr.f32.mxu1 %v22844_v62  ;;  %v21329_v55 = vsel %vm9715_vm5, %v20935_v35, %v9712_v54 }
 0x4d0   : > { %17534 = vmatprep.subr.msk.mxu1 %vm8672_vm0, %v21318_v14  ;;  %18389 = vmatprep.mubr.msk.f32.mxu0 %vm8665_vm1, %v21272_v39 }
 0x4d2   : > { %v21331_v27 = vpop.permute.xlu0 %11606  ;;  %17523 = vmatmul.mubr.msk.f32.vlgmr.msra.gmra.mrb[54].mxu1 %vm8665_vm1, %v20933_v63  ;;  %v21335_v46 = vpop.permute.xlu1 %12116  ;;  %v21352_v63 = vld [vmem:[%s22785_s3 + $0xa0] sm:$0xff] }
 0x4d3   : > { %17535 = vmatpush1.msk.msra.mxu1 %vm8672_vm0, %v21329_v55  ;;  %18390 = vmatmul.mubr.msk.f32.vlgmr.msra.gmra.mrb[8].mxu0 %vm8665_vm1, %v21305_v18 }
 0x4d4   : > { %17609 = vmatpush1.msk.msra.mxu0 %vm8672_vm0, %v20717_v16  ;;  %17547 = vmatprep.subr.msk.mxu1 %vm8672_vm0, %v21339_v10 }
 0x4d5   : > { %18392 = vmatprep.subr.msk.mxu0 %vm8672_vm0, %v20802_v22  ;;  %9610 = vmatprep.mubr.f32.mxu1 %v22844_v62 }
 0x4d6   : > { %11428 = vmatprep.mubr.f32.mxu0 %v22844_v62  ;;  %v10536_v35 = vpop.permute.xlu0 %10535  ;;  %17524 = vmatmul.mubr.msk.f32.gmra.mrb[56].mxu1 %vm8665_vm1, %v20955_v59  ;;  %v21360_v16 = vpop.permute.xlu1 %12371  ;;  %v21377_v59 = vsel %vm3722_vm12, %v20983_v45, %v9986_v33  ;;  %v21413_v33 = vld [vmem:[%s22785_s3 + $0xb0] sm:$0xff] }
 0x4d7   : > { %17610 = vmatmul.mubr.msk.f32.vlgmr.msra.gmra.mrb[4].mxu0 %vm8665_vm1, %v21352_v63  ;;  %9877 = vmatprep.mubr.f32.mxu1 %v22844_v62 }
 0x4d8   : > { %18393 = vmatpush3.msk.msra.mxu0 %vm8672_vm0, %v20802_v22  ;;  %11434 = vmatprep.mubr.f32.mxu0 %v22844_v62  ;;  %v21385_v22 = vsel %vm4388_vm14, %v10261_v37, %v21109_v32 }
 0x4d9   : > { %17621 = vmatprep.subr.msk.mxu0 %vm8672_vm0, %v21120_v8 }
 0x4da   : > { %v10811_v54 = vpop.permute.xlu0 %10810  ;;  %17536 = vmatmul.mubr.msk.f32.vlgmr.msra.gmra.mrb[54].mxu1 %vm8665_vm1, %v20981_v43  ;;  %v21381_v44 = vpop.permute.xlu1 %12880 }
 0x4db   : > { %17548 = vmatpush1.msk.msra.mxu1 %vm8672_vm0, %v21377_v59  ;;  %17611 = vmatmul.mubr.msk.f32.gmra.mrb[6].mxu0 %vm8665_vm1, %v21371_v12 }
 0x4dc   : > { %17560 = vmatprep.subr.msk.mxu1 %vm8672_vm0, %v21385_v22  ;;  %9883 = vmatprep.mubr.f32.mxu1 %v22844_v62 }
 0x4dd   : > { %18394 = vmatprep.mubr.msk.f32.mxu0 %vm8665_vm1, %v21352_v63 }
 0x4de   : > { %v21396_v43 = vpop.permute.xlu0 %11086  ;;  %17537 = vmatmul.mubr.msk.f32.gmra.mrb[56].mxu1 %vm8665_vm1, %v21003_v52  ;;  %v13387_v45 = vpop.permute.xlu1 %13386  ;;  %v21419_v52 = vsel %vm4388_vm14, %v21089_v25, %v10261_v37 }
 0x4df   : > { %18395 = vmatmul.mubr.msk.f32.vlgmr.msra.gmra.mrb[8].mxu0 %vm8665_vm1, %v21371_v12  ;;  %v21404_v32 = vsel %vm10816_vm7, %v21221_v42, %v13387_v45  ;;  %10153 = vmatprep.mubr.f32.mxu1 %v22844_v62  ;;  %v21463_v45 = vsel %vm10816_vm7, %v10811_v54, %v21178_v61  ;;  %v21576_v61 = vsel %vm1064_vm3, %v20795_v20, %v21331_v27  ;;  %v15159_v20 = vld [vmem:[%s22786_s4] sm:$0xff] }
 0x4e0   : > { %17622 = vmatpush1.msk.msra.mxu0 %vm8672_vm0, %v20780_v6  ;;  %11683 = vmatprep.mubr.f32.mxu0 %v22844_v62  ;;  %v21427_v6 = vsel %vm5054_vm8, %v10536_v35, %v21144_v29  ;;  %v21457_v29 = vsel %vm5054_vm8, %v21093_v2, %v10536_v35  ;;  %v21480_v2 = vld [vmem:[%s22785_s3 + $0xc0] sm:$0xff] }
 0x4e1   : > { %18397 = vmatprep.subr.msk.mxu0 %vm8672_vm0, %v21331_v27  ;;  %15163 = vperm.xlu1 %19378, %v15159_v20   ;;  %v17736_v35 = vld [vmem:[%s22785_s3 + $0x140] sm:$0xff] }
 0x4e2   : > { %v21421_v42 = vpop.permute.xlu0 %12627  ;;  %17549 = vmatmul.mubr.msk.f32.vlgmr.msra.gmra.mrb[54].mxu1 %vm8665_vm1, %v21027_v57  ;;  %v21440_v57 = vld [vmem:[%s22785_s3 + $0xb8] sm:$0xff] }
 0x4e3   : > { %17561 = vmatpush1.msk.msra.mxu1 %vm8672_vm0, %v21419_v52  ;;  %17623 = vmatmul.mubr.msk.f32.vlgmr.msra.gmra.mrb[4].mxu0 %vm8665_vm1, %v21413_v33 }
 0x4e4   : > { %18398 = vmatpush3.msk.msra.mxu0 %vm8672_vm0, %v21331_v27  ;;  %17573 = vmatprep.subr.msk.mxu1 %vm8672_vm0, %v21427_v6 }
 0x4e5   : > { %17634 = vmatprep.subr.msk.mxu0 %vm8672_vm0, %v21259_v56  ;;  %10159 = vmatprep.mubr.f32.mxu1 %v22844_v62 }
 0x4e6   : > { %11689 = vmatprep.mubr.f32.mxu0 %v22844_v62  ;;  %v21446_v25 = vpop.permute.xlu0 %13133  ;;  %17550 = vmatmul.mubr.msk.f32.gmra.mrb[56].mxu1 %vm8665_vm1, %v21043_v9 }
 0x4e7   : > { %17624 = vmatmul.mubr.msk.f32.gmra.mrb[6].mxu0 %vm8665_vm1, %v21440_v57  ;;  %10428 = vmatprep.mubr.f32.mxu1 %v22844_v62 }
 0x4e8   : > { %18399 = vmatprep.mubr.msk.f32.mxu0 %vm8665_vm1, %v21413_v33 }
 0x4ea   : > { %v13640_v37 = vpop.permute.xlu0 %13639  ;;  %17562 = vmatmul.mubr.msk.f32.vlgmr.msra.gmra.mrb[54].mxu1 %vm8665_vm1, %v21103_v4  ;;  %v21503_v4 = vsel %vm10816_vm7, %v21161_v50, %v10811_v54  ;;  %v21532_v50 = vld [vmem:[%s22785_s3 + $0xd0] sm:$0xff]  ;;  %v17737_v54 = vld [vmem:[%s22785_s3 + $0x148] sm:$0xff] }
 0x4eb   : > { %v21467_v9 = vsel %vm11092_vm9, %v21284_v51, %v13640_v37  ;;  %17574 = vmatpush1.msk.msra.mxu1 %vm8672_vm0, %v21457_v29  ;;  %18400 = vmatmul.mubr.msk.f32.vlgmr.msra.gmra.mrb[8].mxu0 %vm8665_vm1, %v21440_v57  ;;  %v22850_v51 = vld [vmem:[#allocation12_spill] sm:$0xff] }
 0x4ec   : > { %17635 = vmatpush1.msk.msra.mxu0 %vm8672_vm0, %v20851_v41  ;;  %17586 = vmatprep.subr.msk.mxu1 %vm8672_vm0, %v21463_v45  ;;  %v21497_v41 = vld [vmem:[%s22785_s3 + $0xc8] sm:$0xff] }
 0x4ed   : > { %18402 = vmatprep.subr.msk.mxu0 %vm8672_vm0, %v21314_v3  ;;  %10434 = vmatprep.mubr.f32.mxu1 %v22844_v62 }
 0x4ee   : > { %11938 = vmatprep.mubr.f32.mxu0 %v22844_v62  ;;  %17563 = vmatmul.mubr.msk.f32.gmra.mrb[56].mxu1 %vm8665_vm1, %v21130_v21  ;;  %v21510_v21 = vsel %vm11092_vm9, %v21396_v43, %v21225_v13  ;;  %v17671_v13 = vld [vmem:[%s22785_s3 + $0xf0] sm:$0xff] }
 0x4ef   : > { %17636 = vmatmul.mubr.msk.f32.vlgmr.msra.gmra.mrb[4].mxu0 %vm8665_vm1, %v21480_v2  ;;  %10703 = vmatprep.mubr.f32.mxu1 %v22844_v62 }
 0x4f0   : > { %18403 = vmatpush3.msk.msra.mxu0 %vm8672_vm0, %v21314_v3  ;;  %11944 = vmatprep.mubr.f32.mxu0 %v22844_v62 }
 0x4f1   : > { %17647 = vmatprep.subr.msk.mxu0 %vm8672_vm0, %v21282_v53 }
 0x4f2   : > { %17575 = vmatmul.mubr.msk.f32.vlgmr.msra.gmra.mrb[54].mxu1 %vm8665_vm1, %v21168_v15  ;;  %v21539_v15 = vsel %vm11092_vm9, %v21242_v7, %v21396_v43  ;;  %v17684_v7 = vld [vmem:[%s22785_s3 + $0x100] sm:$0xff] }
 0x4f3   : > { %17587 = vmatpush1.msk.msra.mxu1 %vm8672_vm0, %v21503_v4  ;;  %17637 = vmatmul.mubr.msk.f32.gmra.mrb[6].mxu0 %vm8665_vm1, %v21497_v41 }
 0x4f4   : > { %17599 = vmatprep.subr.msk.mxu1 %vm8672_vm0, %v21510_v21  ;;  %10709 = vmatprep.mubr.f32.mxu1 %v22844_v62 }
 0x4f5   : > { %18404 = vmatprep.mubr.msk.f32.mxu0 %vm8665_vm1, %v21480_v2 }
 0x4f6   : > { %17576 = vmatmul.mubr.msk.f32.gmra.mrb[56].mxu1 %vm8665_vm1, %v21189_v23  ;;  %v21585_v23 = vld [vmem:[%s22785_s3 + $0xe0] sm:$0xff] }
 0x4f7   : > { %18405 = vmatmul.mubr.msk.f32.vlgmr.msra.gmra.mrb[8].mxu0 %vm8665_vm1, %v21497_v41  ;;  %10979 = vmatprep.mubr.f32.mxu1 %v22844_v62 }
 0x4f8   : > { %17648 = vmatpush1.msk.msra.mxu0 %vm8672_vm0, %v20899_v26  ;;  %12193 = vmatprep.mubr.f32.mxu0 %v22844_v62  ;;  %v21554_v26 = vld [vmem:[%s22785_s3 + $0xd8] sm:$0xff] }
 0x4f9   : > { %18407 = vmatprep.subr.msk.mxu0 %vm8672_vm0, %v21335_v46 }
 0x4fa   : > { %17588 = vmatmul.mubr.msk.f32.vlgmr.msra.gmra.mrb[54].mxu1 %vm8665_vm1, %v21218_v11  ;;  %v21618_v11 = vsel %vm1724_vm6, %v20867_v48, %v21314_v3  ;;  %v12629_v48 = vsel %vm3722_vm12, %v21076_v17, %v21421_v42  ;;  %v17672_v17 = vld [vmem:[%s22785_s3 + $0xf8] sm:$0xff] }
 0x4fb   : > { %17600 = vmatpush1.msk.msra.mxu1 %vm8672_vm0, %v21539_v15  ;;  %17649 = vmatmul.mubr.msk.f32.vlgmr.msra.gmra.mrb[4].mxu0 %vm8665_vm1, %v21532_v50 }
 0x4fc   : > { %18408 = vmatpush3.msk.msra.mxu0 %vm8672_vm0, %v21335_v46  ;;  %17612 = vmatprep.subr.msk.mxu1 %vm8672_vm0, %v20734_v34 }
 0x4fd   : > { %17660 = vmatprep.subr.msk.mxu0 %vm8672_vm0, %v21329_v55  ;;  %10985 = vmatprep.mubr.f32.mxu1 %v22844_v62 }
 0x4fe   : > { %12199 = vmatprep.mubr.f32.mxu0 %v22844_v62  ;;  %17589 = vmatmul.mubr.msk.f32.gmra.mrb[56].mxu1 %vm8665_vm1, %v21236_v31  ;;  %v12882_v31 = vsel %vm4388_vm14, %v21078_v1, %v21381_v44  ;;  %v13135_v1 = vsel %vm5054_vm8, %v21174_v58, %v21446_v25  ;;  %v17710_v58 = vld [vmem:[%s22785_s3 + $0x120] sm:$0xff]  ;;  %v22849_v44 = vld [vmem:[#allocation11_spill] sm:$0xff]  ;;  %vm15621_vm8 = vcmask 203776  }
 0x4ff   : > { %17650 = vmatmul.mubr.msk.f32.gmra.mrb[6].mxu0 %vm8665_vm1, %v21554_v26  ;;  %11255 = vmatprep.mubr.f32.mxu1 %v22844_v62 }
 0x500   : > { %18409 = vmatprep.mubr.msk.f32.mxu0 %vm8665_vm1, %v21532_v50 }
 0x502   : > { %17601 = vmatmul.mubr.msk.f32.vlgmr.msra.gmra.mrb[54].mxu1 %vm8665_vm1, %v21272_v39  ;;  %v17723_v39 = vld [vmem:[%s22785_s3 + $0x130] sm:$0xff] }
 0x503   : > { %17613 = vmatpush1.msk.msra.mxu1 %vm8672_vm0, %v20829_v30  ;;  %18410 = vmatmul.mubr.msk.f32.vlgmr.msra.gmra.mrb[8].mxu0 %vm8665_vm1, %v21554_v26 }
 0x504   : > { %17661 = vmatpush1.msk.msra.mxu0 %vm8672_vm0, %v20947_v49  ;;  %17625 = vmatprep.subr.msk.mxu1 %vm8672_vm0, %v21576_v61  ;;  %v21605_v49 = vld [vmem:[%s22785_s3 + $0xe8] sm:$0xff] }
 0x505   : > { %18412 = vmatprep.subr.msk.mxu0 %vm8672_vm0, %v21360_v16  ;;  %11261 = vmatprep.mubr.f32.mxu1 %v22844_v62 }
 0x506   : > { %12448 = vmatprep.mubr.f32.mxu0 %v22844_v62  ;;  %17602 = vmatmul.mubr.msk.f32.gmra.mrb[56].mxu1 %vm8665_vm1, %v21305_v18  ;;  %v17724_v18 = vld [vmem:[%s22785_s3 + $0x138] sm:$0xff] }
 0x507   : > { %17662 = vmatmul.mubr.msk.f32.vlgmr.msra.gmra.mrb[4].mxu0 %vm8665_vm1, %v21585_v23  ;;  %11505 = vmatprep.mubr.f32.mxu1 %v22844_v62 }
 0x508   : > { %18413 = vmatpush3.msk.msra.mxu0 %vm8672_vm0, %v21360_v16  ;;  %12454 = vmatprep.mubr.f32.mxu0 %v22844_v62 }
 0x509   : > { %17673 = vmatprep.subr.msk.mxu0 %vm8672_vm0, %v21377_v59  ;;  %v14143_v59 = vpop.permute.xlu1 %14142 }
 0x50a   : > { %17614 = vmatmul.mubr.msk.f32.vlgmr.msra.gmra.mrb[54].mxu1 %vm8665_vm1, %v21352_v63  ;;  %v22852_v63 = vld [vmem:[#allocation6_spill] sm:$0xff]  ;;  %v14144_v43 = vsel %vm1064_vm3, %v21331_v27, %v14143_v59 }
 0x50b   : > { %17626 = vmatpush1.msk.msra.mxu1 %vm8672_vm0, %v21124_v19  ;;  %17663 = vmatmul.mubr.msk.f32.gmra.mrb[6].mxu0 %vm8665_vm1, %v21605_v49  ;;  %v17749_v27 = vld [vmem:[%s22785_s3 + $0x150] sm:$0xff] }
 0x50c   : > { %17638 = vmatprep.subr.msk.mxu1 %vm8672_vm0, %v21618_v11  ;;  %11511 = vmatprep.mubr.f32.mxu1 %v22844_v62 }
 0x50d   : > { %18414 = vmatprep.mubr.msk.f32.mxu0 %vm8665_vm1, %v21585_v23 }
 0x50e   : > { %17615 = vmatmul.mubr.msk.f32.gmra.mrb[56].mxu1 %vm8665_vm1, %v21371_v12  ;;  %v22853_v12 = vld [vmem:[#allocation7_spill] sm:$0xff] }
 0x50f   : > { %18415 = vmatmul.mubr.msk.f32.vlgmr.msra.gmra.mrb[8].mxu0 %vm8665_vm1, %v21605_v49  ;;  %11760 = vmatprep.mubr.f32.mxu1 %v22844_v62 }
 0x510   : > { %17674 = vmatpush1.msk.msra.mxu0 %vm8672_vm0, %v20995_v47  ;;  %12702 = vmatprep.mubr.f32.mxu0 %v22844_v62  ;;  %v21648_v47 = vsel %vm9442_vm2, %v20915_v60, %v21335_v46  ;;  %v21673_v60 = vsel %vm9715_vm5, %v20963_v38, %v21360_v16  ;;  %v17685_v38 = vld [vmem:[%s22785_s3 + $0x108] sm:$0xff] }
 0x511   : > { %18417 = vmatprep.subr.msk.mxu0 %vm8672_vm0, %v12629_v48 }
 0x512   : > { %17627 = vmatmul.mubr.msk.f32.vlgmr.msra.gmra.mrb[54].mxu1 %vm8665_vm1, %v21413_v33 }
 0x513   : > { %17639 = vmatpush1.msk.msra.mxu1 %vm8672_vm0, %v21263_v0  ;;  %17675 = vmatmul.mubr.msk.f32.vlgmr.msra.gmra.mrb[4].mxu0 %vm8665_vm1, %v17671_v13 }
 0x514   : > { %18418 = vmatpush3.msk.msra.mxu0 %vm8672_vm0, %v12629_v48  ;;  %17651 = vmatprep.subr.msk.mxu1 %vm8672_vm0, %v21648_v47 }
 0x515   : > { %17686 = vmatprep.subr.msk.mxu0 %vm8672_vm0, %v21419_v52  ;;  %11766 = vmatprep.mubr.f32.mxu1 %v22844_v62 }
 0x516   : > { %12708 = vmatprep.mubr.f32.mxu0 %v22844_v62  ;;  %17628 = vmatmul.mubr.msk.f32.gmra.mrb[56].mxu1 %vm8665_vm1, %v21440_v57 }
 0x517   : > { %17676 = vmatmul.mubr.msk.f32.gmra.mrb[6].mxu0 %vm8665_vm1, %v17672_v17  ;;  %12015 = vmatprep.mubr.f32.mxu1 %v22844_v62 }
 0x518   : > { %18419 = vmatprep.mubr.msk.f32.mxu0 %vm8665_vm1, %v17671_v13 }
 0x51a   : > { %17640 = vmatmul.mubr.msk.f32.vlgmr.msra.gmra.mrb[54].mxu1 %vm8665_vm1, %v21480_v2 }
 0x51b   : > { %17652 = vmatpush1.msk.msra.mxu1 %vm8672_vm0, %v21276_v40  ;;  %18420 = vmatmul.mubr.msk.f32.vlgmr.msra.gmra.mrb[8].mxu0 %vm8665_vm1, %v17672_v17 }
 0x51c   : > { %17687 = vmatpush1.msk.msra.mxu0 %vm8672_vm0, %v21097_v28  ;;  %17664 = vmatprep.subr.msk.mxu1 %vm8672_vm0, %v21673_v60  ;;  %v17698_v28 = vld [vmem:[%s22785_s3 + $0x118] sm:$0xff] }
 0x51d   : > { %18422 = vmatprep.subr.msk.mxu0 %vm8672_vm0, %v12882_v31  ;;  %12021 = vmatprep.mubr.f32.mxu1 %v22844_v62 }
 0x51e   : > { %12955 = vmatprep.mubr.f32.mxu0 %v22844_v62  ;;  %17641 = vmatmul.mubr.msk.f32.gmra.mrb[56].mxu1 %vm8665_vm1, %v21497_v41 }
 0x51f   : > { %17688 = vmatmul.mubr.msk.f32.vlgmr.msra.gmra.mrb[4].mxu0 %vm8665_vm1, %v17684_v7  ;;  %12270 = vmatprep.mubr.f32.mxu1 %v22844_v62 }
 0x520   : > { %18423 = vmatpush3.msk.msra.mxu0 %vm8672_vm0, %v12882_v31  ;;  %12961 = vmatprep.mubr.f32.mxu0 %v22844_v62 }
 0x521   : > { %17699 = vmatprep.subr.msk.mxu0 %vm8672_vm0, %v21457_v29 }
 0x522   : > { %17653 = vmatmul.mubr.msk.f32.vlgmr.msra.gmra.mrb[54].mxu1 %vm8665_vm1, %v21532_v50 }
 0x523   : > { %17665 = vmatpush1.msk.msra.mxu1 %vm8672_vm0, %v21318_v14  ;;  %17689 = vmatmul.mubr.msk.f32.gmra.mrb[6].mxu0 %vm8665_vm1, %v17685_v38 }
 0x524   : > { %17677 = vmatprep.subr.msk.mxu1 %vm8672_vm0, %v21083_v24  ;;  %12276 = vmatprep.mubr.f32.mxu1 %v22844_v62  ;;  %v17697_v24 = vld [vmem:[%s22785_s3 + $0x110] sm:$0xff] }
 0x525   : > { %18424 = vmatprep.mubr.msk.f32.mxu0 %vm8665_vm1, %v17684_v7 }
 0x526   : > { %17654 = vmatmul.mubr.msk.f32.gmra.mrb[56].mxu1 %vm8665_vm1, %v21554_v26 }
 0x527   : > { %18425 = vmatmul.mubr.msk.f32.vlgmr.msra.gmra.mrb[8].mxu0 %vm8665_vm1, %v17685_v38  ;;  %12525 = vmatprep.mubr.f32.mxu1 %v22844_v62 }
 0x528   : > { %17700 = vmatpush1.msk.msra.mxu0 %vm8672_vm0, %v21148_v36  ;;  %13208 = vmatprep.mubr.f32.mxu0 %v22844_v62  ;;  %v22847_v36 = vld [vmem:[#allocation8_spill] sm:$0xff] }
 0x529   : > { %18427 = vmatprep.subr.msk.mxu0 %vm8672_vm0, %v13135_v1 }
 0x52a   : > { %17666 = vmatmul.mubr.msk.f32.vlgmr.msra.gmra.mrb[54].mxu1 %vm8665_vm1, %v21585_v23 }
 0x52b   : > { %17678 = vmatpush1.msk.msra.mxu1 %vm8672_vm0, %v21339_v10  ;;  %17701 = vmatmul.mubr.msk.f32.vlgmr.msra.gmra.mrb[4].mxu0 %vm8665_vm1, %v17697_v24  ;;  %v22848_v10 = vld [vmem:[#allocation10_spill] sm:$0xff] }
 0x52c   : > { %18428 = vmatpush3.msk.msra.mxu0 %vm8672_vm0, %v13135_v1  ;;  %17690 = vmatprep.subr.msk.mxu1 %vm8672_vm0, %v21116_v5  ;;  %v22846_v5 = vld [vmem:[#allocation9_spill] sm:$0xff] }
 0x52d   : > { %17712 = vmatprep.subr.msk.mxu0 %vm8672_vm0, %v21503_v4  ;;  %12531 = vmatprep.mubr.f32.mxu1 %v22844_v62 }
 0x52e   : > { %13214 = vmatprep.mubr.f32.mxu0 %v22844_v62  ;;  %17667 = vmatmul.mubr.msk.f32.gmra.mrb[56].mxu1 %vm8665_vm1, %v21605_v49 }
 0x52f   : > { %17702 = vmatmul.mubr.msk.f32.gmra.mrb[6].mxu0 %vm8665_vm1, %v17698_v28  ;;  %12779 = vmatprep.mubr.f32.mxu1 %v22844_v62 }
 0x530   : > { %18429 = vmatprep.mubr.msk.f32.mxu0 %vm8665_vm1, %v17697_v24 }
 0x532   : > { %17679 = vmatmul.mubr.msk.f32.vlgmr.msra.gmra.mrb[54].mxu1 %vm8665_vm1, %v17671_v13 }
 0x533   : > { %17691 = vmatpush1.msk.msra.mxu1 %vm8672_vm0, %v21385_v22  ;;  %18430 = vmatmul.mubr.msk.f32.vlgmr.msra.gmra.mrb[8].mxu0 %vm8665_vm1, %v17698_v28  ;;  %v17711_v22 = vld [vmem:[%s22785_s3 + $0x128] sm:$0xff] }
 0x534   : > { %17713 = vmatpush1.msk.msra.mxu0 %vm8672_vm0, %v22846_v5  ;;  %17703 = vmatprep.subr.msk.mxu1 %vm8672_vm0, %v22847_v36 }
 0x535   : > { %18432 = vmatprep.subr.msk.mxu0 %vm8672_vm0, %v21404_v32  ;;  %12785 = vmatprep.mubr.f32.mxu1 %v22844_v62 }
 0x536   : > { %13461 = vmatprep.mubr.f32.mxu0 %v22844_v62  ;;  %17680 = vmatmul.mubr.msk.f32.gmra.mrb[56].mxu1 %vm8665_vm1, %v17672_v17 }
 0x537   : > { %17714 = vmatmul.mubr.msk.f32.vlgmr.msra.gmra.mrb[4].mxu0 %vm8665_vm1, %v17710_v58  ;;  %13032 = vmatprep.mubr.f32.mxu1 %v22844_v62 }
 0x538   : > { %18433 = vmatpush3.msk.msra.mxu0 %vm8672_vm0, %v21404_v32  ;;  %13467 = vmatprep.mubr.f32.mxu0 %v22844_v62  ;;  %v17762_v32 = vld [vmem:[%s22785_s3 + $0x160] sm:$0xff] }
 0x539   : > { %17725 = vmatprep.subr.msk.mxu0 %vm8672_vm0, %v21539_v15 }
 0x53a   : > { %17692 = vmatmul.mubr.msk.f32.vlgmr.msra.gmra.mrb[54].mxu1 %vm8665_vm1, %v17684_v7 }
 0x53b   : > { %17704 = vmatpush1.msk.msra.mxu1 %vm8672_vm0, %v21427_v6  ;;  %17715 = vmatmul.mubr.msk.f32.gmra.mrb[6].mxu0 %vm8665_vm1, %v17711_v22 }
 0x53c   : > { %17716 = vmatprep.subr.msk.mxu1 %vm8672_vm0, %v22848_v10  ;;  %13038 = vmatprep.mubr.f32.mxu1 %v22844_v62  ;;  %v15324_v10 = vld [vmem:[%s22787_s5 + $0x88] sm:$0xff] }
 0x53d   : > { %18434 = vmatprep.mubr.msk.f32.mxu0 %vm8665_vm1, %v17710_v58 }
 0x53e   : > { %17693 = vmatmul.mubr.msk.f32.gmra.mrb[56].mxu1 %vm8665_vm1, %v17685_v38 }
 0x53f   : > { %18435 = vmatmul.mubr.msk.f32.vlgmr.msra.gmra.mrb[8].mxu0 %vm8665_vm1, %v17711_v22  ;;  %13285 = vmatprep.mubr.f32.mxu1 %v22844_v62 }
 0x540   : > { %17726 = vmatpush1.msk.msra.mxu0 %vm8672_vm0, %v22849_v44  ;;  %13714 = vmatprep.mubr.f32.mxu0 %v22844_v62  ;;  %v15307_v44 = vld [vmem:[%s22787_s5] sm:$0xff] }
 0x541   : > { %18437 = vmatprep.subr.msk.mxu0 %vm8672_vm0, %v21467_v9 }
 0x542   : > { %17705 = vmatmul.mubr.msk.f32.vlgmr.msra.gmra.mrb[54].mxu1 %vm8665_vm1, %v17697_v24 }
 0x543   : > { %17717 = vmatpush1.msk.msra.mxu1 %vm8672_vm0, %v21463_v45  ;;  %17727 = vmatmul.mubr.msk.f32.vlgmr.msra.gmra.mrb[4].mxu0 %vm8665_vm1, %v17723_v39 }
 0x544   : > { %18438 = vmatpush3.msk.msra.mxu0 %vm8672_vm0, %v21467_v9  ;;  %17729 = vmatprep.subr.msk.mxu1 %vm8672_vm0, %v22850_v51  ;;  %v15308_v51 = vld [vmem:[%s22787_s5 + $0x8] sm:$0xff] }
 0x545   : > { %17738 = vmatprep.subr.msk.mxu0 %vm8672_vm0, %v20829_v30  ;;  %13291 = vmatprep.mubr.f32.mxu1 %v22844_v62  ;;  %v22851_v30 = vld [vmem:[#allocation5_spill] sm:$0xff] }
 0x546   : > { %13720 = vmatprep.mubr.f32.mxu0 %v22844_v62  ;;  %17706 = vmatmul.mubr.msk.f32.gmra.mrb[56].mxu1 %vm8665_vm1, %v17698_v28 }
 0x547   : > { %17728 = vmatmul.mubr.msk.f32.gmra.mrb[6].mxu0 %vm8665_vm1, %v17724_v18  ;;  %13538 = vmatprep.mubr.f32.mxu1 %v22844_v62 }
 0x548   : > { %18439 = vmatprep.mubr.msk.f32.mxu0 %vm8665_vm1, %v17723_v39 }
 0x54a   : > { %17718 = vmatmul.mubr.msk.f32.vlgmr.msra.gmra.mrb[54].mxu1 %vm8665_vm1, %v17710_v58 }
 0x54b   : > { %17730 = vmatpush1.msk.msra.mxu1 %vm8672_vm0, %v21510_v21  ;;  %18440 = vmatmul.mubr.msk.f32.vlgmr.msra.gmra.mrb[8].mxu0 %vm8665_vm1, %v17724_v18 }
 0x54c   : > { %17739 = vmatpush1.msk.msra.mxu0 %vm8672_vm0, %v22851_v30  ;;  %17742 = vmatprep.subr.msk.mxu1 %vm8672_vm0, %v22852_v63  ;;  %v15326_v30 = vld [vmem:[%s22787_s5 + $0x98] sm:$0xff]  ;;  %v18712_v63 = vpack.c.bf16 %v15308_v51, %v15307_v44  ;;  %v15321_v44 = vld [vmem:[%s22787_s5 + $0x70] sm:$0xff] }
 0x54d   : > { %18442 = vmatprep.subr.msk.mxu0 %vm8672_vm0, %v22853_v12  ;;  %13544 = vmatprep.mubr.f32.mxu1 %v22844_v62 }
 0x54e   : > { %13964 = vmatprep.mubr.f32.mxu0 %v22844_v62  ;;  %17719 = vmatmul.mubr.msk.f32.gmra.mrb[56].mxu1 %vm8665_vm1, %v17711_v22  ;;  %v15323_v22 = vld [vmem:[%s22787_s5 + $0x80] sm:$0xff] }
 0x54f   : > { %17740 = vmatmul.mubr.msk.f32.vlgmr.msra.gmra.mrb[4].mxu0 %vm8665_vm1, %v17736_v35  ;;  %13791 = vmatprep.mubr.f32.mxu1 %v22844_v62 }
 0x550   : > { %18443 = vmatpush3.msk.msra.mxu0 %vm8672_vm0, %v22853_v12  ;;  %13970 = vmatprep.mubr.f32.mxu0 %v22844_v62  ;;  %v15309_v12 = vld [vmem:[%s22787_s5 + $0x10] sm:$0xff] }
 0x551   : > { %17751 = vmatprep.subr.msk.mxu0 %vm8672_vm0, %v21124_v19  ;;  %v14398_v19 = vpop.permute.xlu0 %14397 }
 0x552   : > { %17731 = vmatmul.mubr.msk.f32.vlgmr.msra.gmra.mrb[54].mxu1 %vm8665_vm1, %v17723_v39  ;;  %v18710_v39 = vpack.c.bf16 %v15324_v10, %v15323_v22  ;;  %v15338_v22 = vld [vmem:[%s22787_s5 + $0xf8] sm:$0xff] }
 0x553   : > { %17741 = vmatmul.mubr.msk.f32.gmra.mrb[6].mxu0 %vm8665_vm1, %v17737_v54  ;;  %17743 = vmatpush1.msk.msra.mxu1 %vm8672_vm0, %v20734_v34  ;;  %v14399_v34 = vsel %vm1724_vm6, %v21314_v3, %v14398_v19  ;;  %v14653_v3 = vpop.permute.xlu1 %14652  ;;  %vm15374_vm6 = vcmask 138240  }
 0x554   : > { %17755 = vmatprep.subr.msk.mxu1 %vm8672_vm0, %v14144_v43  ;;  %13797 = vmatprep.mubr.f32.mxu1 %v22844_v62  ;;  %v15328_v43 = vld [vmem:[%s22787_s5 + $0xa8] sm:$0xff] }
 0x555   : > { %18444 = vmatprep.mubr.msk.f32.mxu0 %vm8665_vm1, %v17736_v35 }
 0x556   : > { %17732 = vmatmul.mubr.msk.f32.gmra.mrb[56].mxu1 %vm8665_vm1, %v17724_v18  ;;  %v15325_v18 = vld [vmem:[%s22787_s5 + $0x90] sm:$0xff] }
 0x557   : > { %18445 = vmatmul.mubr.msk.f32.vlgmr.msra.gmra.mrb[8].mxu0 %vm8665_vm1, %v17737_v54  ;;  %14041 = vmatprep.mubr.f32.mxu1 %v22844_v62 }
 0x558   : > { %17752 = vmatpush1.msk.msra.mxu0 %vm8672_vm0, %v21120_v8  ;;  %14219 = vmatprep.mubr.f32.mxu0 %v22844_v62  ;;  %v17750_v8 = vld [vmem:[%s22785_s3 + $0x158] sm:$0xff] }
 0x559   : > { %18447 = vmatprep.subr.msk.mxu0 %vm8672_vm0, %v14143_v59 }
 0x55a   : > { %17744 = vmatmul.mubr.msk.f32.vlgmr.msra.gmra.mrb[54].mxu1 %vm8665_vm1, %v17736_v35  ;;  %v18714_v35 = vpack.c.bf16 %v15326_v30, %v15325_v18  ;;  %v15355_v18 = vld [vmem:[%s22787_s5 + $0x180] sm:$0xff]  ;;  %v15356_v30 = vld [vmem:[%s22787_s5 + $0x188] sm:$0xff] }
 0x55b   : > { %17753 = vmatmul.mubr.msk.f32.vlgmr.msra.gmra.mrb[4].mxu0 %vm8665_vm1, %v17749_v27  ;;  %17756 = vmatpush1.msk.msra.mxu1 %vm8672_vm0, %v21576_v61 }
 0x55c   : > { %18448 = vmatpush3.msk.msra.mxu0 %vm8672_vm0, %v14143_v59  ;;  %17768 = vmatprep.subr.msk.mxu1 %vm8672_vm0, %v14399_v34  ;;  %v15310_v59 = vld [vmem:[%s22787_s5 + $0x18] sm:$0xff]  ;;  %v15311_v34 = vld [vmem:[%s22787_s5 + $0x20] sm:$0xff] }
 0x55d   : > { %17764 = vmatprep.subr.msk.mxu0 %vm8672_vm0, %v21263_v0  ;;  %14047 = vmatprep.mubr.f32.mxu1 %v22844_v62  ;;  %v14654_v0 = vsel %vm9442_vm2, %v21335_v46, %v14653_v3  ;;  %v14908_v46 = vpop.permute.xlu0 %14907 }
 0x55e   : > { %14225 = vmatprep.mubr.f32.mxu0 %v22844_v62  ;;  %17745 = vmatmul.mubr.msk.f32.gmra.mrb[56].mxu1 %vm8665_vm1, %v17737_v54  ;;  %v14909_v33 = vsel %vm9715_vm5, %v21360_v16, %v14908_v46  ;;  %v17776_v16 = vld [vmem:[%s22785_s3 + $0x178] sm:$0xff]  ;;  %v15327_v54 = vld [vmem:[%s22787_s5 + $0xa0] sm:$0xff] }
 0x55f   : > { %17754 = vmatmul.mubr.msk.f32.gmra.mrb[6].mxu0 %vm8665_vm1, %v17750_v8  ;;  %14296 = vmatprep.mubr.f32.mxu1 %v22844_v62 }
 0x560   : > { %18449 = vmatprep.mubr.msk.f32.mxu0 %vm8665_vm1, %v17749_v27  ;;  %v15164_v52 = vpop.permute.xlu1 %15163 }
 0x561   : > { %v15169_v2 = vpop.permute.xlu0 %15168 }
 0x562   : > { %17757 = vmatmul.mubr.msk.f32.vlgmr.msra.gmra.mrb[54].mxu1 %vm8665_vm1, %v17749_v27  ;;  %v18718_v27 = vpack.c.bf16 %v15328_v43, %v15327_v54 }
 0x563   : > { %18450 = vmatmul.mubr.msk.f32.vlgmr.msra.gmra.mrb[8].mxu0 %vm8665_vm1, %v17750_v8  ;;  %17769 = vmatpush1.msk.msra.mxu1 %vm8672_vm0, %v21618_v11 }
 0x564   : > { %17765 = vmatpush1.msk.msra.mxu0 %vm8672_vm0, %v21259_v56  ;;  %17781 = vmatprep.subr.msk.mxu1 %vm8672_vm0, %v14654_v0  ;;  %v17763_v56 = vld [vmem:[%s22785_s3 + $0x168] sm:$0xff]  ;;  %v15330_v0 = vld [vmem:[%s22787_s5 + $0xb8] sm:$0xff] }
 0x565   : > { %18452 = vmatprep.subr.msk.mxu0 %vm8672_vm0, %v14398_v19  ;;  %14302 = vmatprep.mubr.f32.mxu1 %v22844_v62 }
 0x566   : > { %14474 = vmatprep.mubr.f32.mxu0 %v22844_v62  ;;  %17758 = vmatmul.mubr.msk.f32.gmra.mrb[56].mxu1 %vm8665_vm1, %v17750_v8  ;;  %v15312_v8 = vld [vmem:[%s22787_s5 + $0x28] sm:$0xff] }
 0x567   : > { %17766 = vmatmul.mubr.msk.f32.vlgmr.msra.gmra.mrb[4].mxu0 %vm8665_vm1, %v17762_v32  ;;  %14551 = vmatprep.mubr.f32.mxu1 %v22844_v62 }
 0x568   : > { %18453 = vmatpush3.msk.msra.mxu0 %vm8672_vm0, %v14398_v19  ;;  %14480 = vmatprep.mubr.f32.mxu0 %v22844_v62  ;;  %v18716_v19 = vpack.c.bf16 %v15310_v59, %v15309_v12 }
 0x569   : > { %17777 = vmatprep.subr.msk.mxu0 %vm8672_vm0, %v21276_v40  ;;  %v17775_v40 = vld [vmem:[%s22785_s3 + $0x170] sm:$0xff] }
 0x56a   : > { %17770 = vmatmul.mubr.msk.f32.vlgmr.msra.gmra.mrb[54].mxu1 %vm8665_vm1, %v17762_v32 }
 0x56b   : > { %17767 = vmatmul.mubr.msk.f32.gmra.mrb[6].mxu0 %vm8665_vm1, %v17763_v56  ;;  %17782 = vmatpush1.msk.msra.mxu1 %vm8672_vm0, %v21648_v47 }
 0x56c   : > { %17794 = vmatprep.subr.msk.mxu1 %vm8672_vm0, %v14909_v33  ;;  %14557 = vmatprep.mubr.f32.mxu1 %v22844_v62  ;;  %v15314_v33 = vld [vmem:[%s22787_s5 + $0x38] sm:$0xff] }
 0x56d   : > { %18454 = vmatprep.mubr.msk.f32.mxu0 %vm8665_vm1, %v17762_v32  ;;  %v18720_v32 = vpack.c.bf16 %v15312_v8, %v15311_v34 }
 0x56e   : > { %17771 = vmatmul.mubr.msk.f32.gmra.mrb[56].mxu1 %vm8665_vm1, %v17763_v56 }
 0x56f   : > { %18455 = vmatmul.mubr.msk.f32.vlgmr.msra.gmra.mrb[8].mxu0 %vm8665_vm1, %v17763_v56  ;;  %14806 = vmatprep.mubr.f32.mxu1 %v22844_v62  ;;  %v15313_v56 = vld [vmem:[%s22787_s5 + $0x30] sm:$0xff] }
 0x570   : > { %17778 = vmatpush1.msk.msra.mxu0 %vm8672_vm0, %v21282_v53  ;;  %14729 = vmatprep.mubr.f32.mxu0 %v22844_v62  ;;  %v17788_v53 = vld [vmem:[%s22785_s3 + $0x180] sm:$0xff] }
 0x571   : > { %18457 = vmatprep.subr.msk.mxu0 %vm8672_vm0, %v14653_v3 }
 0x572   : > { %17783 = vmatmul.mubr.msk.f32.vlgmr.msra.gmra.mrb[54].mxu1 %vm8665_vm1, %v17775_v40 }
 0x573   : > { %17779 = vmatmul.mubr.msk.f32.vlgmr.msra.gmra.mrb[4].mxu0 %vm8665_vm1, %v17775_v40  ;;  %17795 = vmatpush1.msk.msra.mxu1 %vm8672_vm0, %v21673_v60 }
 0x574   : > { %18458 = vmatpush3.msk.msra.mxu0 %vm8672_vm0, %v14653_v3  ;;  %14735 = vmatprep.mubr.f32.mxu0 %v22844_v62  ;;  %v15329_v3 = vld [vmem:[%s22787_s5 + $0xb0] sm:$0xff] }
 0x575   : > { %17790 = vmatprep.subr.msk.mxu0 %vm8672_vm0, %v21318_v14  ;;  %14812 = vmatprep.mubr.f32.mxu1 %v22844_v62  ;;  %v17789_v14 = vld [vmem:[%s22785_s3 + $0x188] sm:$0xff] }
 0x576   : > { %17784 = vmatmul.mubr.msk.f32.gmra.mrb[56].mxu1 %vm8665_vm1, %v17776_v16  ;;  %18711 = vmatprep.subr.bf16.mxu1 %v18710_v39  ;;  %v15322_v39 = vld [vmem:[%s22787_s5 + $0x78] sm:$0xff] }
 0x577   : > { %17780 = vmatmul.mubr.msk.f32.gmra.mrb[6].mxu0 %vm8665_vm1, %v17776_v16  ;;  %15061 = vmatprep.mubr.f32.mxu1 %v22844_v62  ;;  %v18740_v51 = vpack.c.bf16 %v15322_v39, %v15321_v44 }
 0x578   : > { %18459 = vmatprep.mubr.msk.f32.mxu0 %vm8665_vm1, %v17775_v40  ;;  %v15331_v40 = vld [vmem:[%s22787_s5 + $0xc0] sm:$0xff] }
 0x57a   : > { %17796 = vmatmul.mubr.msk.f32.vlgmr.msra.gmra.mrb[54].mxu1 %vm8665_vm1, %v17788_v53 }
 0x57b   : > { %18460 = vmatmul.mubr.msk.f32.vlgmr.msra.gmra.mrb[8].mxu0 %vm8665_vm1, %v17776_v16  ;;  %15067 = vmatprep.mubr.f32.mxu1 %v22844_v62  ;;  %v15332_v16 = vld [vmem:[%s22787_s5 + $0xc8] sm:$0xff] }
 0x57c   : > { %17791 = vmatpush1.msk.msra.mxu0 %vm8672_vm0, %v21329_v55  ;;  %14984 = vmatprep.mubr.f32.mxu0 %v22844_v62 }
 0x57d   : > { %18462 = vmatprep.subr.msk.mxu0 %vm8672_vm0, %v14908_v46  ;;  %18713 = vmatpush3.bf16.msra.mxu1 %v18712_v63 }
 0x57e   : > { %17797 = vmatmul.mubr.msk.f32.gmra.mrb[56].mxu1 %vm8665_vm1, %v17789_v14  ;;  %18715 = vmatprep.subr.bf16.mxu1 %v18714_v35  ;;  %v18742_v35 = vpack.c.bf16 %v15356_v30, %v15355_v18 }
 0x57f   : > { %17792 = vmatmul.mubr.msk.f32.vlgmr.msra.gmra.mrb[4].mxu0 %vm8665_vm1, %v17788_v53 }
 0x580   : > { %18463 = vmatpush3.msk.msra.mxu0 %vm8672_vm0, %v14908_v46  ;;  %14990 = vmatprep.mubr.f32.mxu0 %v22844_v62  ;;  %v18722_v46 = vpack.c.bf16 %v15330_v0, %v15329_v3 }
 0x581   : > { %18717 = vmatpush3.bf16.msra.mxu1 %v18716_v19 }
 0x582   : > { %18719 = vmatprep.subr.bf16.mxu1 %v18718_v27 }
 0x583   : > { %17793 = vmatmul.mubr.msk.f32.gmra.mrb[6].mxu0 %vm8665_vm1, %v17789_v14 }
 0x584   : > { %18464 = vmatprep.mubr.msk.f32.mxu0 %vm8665_vm1, %v17788_v53  ;;  %v18724_v53 = vpack.c.bf16 %v15314_v33, %v15313_v56 }
 0x585   : > { %18721 = vmatpush3.bf16.msra.mxu1 %v18720_v32 }
 0x586   : > { %18723 = vmatprep.subr.bf16.mxu1 %v18722_v46 }
 0x587   : > { %18465 = vmatmul.mubr.msk.f32.vlgmr.msra.gmra.mrb[8].mxu0 %vm8665_vm1, %v17789_v14  ;;  %v18726_v14 = vpack.c.bf16 %v15332_v16, %v15331_v40 }
 0x588   : > { %18528 = vmatprep.mubr.msk.f32.mxu0 %vm19496_vm4, %v22844_v62 }
 0x589   : > { %18725 = vmatpush3.bf16.msra.mxu1 %v18724_v53 }
 0x58a   : > { %18727 = vmatprep.subr.bf16.mxu1 %v18726_v14 }
 0x64d   : > { %v15063_v55 = vpop.f32.mrb[54].mxu1 }
 0x64e   : > { %v15065_v42 = vpop.f32.mrb[55].mxu1  ;;  %v21954_v29 = vadd.f32 %v15164_v52, %v15063_v55  ;;  %v15315_v55 = vld [vmem:[%s22787_s5 + $0x40] sm:$0xff] }
 0x64f   : > { %v21952_v6 = vadd.f32 %v15164_v52, %v15065_v42  ;;  %v15333_v42 = vld [vmem:[%s22787_s5 + $0xd0] sm:$0xff] }
 0x650   : > { %v15183_v61 = vmax.f32 %v21954_v29, 0.0 }
 0x651   : > { %v15069_v57 = vpop.f32.mrb[56].mxu1  ;;  %v15184_v4 = vmax.f32 %v21952_v6, 0.0 }
 0x652   : > { %v14986_v25 = vpop.f32.mrb[4].mxu0  ;;  %v15071_v37 = vpop.f32.mrb[57].mxu1  ;;  %v21964_v15 = vadd.f32 %v15169_v2, %v15069_v57  ;;  %v15334_v57 = vld [vmem:[%s22787_s5 + $0xd8] sm:$0xff] }
 0x653   : > { %v21956_v45 = vadd.f32 %v15164_v52, %v14986_v25  ;;  %v14988_v9 = vpop.f32.mrb[5].mxu0  ;;  %v21962_v50 = vadd.f32 %v15169_v2, %v15071_v37  ;;  %v18730_v37 = vpack.c.bf16 %v15334_v57, %v15333_v42 }
 0x654   : > { %v21958_v41 = vadd.f32 %v15164_v52, %v14988_v9  ;;  %v15188_v60 = vmax.f32 %v21964_v15, 0.0  ;;  %v15317_v9 = vld [vmem:[%s22787_s5 + $0x50] sm:$0xff] }
 0x655   : > { %v15181_v21 = vmax.f32 %v21956_v45, 0.0  ;;  %v15189_v47 = vmax.f32 %v21962_v50, 0.0 }
 0x656   : > { %v15182_v26 = vmax.f32 %v21958_v41, 0.0  ;;  %v14992_v23 = vpop.f32.mrb[6].mxu0 }
 0x657   : > { %v19384_v20 = vpack.i.bf16 %v15181_v21, %v15184_v4  ;;  %v21972_v49 = vadd.f32 %v15169_v2, %v14992_v23  ;;  %v14994_v11 = vpop.f32.mrb[7].mxu0  ;;  %v15335_v23 = vld [vmem:[%s22787_s5 + $0xe0] sm:$0xff] }
 0x658   : > { %v19379_v48 = vpack.i.bf16 %v15183_v61, %v15182_v26  ;;  %v21978_v13 = vadd.f32 %v15169_v2, %v14994_v11 }
 0x659   : > { %v15186_v17 = vmax.f32 %v21972_v49, 0.0  ;;  %19385 = vrot.lane.b32.xlu0 %v19384_v20, %s22834_s19  ;;  %v15336_v20 = vld [vmem:[%s22787_s5 + $0xe8] sm:$0xff] }
 0x65a   : > { %v15187_v31 = vmax.f32 %v21978_v13, 0.0  ;;  %v18466_v7 = vpop.f32.mrb[8].mxu0  ;;  %19380 = vrot.lane.b32.xlu1 %v19379_v48, %s22834_s19  ;;  %v18734_v48 = vpack.c.bf16 %v15336_v20, %v15335_v23 }
 0x65b   : > { %v19389_v38 = vpack.i.bf16 %v15186_v17, %v15189_v47  ;;  %v21990_v1 = vadd.f32 %v18466_v7, %v15169_v2  ;;  %v15140_v24 = vpop.f32.mrb[9].mxu0  ;;  %v15318_v2 = vld [vmem:[%s22787_s5 + $0x58] sm:$0xff]  ;;  %v15319_v7 = vld [vmem:[%s22787_s5 + $0x60] sm:$0xff] }
 0x65c   : > { %v19394_v28 = vpack.i.bf16 %v15188_v60, %v15187_v31  ;;  %v21996_v5 = vadd.f32 %v15164_v52, %v15140_v24  ;;  %v15316_v52 = vld [vmem:[%s22787_s5 + $0x48] sm:$0xff]  ;;  %v18732_v11 = vpack.c.bf16 %v15318_v2, %v15317_v9 }
 0x65d   : > { %19390 = vrot.lane.b32.xlu0 %v19389_v38, %s22834_s19  ;;  %v15190_v36 = vmax.f32 %v21990_v1, 0.0  ;;  %v18728_v25 = vpack.c.bf16 %v15316_v52, %v15315_v55  ;;  %v15320_v38 = vld [vmem:[%s22787_s5 + $0x68] sm:$0xff] }
 0x65e   : > { %19395 = vrot.lane.b32.xlu1 %v19394_v28, %s22834_s19  ;;  %v15185_v58 = vmax.f32 %v21996_v5, 0.0  ;;  %v18736_v24 = vpack.c.bf16 %v15320_v38, %v15319_v7  ;;  %v15337_v28 = vld [vmem:[%s22787_s5 + $0xf0] sm:$0xff] }
 0x65f   : > { %18729 = vmatpush3.bf16.msra.mxu1 %v18728_v25  ;;  %v18738_v10 = vpack.c.bf16 %v15338_v22, %v15337_v28  ;;  %v15357_v5 = vld [vmem:[%s22787_s5 + $0x190] sm:$0xff]  ;;  %v15359_v22 = vld [vmem:[%s22787_s5 + $0x1a0] sm:$0xff] }
 0x660   : > { %18731 = vmatprep.subr.bf16.mxu1 %v18730_v37  ;;  %v15341_v38 = vld [vmem:[%s22787_s5 + $0x110] sm:$0xff] }
 0x661   : > { %15219 = vrot.lane.b32.xlu0 %v15190_v36, %s22834_s19 }
 0x662   : > { %15209 = vrot.lane.b32.xlu1 %v15185_v58, %s22834_s19  ;;  %s17118_s19 = sshll.u32 %s405_s17, 4  ;;  %s22742_s19 = int_to_ptr.vmem [resolvable:$true] %s17118_s19 }
 0x663   : > { %18733 = vmatpush3.bf16.msra.mxu1 %v18732_v11  ;;  %s19422_s0 = scalar_lea.vmem %s22742_s19, 16  ;;  %p19429_p0 = scmp.lt.s32.totalorder %s22742_s19, %s19427_s1 }
 0x664   : > { %18735 = vmatprep.subr.bf16.mxu1 %v18734_v48  ;;  %p19423_p11 = scmp.ne.s32.totalorder %s22742_s19, %s19422_s0  ;;  %p19430_p1 = scmp.lt.s32.totalorder %s19428_s15, %s19422_s0 }
 0x666   : > { %p19424_p12 = pnand %p19423_p11, %p19618_p5  ;;  %p19431_p2 = por %p19430_p1, %p19429_p0 }
 0x667   : > { %18737 = vmatpush3.bf16.msra.mxu1 %v18736_v24  ;;  %v15342_v24 = vld [vmem:[%s22787_s5 + $0x118] sm:$0xff] }
 0x668   : > { %18739 = vmatprep.subr.bf16.mxu1 %v18738_v10  ;;  %v15360_v10 = vld [vmem:[%s22787_s5 + $0x1a8] sm:$0xff]  ;;  %p19425_p13 = pneg %p19424_p12 }
 0x66a   : > { %p19432_p3 = pnand %p19431_p2, %p19425_p13 }
 0x66b   : > { %18741 = vmatpush3.bf16.msra.mxu1 %v18740_v51 }
 0x66c   : > { %18743 = vmatprep.subr.bf16.mxu1 %v18742_v35 }
 0x6cb   : > { %v19386_v63 = vpop.permute.xlu0 %19385 }
 0x6cc   : > { %v19388_v12 = vunpack.i.h.bf16 %v19386_v63  ;;  %v19387_v59 = vunpack.i.l.bf16 %v19386_v63  ;;  %v19381_v54 = vpop.permute.xlu1 %19380  ;;  %v18748_v63 = vpack.c.bf16 %v15342_v24, %v15341_v38 }
 0x6cd   : > { %v19383_v43 = vunpack.i.h.bf16 %v19381_v54  ;;  %v19382_v19 = vunpack.i.l.bf16 %v19381_v54  ;;  %v15343_v54 = vld [vmem:[%s22787_s5 + $0x120] sm:$0xff] }
 0x6cf   : > { %v15221_v27 = vsel %vm1064_vm3, %v19388_v12, %v19382_v19  ;;  %v15222_v34 = vsel %vm1064_vm3, %v19382_v19, %v19383_v43  ;;  %v15223_v8 = vsel %vm1064_vm3, %v19383_v43, %v19387_v59  ;;  %v19391_v3 = vpop.permute.xlu0 %19390  ;;  %v15344_v43 = vld [vmem:[%s22787_s5 + $0x128] sm:$0xff] }
 0x6d0   : > { %v15239_v0 = vmax.f32 %v15181_v21, %v15221_v27  ;;  %v15240_v32 = vmax.f32 %v15182_v26, %v15222_v34  ;;  %v22119_v46 = vmax.f32 %v15183_v61, %v15223_v8  ;;  %v19393_v56 = vunpack.i.h.bf16 %v19391_v3  ;;  %v19396_v33 = vpop.permute.xlu1 %19395  ;;  %v15361_v34 = vld [vmem:[%s22787_s5 + $0x1b0] sm:$0xff]  ;;  %v15362_v8 = vld [vmem:[%s22787_s5 + $0x1b8] sm:$0xff] }
 0x6d1   : > { %v19392_v40 = vunpack.i.l.bf16 %v19391_v3  ;;  %v19398_v16 = vunpack.i.h.bf16 %v19396_v33  ;;  %v19397_v53 = vunpack.i.l.bf16 %v19396_v33  ;;  %v18752_v3 = vpack.c.bf16 %v15344_v43, %v15343_v54  ;;  %v15363_v33 = vld [vmem:[%s22787_s5 + $0x1c0] sm:$0xff] }
 0x6d2   : > { %15259 = vrot.lane.b32.xlu0 %v15239_v0, %s22829_s16  ;;  %v19399_v14 = vpack.i.bf16 %v22119_v46, %v15240_v32 }
 0x6d3   : > { %v15225_v55 = vsel %vm1064_vm3, %v19393_v56, %v19397_v53  ;;  %v15226_v45 = vsel %vm1064_vm3, %v19397_v53, %v19398_v16  ;;  %v15227_v41 = vsel %vm1064_vm3, %v19398_v16, %v19392_v40  ;;  %v15220_v52 = vpop.permute.xlu0 %15219  ;;  %v15346_v56 = vld [vmem:[%s22787_s5 + $0x138] sm:$0xff] }
 0x6d4   : > { %v15245_v29 = vmax.f32 %v15187_v31, %v15226_v45  ;;  %v22130_v21 = vmax.f32 %v15188_v60, %v15227_v41  ;;  %v15210_v26 = vpop.permute.xlu1 %15209  ;;  %19400 = vrot.lane.b32.xlu1 %v19399_v14, %s22829_s16  ;;  %v15244_v57 = vmax.f32 %v15186_v17, %v15225_v55  ;;  %v15228_v15 = vsel %vm1064_vm3, %v19392_v40, %v15220_v52  ;;  %v15340_v31 = vld [vmem:[%s22787_s5 + $0x108] sm:$0xff]  ;;  %v15347_v14 = vld [vmem:[%s22787_s5 + $0x140] sm:$0xff]  ;;  %v15365_v45 = vld [vmem:[%s22787_s5 + $0x1d0] sm:$0xff] }
 0x6d5   : > { %v15224_v61 = vsel %vm1064_vm3, %v19387_v59, %v15210_v26  ;;  %v22143_v60 = vmax.f32 %v15185_v58, %v15210_v26  ;;  %v22148_v6 = vmax.f32 %v15189_v47, %v15228_v15  ;;  %v15339_v47 = vld [vmem:[%s22787_s5 + $0x100] sm:$0xff]  ;;  %v18750_v59 = vpack.c.bf16 %v15360_v10, %v15359_v22  ;;  %v15364_v40 = vld [vmem:[%s22787_s5 + $0x1c8] sm:$0xff]  ;;  %v15366_v41 = vld [vmem:[%s22787_s5 + $0x1d8] sm:$0xff] }
 0x6d6   : > { %v15242_v42 = vmax.f32 %v15184_v4, %v15224_v61  ;;  %v19404_v25 = vpack.i.bf16 %v22130_v21, %v15245_v29  ;;  %v22154_v4 = vmax.f32 %v15190_v36, %v15220_v52  ;;  %v15358_v36 = vld [vmem:[%s22787_s5 + $0x198] sm:$0xff]  ;;  %v18744_v20 = vpack.c.bf16 %v15340_v31, %v15339_v47  ;;  %v15348_v55 = vld [vmem:[%s22787_s5 + $0x148] sm:$0xff]  ;;  %v15349_v61 = vld [vmem:[%s22787_s5 + $0x150] sm:$0xff] }
 0x6d7   : > { %v18746_v7 = vpack.c.bf16 %v15358_v36, %v15357_v5  ;;  %v18758_v53 = vpack.c.bf16 %v15364_v40, %v15363_v33  ;;  %v18762_v26 = vpack.c.bf16 %v15366_v41, %v15365_v45  ;;  %v15350_v52 = vld [vmem:[%s22787_s5 + $0x158] sm:$0xff]  ;;  %v15351_v15 = vld [vmem:[%s22787_s5 + $0x160] sm:$0xff]  ;;  %v15369_v47 = vld [vmem:[%s22787_s5 + $0x1f0] sm:$0xff]  ;;  %vm15381_vm3 = vcmask 1040384  }
 0x6d8   : > { %v19409_v13 = vpack.i.bf16 %v15242_v42, %v15244_v57  ;;  %19405 = vrot.lane.b32.xlu1 %v19404_v25, %s22829_s16  ;;  %v18764_v25 = vpack.c.bf16 %v15350_v52, %v15349_v61  ;;  %v15370_v31 = vld [vmem:[%s22787_s5 + $0x1f8] sm:$0xff]  ;;  %v15353_v36 = vld [vmem:[%s22787_s5 + $0x170] sm:$0xff]  ;;  %v15611_v45 = vld [vmem:[%s22788_s6 + $0x8] sm:$0xff] }
 0x6d9   : > { %v18770_v5 = vpack.c.bf16 %v15370_v31, %v15369_v47  ;;  %v17836_v41 = vld [vmem:[%s22788_s6 + $0xc0] sm:$0xff]  ;;  %v17838_v47 = vld [vmem:[%s22788_s6 + $0xd0] sm:$0xff]  ;;  %v17839_v31 = vld [vmem:[%s22788_s6 + $0xd8] sm:$0x1] }
 0x6da   : > { %19410 = vrot.lane.b32.xlu0 %v19409_v13, %s22829_s16 }
 0x6dc   : > { %15267 = vrot.lane.b32.xlu1 %v22143_v60, %s22829_s16 }
 0x6de   : > { %15275 = vrot.lane.b32.xlu0 %v22148_v6, %s22829_s16 }
 0x6e0   : > { %15277 = vrot.lane.b32.xlu1 %v22154_v4, %s22829_s16  ;;  %s17106_s16 = scalar_lea.sflag [#allocation3], %s404_s26 }
 0x744   : > { %v15260_v1 = vpop.permute.xlu0 %15259 }
 0x746   : > { %v22160_v49 = vpop.permute.xlu1 %19400 }
 0x747   : > { %v19403_v17 = vunpack.i.h.bf16 %v22160_v49  ;;  %v19402_v50 = vunpack.i.l.bf16 %v22160_v49 }
 0x749   : > { %v15279_v58 = vsel %vm3722_vm12, %v15260_v1, %v19402_v50  ;;  %v15280_v37 = vsel %vm3722_vm12, %v19402_v50, %v19403_v17  ;;  %v15352_v50 = vld [vmem:[%s22787_s5 + $0x168] sm:$0xff] }
 0x74a   : > { %v15297_v9 = vmax.f32 %v15239_v0, %v15279_v58  ;;  %v22180_v2 = vpop.permute.xlu1 %19405  ;;  %v15298_v23 = vmax.f32 %v15240_v32, %v15280_v37  ;;  %v18754_v0 = vpack.c.bf16 %v15362_v8, %v15361_v34  ;;  %v15345_v32 = vld [vmem:[%s22787_s5 + $0x130] sm:$0xff]  ;;  %v18768_v1 = vpack.c.bf16 %v15352_v50, %v15351_v15  ;;  %v15354_v58 = vld [vmem:[%s22787_s5 + $0x178] sm:$0xff]  ;;  %v15371_v37 = vld [vmem:[%s22787_s5 + $0x200] sm:$0xff] }
 0x74b   : > { %v19408_v11 = vunpack.i.h.bf16 %v22180_v2  ;;  %v19407_v48 = vunpack.i.l.bf16 %v22180_v2  ;;  %v18756_v16 = vpack.c.bf16 %v15346_v56, %v15345_v32  ;;  %v15612_v50 = vld [vmem:[%s22788_s6 + $0x10] sm:$0xff] }
 0x74c   : > { %v22190_v28 = vpop.permute.xlu0 %19410  ;;  %15449 = vmatprep.mubr.f32.mxu1 %v15298_v23 }
 0x74d   : > { %v19413_v44 = vunpack.i.h.bf16 %v22190_v28  ;;  %v19412_v39 = vunpack.i.l.bf16 %v22190_v28  ;;  %15450 = vmatmul.mubr.f32.vlgmr.msra.gmra.mrb[58].mxu1 %v15297_v9  ;;  %v15284_v51 = vsel %vm3722_vm12, %v19407_v48, %v19408_v11  ;;  %v15372_v9 = vld [vmem:[%s22787_s5 + $0x208] sm:$0xff]  ;;  %v15373_v28 = vld [vmem:[%s22787_s5 + $0x210] sm:$0x1] }
 0x74e   : > { %18745 = vmatpush3.bf16.msra.mxu1 %v18744_v20  ;;  %v22203_v18 = vpop.permute.xlu1 %15267  ;;  %v15303_v30 = vmax.f32 %v15245_v29, %v15284_v51  ;;  %v18760_v29 = vpack.c.bf16 %v15348_v55, %v15347_v14  ;;  %v18772_v20 = vpack.c.bf16 %v15354_v58, %v15353_v36  ;;  %v17812_v36 = vld [vmem:[%s22788_s6 + $0x40] sm:$0xff]  ;;  %v17813_v58 = vld [vmem:[%s22788_s6 + $0x48] sm:$0xff]  ;;  %v16925_v51 = vld [vmem:[%s22790_s8 + $0x10] sm:$0xff] }
 0x74f   : > { %v15282_v35 = vsel %vm3722_vm12, %v19413_v44, %v22203_v18  ;;  %18747 = vmatprep.subr.bf16.mxu1 %v18746_v7  ;;  %v15283_v12 = vsel %vm3722_vm12, %v19412_v39, %v19407_v48  ;;  %v18774_v48 = vpack.c.bf16 %v15372_v9, %v15371_v37  ;;  %v15281_v7 = vsel %vm3722_vm12, %v19403_v17, %v19413_v44  ;;  %v17805_v17 = vld [vmem:[%s22788_s6 + $0x28] sm:$0xff]  ;;  %v17848_v37 = vld [vmem:[%s22788_s6 + $0x100] sm:$0xff] }
 0x750   : > { %v15300_v19 = vmax.f32 %v15242_v42, %v15282_v35  ;;  %15454 = vmatprep.mubr.f32.mxu1 %v15303_v30  ;;  %v15302_v27 = vmax.f32 %v15244_v57, %v15283_v12  ;;  %v15367_v42 = vld [vmem:[%s22787_s5 + $0x1e0] sm:$0xff]  ;;  %v15368_v57 = vld [vmem:[%s22787_s5 + $0x1e8] sm:$0xff]  ;;  %v15276_v38 = vpop.permute.xlu0 %15275  ;;  %v15299_v22 = vmax.f32 %v22119_v46, %v15281_v7  ;;  %v15301_v46 = vmax.f32 %v22143_v60, %v22203_v18  ;;  %v17806_v18 = vld [vmem:[%s22788_s6 + $0x30] sm:$0xff] }
 0x751   : > { %v18766_v13 = vpack.c.bf16 %v15368_v57, %v15367_v42  ;;  %v15285_v10 = vsel %vm3722_vm12, %v19408_v11, %v15276_v38  ;;  %v17824_v60 = vld [vmem:[%s22788_s6 + $0x80] sm:$0xff]  ;;  %v19512_v11 = vmov 0.0|0.0   ;;  %v17807_v30 = vld [vmem:[%s22788_s6 + $0x38] sm:$0x1]  ;;  %v17849_v9 = vld [vmem:[%s22788_s6 + $0x108] sm:$0xff] }
 0x752   : > { %18749 = vmatpush3.bf16.msra.mxu1 %v18748_v63  ;;  %v15278_v23 = vpop.permute.xlu1 %15277  ;;  %v15304_v49 = vmax.f32 %v22130_v21, %v15285_v10  ;;  %v17804_v21 = vld [vmem:[%s22788_s6 + $0x20] sm:$0xff]  ;;  %18806 = vmatprep.subr.bf16.mxu0 %v19512_v11  ;;  %v17826_v63 = vld [vmem:[%s22788_s6 + $0x90] sm:$0xff]  ;;  %v18782_v35 = vpack.c.bf16 %v17807_v30, %v17806_v18  ;;  %v17827_v12 = vld [vmem:[%s22788_s6 + $0x98] sm:$0x1] }
 0x753   : > { %15455 = vmatmul.mubr.f32.gmra.mrb[60].mxu1 %v15302_v27  ;;  %18751 = vmatprep.subr.bf16.mxu1 %v18750_v59  ;;  %v15286_v24 = vsel %vm3722_vm12, %v15276_v38, %v15278_v23  ;;  %v18779_v2 = vpack.c.bf16 %v17805_v17, %v17804_v21  ;;  %vm19513_vm12 = vmmov 1   ;;  %v18810_v59 = vpack.c.bf16 %v17827_v12, %v17826_v63  ;;  %v17815_v38 = vld [vmem:[%s22788_s6 + $0x58] sm:$0x1]  ;;  %v17831_v12 = vld [vmem:[%s22788_s6 + $0xa8] sm:$0xff] }
 0x754   : > { %15524 = vmatprep.mubr.f32.mxu1 %v15300_v19  ;;  %v15305_v39 = vmax.f32 %v22148_v6, %v15286_v24  ;;  %v15306_v6 = vmax.f32 %v22154_v4, %v15278_v23  ;;  %v17825_v4 = vld [vmem:[%s22788_s6 + $0x88] sm:$0xff]  ;;  %vm22319_vm14 = vmpackc.low %vm15381_vm3, %vm19513_vm12  ;;  %v18793_v23 = vpack.c.bf16 %v17813_v58, %v17812_v36  ;;  %v17850_v24 = vld [vmem:[%s22788_s6 + $0x110] sm:$0xff] }
 0x755   : > { %v18807_v44 = vpack.c.bf16 %v17825_v4, %v17824_v60  ;;  %v17820_v60 = vld [vmem:[%s22788_s6 + $0x70] sm:$0xff]  ;;  %v17821_v4 = vld [vmem:[%s22788_s6 + $0x78] sm:$0x1] }
 0x756   : > { %18753 = vmatpush3.bf16.msra.mxu1 %v18752_v3  ;;  %v17863_v18 = vld [vmem:[%s22788_s6 + $0x158] sm:$0x1]  ;;  %v18803_v30 = vpack.c.bf16 %v17821_v4, %v17820_v60  ;;  %v17856_v36 = vld [vmem:[%s22788_s6 + $0x130] sm:$0xff] }
 0x757   : > { %18755 = vmatprep.subr.bf16.mxu1 %v18754_v0  ;;  %18808 = vmatpush3.bf16.msra.mxu0 %v18807_v44  ;;  %v17862_v44 = vld [vmem:[%s22788_s6 + $0x150] sm:$0xff]  ;;  %v17857_v58 = vld [vmem:[%s22788_s6 + $0x138] sm:$0x1] }
 0x758   : > { %18809 = vmatprep.subr.bf16.mxu0 %v19512_v11  ;;  %v18852_v63 = vpack.c.bf16 %v17863_v18, %v17862_v44  ;;  %v17893_v4 = vld [vmem:[%s22788_s6 + $0x1f8] sm:$0x1] }
 0x75a   : > { %18757 = vmatpush3.bf16.msra.mxu1 %v18756_v16 }
 0x75b   : > { %18759 = vmatprep.subr.bf16.mxu1 %v18758_v53  ;;  %18812 = vmatpush3.bf16.msk.msra.mxu0 %vm22319_vm14, %v18810_v59  ;;  %v15610_v53 = vld [vmem:[%s22788_s6] sm:$0xff] }
 0x75c   : > { %18820 = vmatprep.subr.bf16.mxu0 %v19512_v11  ;;  %v18786_v42 = vpack.c.bf16 %v15611_v45, %v15610_v53  ;;  %v17872_v59 = vld [vmem:[%s22788_s6 + $0x180] sm:$0xff] }
 0x75d   : > { %v17884_v53 = vld [vmem:[%s22788_s6 + $0x1c0] sm:$0xff] }
 0x75e   : > { %18761 = vmatpush3.bf16.msra.mxu1 %v18760_v29  ;;  %v17837_v29 = vld [vmem:[%s22788_s6 + $0xc8] sm:$0xff] }
 0x75f   : > { %18763 = vmatprep.subr.bf16.mxu1 %v18762_v26  ;;  %v18821_v57 = vpack.c.bf16 %v17837_v29, %v17836_v41  ;;  %v17845_v41 = vld [vmem:[%s22788_s6 + $0xf8] sm:$0x1] }
 0x762   : > { %18765 = vmatpush3.bf16.msra.mxu1 %v18764_v25  ;;  %v15613_v25 = vld [vmem:[%s22788_s6 + $0x18] sm:$0x1] }
 0x763   : > { %18767 = vmatprep.subr.bf16.mxu1 %v18766_v13 }
 0x766   : > { %18769 = vmatpush3.bf16.msra.mxu1 %v18768_v1  ;;  %v18789_v1 = vpack.c.bf16 %v15613_v25, %v15612_v50  ;;  %v17887_v25 = vld [vmem:[%s22788_s6 + $0x1d8] sm:$0x1]  ;;  %v17854_v50 = vld [vmem:[%s22788_s6 + $0x120] sm:$0xff] }
 0x767   : > { %18771 = vmatprep.subr.bf16.mxu1 %v18770_v5  ;;  %v18824_v5 = vpack.c.bf16 %v17839_v31, %v17838_v47  ;;  %v17855_v47 = vld [vmem:[%s22788_s6 + $0x128] sm:$0xff] }
 0x768   : > { %v18842_v31 = vpack.c.bf16 %v17855_v47, %v17854_v50  ;;  %v17020_v50 = vld [vmem:[%s22792_s10 + $0x38] sm:$0xff] }
 0x76a   : > { %18773 = vmatpush3.bf16.msra.mxu1 %v18772_v20  ;;  %v18835_v20 = vpack.c.bf16 %v17849_v9, %v17848_v37  ;;  %v17866_v37 = vld [vmem:[%s22788_s6 + $0x160] sm:$0xff]  ;;  %v17867_v9 = vld [vmem:[%s22788_s6 + $0x168] sm:$0xff] }
 0x76b   : > { %18775 = vmatprep.subr.bf16.mxu1 %v18774_v48 }
 0x76d   : > { %15525 = vmatmul.mubr.f32.vlgmr.msra.gmra.mrb[62].mxu1 %v15299_v22  ;;  %v17851_v22 = vld [vmem:[%s22788_s6 + $0x118] sm:$0x1] }
 0x76e   : > { %15529 = vmatprep.mubr.f32.mxu1 %v15305_v39  ;;  %18777 = vmatpush3.bf16.msra.mxu1 %v18774_v48  ;;  %v17814_v48 = vld [vmem:[%s22788_s6 + $0x50] sm:$0xff]  ;;  %v18838_v39 = vpack.c.bf16 %v17851_v22, %v17850_v24  ;;  %v17878_v24 = vld [vmem:[%s22788_s6 + $0x1a0] sm:$0xff]  ;;  %v17879_v22 = vld [vmem:[%s22788_s6 + $0x1a8] sm:$0xff] }
 0x76f   : > { %18471 = vmatprep.subr.msk.mxu1 %vm15381_vm3, %v15373_v28  ;;  %v18796_v10 = vpack.c.bf16 %v17815_v38, %v17814_v48  ;;  %v17868_v48 = vld [vmem:[%s22788_s6 + $0x170] sm:$0xff] }
 0x771   : > { %15530 = vmatmul.mubr.f32.gmra.mrb[64].mxu1 %v15304_v49  ;;  %v17819_v49 = vld [vmem:[%s22788_s6 + $0x68] sm:$0xff] }
 0x772   : > { %18473 = vmatprep.mubr.msk.f32.mxu1 %vm15374_vm6, %v15301_v46  ;;  %18472 = vmatpush3.msk.msra.mxu1 %vm15381_vm3, %v15373_v28  ;;  %v17818_v28 = vld [vmem:[%s22788_s6 + $0x60] sm:$0xff] }
 0x773   : > { %18778 = vmatprep.subr.bf16.mxu1 %v19512_v11  ;;  %v17860_v46 = vld [vmem:[%s22788_s6 + $0x140] sm:$0xff]  ;;  %v18800_v21 = vpack.c.bf16 %v17819_v49, %v17818_v28  ;;  %v17880_v28 = vld [vmem:[%s22788_s6 + $0x1b0] sm:$0xff]  ;;  %v17881_v49 = vld [vmem:[%s22788_s6 + $0x1b8] sm:$0x1] }
 0x775   : > { %18474 = vmatmul.mubr.msk.f32.vlgmr.msra.gmra.mrb[66].mxu1 %vm15374_vm6, %v15306_v6  ;;  %v17861_v6 = vld [vmem:[%s22788_s6 + $0x148] sm:$0xff] }
 0x776   : > { %18484 = vmatprep.mubr.msk.f32.mxu1 %vm19496_vm4, %v22844_v62  ;;  %18780 = vmatpush3.bf16.msra.mxu1 %v18779_v2  ;;  %v18849_v17 = vpack.c.bf16 %v17861_v6, %v17860_v46  ;;  %v18873_v46 = vpack.c.bf16 %v17881_v49, %v17880_v28  ;;  %v17890_v6 = vld [vmem:[%s22788_s6 + $0x1e0] sm:$0xff] }
 0x777   : > { %18781 = vmatprep.subr.bf16.mxu1 %v19512_v11 }
 0x77a   : > { %18784 = vmatpush3.bf16.msk.msra.mxu1 %vm22319_vm14, %v18782_v35  ;;  %v17830_v35 = vld [vmem:[%s22788_s6 + $0xa0] sm:$0xff] }
 0x77b   : > { %18785 = vmatprep.subr.bf16.mxu1 %v19512_v11 }
 0x820   : > { %v18060_v54 = vpop.f32.mrb[58].mxu1 }
 0x821   : > { %v18061_v43 = vpop.f32.mrb[59].mxu1 }
 0x822   : > { %v18062_v19 = vadd.f32 %v18061_v43, %v18060_v54  ;;  %v17873_v54 = vld [vmem:[%s22788_s6 + $0x188] sm:$0xff]  ;;  %v18814_v43 = vpack.c.bf16 %v17831_v12, %v17830_v35  ;;  %v16926_v35 = vld [vmem:[%s22790_s8 + $0x18] sm:$0xff] }
 0x823   : > { %v18894_v12 = vpack.c.bf16 %v16926_v35, %v16925_v51 }
 0x826   : > { %v18063_v27 = vpop.f32.mrb[60].mxu1 }
 0x827   : > { %v18064_v34 = vpop.f32.mrb[61].mxu1 }
 0x828   : > { %v18065_v8 = vadd.f32 %v18064_v34, %v18063_v27  ;;  %v17833_v27 = vld [vmem:[%s22788_s6 + $0xb8] sm:$0x1] }
 0x840   : > { %v18098_v3 = vpop.f32.mrb[62].mxu1 }
 0x841   : > { %v18099_v0 = vpop.f32.mrb[63].mxu1 }
 0x842   : > { %v18100_v32 = vadd.f32 %v18099_v0, %v18098_v3  ;;  %v17832_v3 = vld [vmem:[%s22788_s6 + $0xb0] sm:$0xff] }
 0x843   : > { %v17874_v0 = vld [vmem:[%s22788_s6 + $0x190] sm:$0xff] }
 0x844   : > { %v18101_v56 = vpop.f32.mrb[64].mxu1  ;;  %v15527_v33 = vadd.f32 %v18100_v32, %v18062_v19  ;;  %v18863_v19 = vpack.c.bf16 %v17873_v54, %v17872_v59  ;;  %v17875_v32 = vld [vmem:[%s22788_s6 + $0x198] sm:$0x1]  ;;  %v16927_v59 = vld [vmem:[%s22790_s8 + $0x20] sm:$0xff]  ;;  %v16928_v54 = vld [vmem:[%s22790_s8 + $0x28] sm:$0xff] }
 0x845   : > { %v18102_v40 = vpop.f32.mrb[65].mxu1 }
 0x846   : > { %v18103_v16 = vadd.f32 %v18102_v40, %v18101_v56  ;;  %v18817_v56 = vpack.c.bf16 %v17833_v27, %v17832_v3  ;;  %v17842_v40 = vld [vmem:[%s22788_s6 + $0xe0] sm:$0xff]  ;;  %v16930_v27 = vld [vmem:[%s22790_s8 + $0x38] sm:$0xff]  ;;  %v16932_v3 = vld [vmem:[%s22790_s8 + $0x48] sm:$0xff] }
 0x848   : > { %v15532_v14 = vadd.f32 %v18103_v16, %v18065_v8  ;;  %v18475_v55 = vpop.f32.mrb[66].mxu1  ;;  %v17843_v16 = vld [vmem:[%s22788_s6 + $0xe8] sm:$0xff] }
 0x849   : > { %v15601_v26 = vpop.f32.mrb[67].mxu1 }
 0x84a   : > { %v22355_v61 = vadd.f32 %v18475_v55, %v15532_v14  ;;  %v22357_v52 = vadd.f32 %v15601_v26, %v15527_v33  ;;  %v18866_v33 = vpack.c.bf16 %v17875_v32, %v17874_v0  ;;  %v17885_v14 = vld [vmem:[%s22788_s6 + $0x1c8] sm:$0xff]  ;;  %v18828_v55 = vpack.c.bf16 %v17843_v16, %v17842_v40  ;;  %v16933_v0 = vld [vmem:[%s22790_s8 + $0x50] sm:$0xff]  ;;  %v16935_v40 = vld [vmem:[%s22790_s8 + $0x60] sm:$0xff] }
 0x84b   : > { %v18877_v45 = vpack.c.bf16 %v17885_v14, %v17884_v53  ;;  %v16936_v16 = vld [vmem:[%s22790_s8 + $0x68] sm:$0xff]  ;;  %v16937_v14 = vld [vmem:[%s22790_s8 + $0x70] sm:$0xff] }
 0x84c   : > { %v15620_v13 = vrot.slane %v22357_v52, 1  ;;  %v15941_v15 = vrot.slane %v22357_v52, 4  ;;  %v16105_v7 = vrot.slane %v22357_v52, 6  ;;  %v15777_v2 = vrot.slane %v22357_v52, 2 }
 0x84d   : > { %v15859_v34 = vrot.slane %v22357_v52, 3  ;;  %v16433_v8 = vrot.slane %v22355_v61, 2  ;;  %v16023_v29 = vrot.slane %v22357_v52, 5  ;;  %v16597_v26 = vrot.slane %v22355_v61, 4 }
 0x84e   : > { %18485 = vmatmul.mubr.msk.f32.vlgmr.msra.gmra.mrb[68].mxu1 %vm15621_vm8, %v15620_v13  ;;  %18529 = vmatmul.mubr.msk.f32.vlgmr.msra.gmra.mrb[10].mxu0 %vm15621_vm8, %v15941_v15  ;;  %v16679_v60 = vrot.slane %v22355_v61, 5  ;;  %v16843_v18 = vrot.slane %v22355_v61, 7  ;;  %v18909_v53 = vpack.c.bf16 %v16936_v16, %v16935_v40 }
 0x84f   : > { %18787 = vmatpush3.bf16.msra.mxu1 %v18786_v42  ;;  %18822 = vmatpush3.bf16.msra.mxu0 %v18821_v57  ;;  %v17844_v42 = vld [vmem:[%s22788_s6 + $0xf0] sm:$0xff] }
 0x850   : > { %18788 = vmatprep.subr.bf16.mxu1 %v19512_v11  ;;  %18823 = vmatprep.subr.bf16.mxu0 %v19512_v11  ;;  %v17886_v57 = vld [vmem:[%s22788_s6 + $0x1d0] sm:$0xff]  ;;  %v18831_v13 = vpack.c.bf16 %v17845_v41, %v17844_v42 }
 0x851   : > { %18495 = vmatprep.mubr.msk.f32.mxu1 %vm19496_vm4, %v22844_v62  ;;  %18550 = vmatprep.mubr.msk.f32.mxu0 %vm19496_vm4, %v22844_v62  ;;  %v18880_v15 = vpack.c.bf16 %v17887_v25, %v17886_v57  ;;  %v17015_v41 = vld [vmem:[%s22792_s10 + $0x10] sm:$0xff]  ;;  %v17017_v57 = vld [vmem:[%s22792_s10 + $0x20] sm:$0xff]  ;;  %v17018_v25 = vld [vmem:[%s22792_s10 + $0x28] sm:$0xff] }
 0x853   : > { %18791 = vmatpush3.bf16.msk.msra.mxu1 %vm22319_vm14, %v18789_v1  ;;  %18826 = vmatpush3.bf16.msk.msra.mxu0 %vm22319_vm14, %v18824_v5  ;;  %v16187_v1 = vrot.slane %v22357_v52, 7  ;;  %v16761_v5 = vrot.slane %v22355_v61, 6 }
 0x854   : > { %18792 = vmatprep.subr.bf16.mxu1 %v19512_v11  ;;  %18834 = vmatprep.subr.bf16.mxu0 %v19512_v11 }
 0x856   : > { %18496 = vmatmul.mubr.msk.f32.vlgmr.msra.gmra.mrb[70].mxu1 %vm15621_vm8, %v22357_v52  ;;  %18551 = vmatmul.mubr.msk.f32.vlgmr.msra.gmra.mrb[12].mxu0 %vm15621_vm8, %v16105_v7  ;;  %v18845_v52 = vpack.c.bf16 %v17857_v58, %v17856_v36  ;;  %v17869_v7 = vld [vmem:[%s22788_s6 + $0x178] sm:$0x1] }
 0x857   : > { %18794 = vmatpush3.bf16.msra.mxu1 %v18793_v23  ;;  %18836 = vmatpush3.bf16.msra.mxu0 %v18835_v20  ;;  %v18856_v23 = vpack.c.bf16 %v17867_v9, %v17866_v37  ;;  %v16351_v20 = vrot.slane %v22355_v61, 1  ;;  %v18859_v38 = vpack.c.bf16 %v17869_v7, %v17868_v48 }
 0x858   : > { %18795 = vmatprep.subr.bf16.mxu1 %v19512_v11  ;;  %18837 = vmatprep.subr.bf16.mxu0 %v19512_v11 }
 0x859   : > { %18506 = vmatprep.mubr.msk.f32.mxu1 %vm19496_vm4, %v22844_v62  ;;  %18572 = vmatprep.mubr.msk.f32.mxu0 %vm19496_vm4, %v22844_v62 }
 0x85b   : > { %18798 = vmatpush3.bf16.msk.msra.mxu1 %vm22319_vm14, %v18796_v10  ;;  %18840 = vmatpush3.bf16.msk.msra.mxu0 %vm22319_vm14, %v18838_v39  ;;  %v18870_v10 = vpack.c.bf16 %v17879_v22, %v17878_v24  ;;  %v16515_v39 = vrot.slane %v22355_v61, 3 }
 0x85c   : > { %18799 = vmatprep.subr.bf16.mxu1 %v19512_v11  ;;  %18848 = vmatprep.subr.bf16.mxu0 %v19512_v11 }
 0x85e   : > { %18507 = vmatmul.mubr.msk.f32.vlgmr.msra.gmra.mrb[72].mxu1 %vm15621_vm8, %v15777_v2  ;;  %18573 = vmatmul.mubr.msk.f32.vlgmr.msra.gmra.mrb[14].mxu0 %vm15621_vm8, %v22355_v61  ;;  %v17892_v2 = vld [vmem:[%s22788_s6 + $0x1f0] sm:$0xff] }
 0x85f   : > { %18801 = vmatpush3.bf16.msra.mxu1 %v18800_v21  ;;  %18850 = vmatpush3.bf16.msra.mxu0 %v18849_v17  ;;  %v17891_v21 = vld [vmem:[%s22788_s6 + $0x1e8] sm:$0xff]  ;;  %v18887_v44 = vpack.c.bf16 %v17893_v4, %v17892_v2 }
 0x860   : > { %18802 = vmatprep.subr.bf16.mxu1 %v19512_v11  ;;  %18851 = vmatprep.subr.bf16.mxu0 %v19512_v11  ;;  %v18884_v17 = vpack.c.bf16 %v17891_v21, %v17890_v6 }
 0x861   : > { %18517 = vmatprep.mubr.msk.f32.mxu1 %vm19496_vm4, %v22844_v62  ;;  %18594 = vmatprep.mubr.msk.f32.mxu0 %vm19496_vm4, %v22844_v62 }
 0x863   : > { %18805 = vmatpush3.bf16.msk.msra.mxu1 %vm22319_vm14, %v18803_v30  ;;  %18854 = vmatpush3.bf16.msk.msra.mxu0 %vm22319_vm14, %v18852_v63  ;;  %v16923_v30 = vld [vmem:[%s22790_s8] sm:$0xff]  ;;  %v16924_v63 = vld [vmem:[%s22790_s8 + $0x8] sm:$0xff] }
 0x864   : > { %18813 = vmatprep.subr.bf16.mxu1 %v19512_v11  ;;  %18862 = vmatprep.subr.bf16.mxu0 %v19512_v11  ;;  %v18891_v61 = vpack.c.bf16 %v16924_v63, %v16923_v30 }
 0x866   : > { %18518 = vmatmul.mubr.msk.f32.vlgmr.msra.gmra.mrb[74].mxu1 %vm15621_vm8, %v15859_v34  ;;  %18595 = vmatmul.mubr.msk.f32.vlgmr.msra.gmra.mrb[16].mxu0 %vm15621_vm8, %v16433_v8  ;;  %v16931_v8 = vld [vmem:[%s22790_s8 + $0x40] sm:$0xff] }
 0x867   : > { %18815 = vmatpush3.bf16.msra.mxu1 %v18814_v43  ;;  %18864 = vmatpush3.bf16.msra.mxu0 %v18863_v19  ;;  %v16929_v43 = vld [vmem:[%s22790_s8 + $0x30] sm:$0xff]  ;;  %v18897_v19 = vpack.c.bf16 %v16928_v54, %v16927_v59  ;;  %v18903_v32 = vpack.c.bf16 %v16932_v3, %v16931_v8 }
 0x868   : > { %18816 = vmatprep.subr.bf16.mxu1 %v19512_v11  ;;  %18865 = vmatprep.subr.bf16.mxu0 %v19512_v11  ;;  %v18900_v34 = vpack.c.bf16 %v16930_v27, %v16929_v43 }
 0x869   : > { %18539 = vmatprep.mubr.msk.f32.mxu1 %vm19496_vm4, %v22844_v62  ;;  %18616 = vmatprep.mubr.msk.f32.mxu0 %vm19496_vm4, %v22844_v62 }
 0x86b   : > { %18819 = vmatpush3.bf16.msk.msra.mxu1 %vm22319_vm14, %v18817_v56  ;;  %18868 = vmatpush3.bf16.msk.msra.mxu0 %vm22319_vm14, %v18866_v33  ;;  %v16934_v56 = vld [vmem:[%s22790_s8 + $0x58] sm:$0xff] }
 0x86c   : > { %18827 = vmatprep.subr.bf16.mxu1 %v19512_v11  ;;  %18876 = vmatprep.subr.bf16.mxu0 %v19512_v11  ;;  %v18906_v33 = vpack.c.bf16 %v16934_v56, %v16933_v0  ;;  %v16920_v56 = vld [vmem:[%s22789_s7] sm:$0x1] }
 0x86e   : > { %18540 = vmatmul.mubr.msk.f32.vlgmr.msra.gmra.mrb[76].mxu1 %vm15621_vm8, %v16023_v29  ;;  %18617 = vmatmul.mubr.msk.f32.vlgmr.msra.gmra.mrb[18].mxu0 %vm15621_vm8, %v16597_v26  ;;  %v17016_v26 = vld [vmem:[%s22792_s10 + $0x18] sm:$0xff] }
 0x86f   : > { %18829 = vmatpush3.bf16.msra.mxu1 %v18828_v55  ;;  %18878 = vmatpush3.bf16.msra.mxu0 %v18877_v45  ;;  %v17013_v55 = vld [vmem:[%s22792_s10] sm:$0xff]  ;;  %v17014_v45 = vld [vmem:[%s22792_s10 + $0x8] sm:$0xff]  ;;  %v18915_v42 = vpack.c.bf16 %v17016_v26, %v17015_v41  ;;  %v17023_v41 = vld [vmem:[%s22792_s10 + $0x50] sm:$0xf] }
 0x870   : > { %18830 = vmatprep.subr.bf16.mxu1 %v19512_v11  ;;  %18879 = vmatprep.subr.bf16.mxu0 %v19512_v11  ;;  %v18912_v29 = vpack.c.bf16 %v17014_v45, %v17013_v55  ;;  %v17022_v55 = vld [vmem:[%s22792_s10 + $0x48] sm:$0xff] }
 0x871   : > { %18561 = vmatprep.mubr.msk.f32.mxu1 %vm19496_vm4, %v22844_v62  ;;  %18638 = vmatprep.mubr.msk.f32.mxu0 %vm19496_vm4, %v22844_v62 }
 0x873   : > { %18833 = vmatpush3.bf16.msk.msra.mxu1 %vm22319_vm14, %v18831_v13  ;;  %18882 = vmatpush3.bf16.msk.msra.mxu0 %vm22319_vm14, %v18880_v15  ;;  %v18918_v13 = vpack.c.bf16 %v17018_v25, %v17017_v57  ;;  %v17019_v15 = vld [vmem:[%s22792_s10 + $0x30] sm:$0xff] }
 0x874   : > { %18841 = vmatprep.subr.bf16.mxu1 %v19512_v11  ;;  %18890 = vmatprep.subr.bf16.mxu0 %v19512_v11  ;;  %v18921_v47 = vpack.c.bf16 %v17020_v50, %v17019_v15 }
 0x876   : > { %18562 = vmatmul.mubr.msk.f32.vlgmr.msra.gmra.mrb[78].mxu1 %vm15621_vm8, %v16187_v1  ;;  %18639 = vmatmul.mubr.msk.f32.vlgmr.msra.gmra.mrb[20].mxu0 %vm15621_vm8, %v16761_v5 }
 0x877   : > { %18843 = vmatpush3.bf16.msra.mxu1 %v18842_v31  ;;  %18583 = vmatprep.mubr.msk.f32.mxu1 %vm19496_vm4, %v22844_v62 }
 0x878   : > { %18844 = vmatprep.subr.bf16.mxu1 %v19512_v11  ;;  %18682 = vmatprep.mubr.msk.f32.mxu0 %vm19496_vm4, %v22844_v62 }
 0x879   : > { %18892 = vmatpush3.bf16.msra.mxu0 %v18891_v61 }
 0x87a   : > { %18893 = vmatprep.subr.bf16.mxu0 %v19512_v11 }
 0x87b   : > { %18847 = vmatpush3.bf16.msk.msra.mxu1 %vm22319_vm14, %v18845_v52 }
 0x87c   : > { %18855 = vmatprep.subr.bf16.mxu1 %v19512_v11 }
 0x87d   : > { %18895 = vmatpush3.bf16.msra.mxu0 %v18894_v12 }
 0x87e   : > { %18584 = vmatmul.mubr.msk.f32.vlgmr.msra.gmra.mrb[80].mxu1 %vm15621_vm8, %v16351_v20  ;;  %18896 = vmatprep.subr.bf16.mxu0 %v19512_v11 }
 0x87f   : > { %18857 = vmatpush3.bf16.msra.mxu1 %v18856_v23  ;;  %18605 = vmatprep.mubr.msk.f32.mxu1 %vm19496_vm4, %v22844_v62 }
 0x880   : > { %18858 = vmatprep.subr.bf16.mxu1 %v19512_v11 }
 0x881   : > { %18898 = vmatpush3.bf16.msra.mxu0 %v18897_v19 }
 0x882   : > { %18899 = vmatprep.subr.bf16.mxu0 %v19512_v11 }
 0x883   : > { %18861 = vmatpush3.bf16.msk.msra.mxu1 %vm22319_vm14, %v18859_v38 }
 0x884   : > { %18869 = vmatprep.subr.bf16.mxu1 %v19512_v11 }
 0x885   : > { %18901 = vmatpush3.bf16.msra.mxu0 %v18900_v34 }
 0x886   : > { %18606 = vmatmul.mubr.msk.f32.vlgmr.msra.gmra.mrb[82].mxu1 %vm15621_vm8, %v16515_v39  ;;  %18902 = vmatprep.subr.bf16.mxu0 %v19512_v11 }
 0x887   : > { %18871 = vmatpush3.bf16.msra.mxu1 %v18870_v10  ;;  %18627 = vmatprep.mubr.msk.f32.mxu1 %vm19496_vm4, %v22844_v62 }
 0x888   : > { %18872 = vmatprep.subr.bf16.mxu1 %v19512_v11 }
 0x889   : > { %18904 = vmatpush3.bf16.msra.mxu0 %v18903_v32 }
 0x88a   : > { %18905 = vmatprep.subr.bf16.mxu0 %v19512_v11 }
 0x88b   : > { %18875 = vmatpush3.bf16.msk.msra.mxu1 %vm22319_vm14, %v18873_v46 }
 0x88c   : > { %18883 = vmatprep.subr.bf16.mxu1 %v19512_v11 }
 0x88d   : > { %18907 = vmatpush3.bf16.msra.mxu0 %v18906_v33 }
 0x88e   : > { %18628 = vmatmul.mubr.msk.f32.vlgmr.msra.gmra.mrb[84].mxu1 %vm15621_vm8, %v16679_v60  ;;  %18908 = vmatprep.subr.bf16.mxu0 %v19512_v11 }
 0x88f   : > { %18885 = vmatpush3.bf16.msra.mxu1 %v18884_v17  ;;  %18649 = vmatprep.mubr.msk.f32.mxu1 %vm19496_vm4, %v22844_v62 }
 0x890   : > { %18886 = vmatprep.subr.bf16.mxu1 %v19512_v11 }
 0x891   : > { %18910 = vmatpush3.bf16.msra.mxu0 %v18909_v53 }
 0x892   : > { %18680 = vmatprep.subr.mxu0 %v22844_v62 }
 0x893   : > { %18889 = vmatpush3.bf16.msk.msra.mxu1 %vm22319_vm14, %v18887_v44 }
 0x894   : > { %18911 = vmatprep.subr.bf16.mxu1 %v19512_v11 }
 0x895   : > { %18681 = vmatpush3.msra.mxu0 %v16937_v14  ;;  %v17021_v14 = vld [vmem:[%s22792_s10 + $0x40] sm:$0xff] }
 0x896   : > { %18650 = vmatmul.mubr.msk.f32.vlgmr.msra.gmra.mrb[86].mxu1 %vm15621_vm8, %v16843_v18  ;;  %v18924_v45 = vpack.c.bf16 %v17022_v55, %v17021_v14 }
 0x897   : > { %18707 = vmatprep.mubr.msk.f32.mxu1 %vm19496_vm4, %v22844_v62  ;;  %18913 = vmatpush3.bf16.msra.mxu1 %v18912_v29  ;;  %vm17029_vm4 = vcmask 1043456   ;;  %v16938_v29 = vld [vmem:[%s22791_s9] sm:$0x1] }
 0x898   : > { %18914 = vmatprep.subr.bf16.mxu1 %v19512_v11 }
 0x89b   : > { %18916 = vmatpush3.bf16.msra.mxu1 %v18915_v42 }
 0x89c   : > { %18917 = vmatprep.subr.bf16.mxu1 %v19512_v11 }
 0x89f   : > { %18919 = vmatpush3.bf16.msra.mxu1 %v18918_v13 }
 0x8a0   : > { %18920 = vmatprep.subr.bf16.mxu1 %v19512_v11 }
 0x8a3   : > { %18922 = vmatpush3.bf16.msra.mxu1 %v18921_v47 }
 0x8a4   : > { %18923 = vmatprep.subr.bf16.mxu1 %v19512_v11 }
 0x8a7   : > { %18925 = vmatpush3.bf16.msra.mxu1 %v18924_v45 }
 0x8a8   : > { %18705 = vmatprep.subr.mxu1 %v22844_v62  ;;  %v17024_v62 = vld [vmem:[%s22793_s11] sm:$0x1] }
 0x8ab   : > { %18706 = vmatpush3.msk.msra.mxu1 %vm17029_vm4, %v17023_v41 }
 0x921   : > { %v15693_v31 = vpop.f32.mrb[68].mxu1  ;;  %v16013_v1 = vpop.f32.mrb[10].mxu0 }
 0x922   : > { %v18486_v5 = vpop.f32.mrb[69].mxu1  ;;  %v18530_v36 = vpop.f32.mrb[11].mxu0 }
 0x929   : > { %v15768_v58 = vpop.f32.mrb[70].mxu1  ;;  %v16177_v52 = vpop.f32.mrb[12].mxu0 }
 0x92a   : > { %v15769_v37 = vadd.f32 %v15768_v58, %v15693_v31  ;;  %v18497_v9 = vpop.f32.mrb[71].mxu1  ;;  %v18552_v23 = vpop.f32.mrb[13].mxu0 }
 0x931   : > { %v15849_v20 = vpop.f32.mrb[72].mxu1  ;;  %v16341_v48 = vpop.f32.mrb[14].mxu0 }
 0x932   : > { %v15853_v7 = vadd.f32 %v15849_v20, %v15769_v37  ;;  %v18508_v38 = vpop.f32.mrb[73].mxu1  ;;  %v18574_v24 = vpop.f32.mrb[15].mxu0 }
 0x939   : > { %v15931_v22 = vpop.f32.mrb[74].mxu1  ;;  %v16505_v10 = vpop.f32.mrb[16].mxu0 }
 0x93a   : > { %v15935_v39 = vadd.f32 %v15931_v22, %v15853_v7  ;;  %v18519_v28 = vpop.f32.mrb[75].mxu1  ;;  %v18596_v49 = vpop.f32.mrb[17].mxu0 }
 0x93c   : > { %v16017_v11 = vadd.f32 %v16013_v1, %v15935_v39 }
 0x941   : > { %v16095_v46 = vpop.f32.mrb[76].mxu1  ;;  %v16669_v6 = vpop.f32.mrb[18].mxu0 }
 0x942   : > { %v16099_v21 = vadd.f32 %v16095_v46, %v16017_v11  ;;  %v18541_v17 = vpop.f32.mrb[77].mxu1  ;;  %v18618_v60 = vpop.f32.mrb[19].mxu0 }
 0x944   : > { %v16181_v2 = vadd.f32 %v16177_v52, %v16099_v21 }
 0x949   : > { %v16259_v4 = vpop.f32.mrb[78].mxu1  ;;  %v16833_v44 = vpop.f32.mrb[20].mxu0 }
 0x94a   : > { %v16263_v18 = vadd.f32 %v16259_v4, %v16181_v2  ;;  %v18563_v30 = vpop.f32.mrb[79].mxu1  ;;  %v18640_v63 = vpop.f32.mrb[21].mxu0 }
 0x94c   : > { %v16345_v51 = vadd.f32 %v16341_v48, %v16263_v18 }
 0x951   : > { %v16423_v61 = vpop.f32.mrb[80].mxu1 }
 0x952   : > { %v16427_v35 = vadd.f32 %v16423_v61, %v16345_v51  ;;  %v18585_v12 = vpop.f32.mrb[81].mxu1 }
 0x954   : > { %v16509_v59 = vadd.f32 %v16505_v10, %v16427_v35 }
 0x959   : > { %v16587_v54 = vpop.f32.mrb[82].mxu1 }
 0x95a   : > { %v16591_v43 = vadd.f32 %v16587_v54, %v16509_v59  ;;  %v18607_v19 = vpop.f32.mrb[83].mxu1 }
 0x95c   : > { %v16673_v27 = vadd.f32 %v16669_v6, %v16591_v43 }
 0x961   : > { %v16751_v34 = vpop.f32.mrb[84].mxu1 }
 0x962   : > { %v16755_v8 = vadd.f32 %v16751_v34, %v16673_v27  ;;  %v18629_v3 = vpop.f32.mrb[85].mxu1 }
 0x964   : > { %v16837_v0 = vadd.f32 %v16833_v44, %v16755_v8 }
 0x969   : > { %v16915_v32 = vpop.f32.mrb[86].mxu1 }
 0x96a   : > { %v16919_v33 = vadd.f32 %v16915_v32, %v16837_v0  ;;  %v18651_v40 = vpop.f32.mrb[87].mxu1 }
 0x96c   : > { %v16921_v16 = vadd.f32 %v16920_v56, %v16919_v33 }
 0x96e   : > { %v16922_v53 = vmax.f32 %v16921_v16, 0.0 }
 0x970   : > { %18683 = vmatmul.mubr.msk.f32.vlgmr.msra.gmra.mrb[22].mxu0 %vm9715_vm5, %v16922_v53 }
 0xa43   : > { %v17008_v26 = vpop.f32.mrb[22].mxu0 }
 0xa44   : > { %v17009_v42 = vadd.f32 %v17008_v26, %v16938_v29  ;;  %v18684_v57 = vpop.f32.mrb[23].mxu0 }
 0xa46   : > { %v17012_v25 = vmax.f32 %v17009_v42, 0.0 }
 0xa48   : > { %18708 = vmatmul.mubr.msk.f32.vlgmr.msra.gmra.mrb[88].mxu1 %vm17025_vm10, %v17012_v25 }
 0xb1b   : > { %v17099_v13 = vpop.f32.mrb[88].mxu1 }
 0xb1c   : > { %v17100_v15 = vadd.f32 %v17099_v13, %v17024_v62  ;;  %v18709_v50 = vpop.f32.mrb[89].mxu1 }
 0xb1e   : > { %17104 = vst.msk [vmem:[%s405_s17] sm:$0x1] %vm17103_vm11, %v17100_v15 }
 0xb1f   : > { %19435 = shalt.err (!%p19432_p3)
}
 0xb20   : > { %s19436_s26 = scalar_lea.hbm %s22740_s28, 16  ;;  %s19440_s29 = scalar_lea.hbm %s22794_s12, 32 }
 0xb21   : > { %p19437_p4 = scmp.ne.s32.totalorder %s22740_s28, %s19436_s26  ;;  %p19441_p9 = scmp.lt.u32.totalorder %s22740_s28, %s22794_s12 }
 0xb22   : > { %p19442_p10 = scmp.lt.u32.totalorder %s19440_s29, %s19436_s26  ;;  %p19444_p12 = scmp.lt.u32.totalorder %s19436_s26, %s22740_s28 }
 0xb23   : > { %p19438_p7 = pnand %p19437_p4, %p19618_p5 }
 0xb24   : > { %p19443_p11 = por %p19442_p10, %p19441_p9 }
 0xb25   : > { %p19439_p8 = pneg %p19438_p7 }
 0xb26   : > { %p19445_p13 = por %p19444_p12, %p19443_p11 }
 0xb28   : > { %p19446_p0 = pnand %p19445_p13, %p19439_p8 }
 0xb2a   : > { %19449 = shalt.err (!%p19446_p0)
}
 0xb2b   : > { %19310 = dma.vmem_to_hbm [thread:$0]  (%p19618_p5), %s22742_s19, 16, %s22740_s28, %s17106_s16  }
 0xb2c PF: > { %p19316_p1 = scmp.ge.s32.totalorder %s19484_s24, 2  ;;  %s17130_s0 = sand.u32 1, %s19472_s21  }
 0xb2d   : > { %s17131_s1 = scalar_lea.sflag [#allocation3], %s17130_s0 }
 0xb2e   : > { %p19313_p2 = pnand %p19316_p1, %p19622_p6 }
 0xb30   : > { %19467 = dma.done.wait (!%p19313_p2), %s17131_s1, 16  }
 0xb31   : > { %19469 = vsyncadd (!%p19313_p2), %s17131_s1, 4294967280  ;;  %p22_p3 = scmp.ge.s32.totalorder %s19605_s27, 4   ;;  %s22856_s21 = smov %s19476_s22 }
 0xb32   : > { %s22857_s22 = smov %s19480_s23  ;;  %s22858_s23 = smov %s19616_s30 }
 0xb33   : > { %s22859_s24 = smov %s19605_s27  ;;  %24 = sbr.rel (!%p22_p3) target bundleno = 6 (0x6), region = 166 }
 0xb3a   :  { %17135 = vsyncpa [#allocation3], 1 }
 0xb3b   :  { %17137 = vsyncpa [#allocation3 + $0x1], 1 }

</bundles_post_ra>
